<compile_context>
chip_gen: v7x
topology: tpu7x:2x2x1
jax: 0.10.0
libtpu: 0.0.40
codegen_flags: <defaults>
</compile_context>

<pallas_src>
import math

import numpy as np
import jax
import jax.numpy as jnp
from jax.experimental import pallas as pl
from jax.experimental.pallas import tpu as pltpu


LANE = 128   # channel padding target (vreg lane width)


# ----------------------------------------------------------------------------
# Parameter construction (deterministic, in-script — synthetic weights).
# ----------------------------------------------------------------------------
def make_gabor_kernels(in_channels, kernel_size, directions, frequencies):
    """Synthetic stand-in for make_oriented_map_stack_phases.

    Produces (directions+1) * len(frequencies) * 2 (cos/sin phase) gabor
    filters, replicated across input channels.
    Returned layout: (KS, KS, Cin, Kcount).
    """
    half = kernel_size // 2
    coords = jnp.arange(kernel_size, dtype=jnp.float32) - float(half)
    yy, xx = jnp.meshgrid(coords, coords, indexing="ij")
    n_dirs = directions + 1
    filters = []
    for f in frequencies:
        sigma = max(min(2.0 / f, kernel_size / 2.0), 1.0)
        env = jnp.exp(-(xx ** 2 + yy ** 2) / (2.0 * sigma ** 2))
        for d in range(n_dirs):
            theta = math.pi * d / n_dirs
            rot = xx * math.cos(theta) + yy * math.sin(theta)
            arg = 2.0 * math.pi * f * rot
            for g in (env * jnp.cos(arg), env * jnp.sin(arg)):
                g = g - jnp.mean(g)
                g = g / (jnp.sqrt(jnp.sum(g ** 2)) + 1e-6)
                filters.append(g)
    bank = jnp.stack(filters, axis=-1)                    # (KS, KS, Kcount)
    w = jnp.broadcast_to(
        bank[:, :, None, :],
        (kernel_size, kernel_size, in_channels, bank.shape[-1]),
    )
    return (w / float(in_channels)).astype(jnp.float32)


def init_params(key, in_channels, kernel_size=11, directions=7,
                frequencies=(2.0, 1.0, 0.5, 0.25, 0.125)):
    w_gabor = make_gabor_kernels(in_channels, kernel_size, directions,
                                 list(frequencies))
    K = w_gabor.shape[-1]            # (directions+1) * n_freq * 2  -> 80
    Ksq = K // 8                     # squeeze channels
    Cout = K // 2                    # conv_2 out_channels (out_channels=None)
    ks = jax.random.split(key, 11)
    nrm = lambda k, s: (0.1 * jax.random.normal(k, s)).astype(jnp.float32)
    return dict(
        w_pre=nrm(ks[0], (in_channels, in_channels)),
        b_pre=nrm(ks[1], (1, in_channels)),
        w_gabor=w_gabor,
        b_gabor=nrm(ks[2], (1, K)),
        w_fc1=nrm(ks[3], (K, Ksq)),
        b_fc1=nrm(ks[4], (1, Ksq)),
        w_fc2=nrm(ks[5], (Ksq, K)),
        b_fc2=nrm(ks[6], (1, K)),
        w_c2=nrm(ks[7], (K, Cout)),
        b_c2=nrm(ks[8], (1, Cout)),
        w_sc=nrm(ks[9], (in_channels, Cout)),
        b_sc=nrm(ks[10], (1, Cout)),
    )


# ----------------------------------------------------------------------------
# Trace-time weight algebra: fold conv_pre into the gabor bank + lane padding.
# ----------------------------------------------------------------------------
def _fold_and_pad_params(params, kp=LANE, sp=LANE, cp=LANE):
    w_pre, b_pre = params["w_pre"], params["b_pre"]
    w_gab = params["w_gabor"]                             # (KS, KS, Cin, K)
    KS, _, Cin, K = w_gab.shape

    # Fold the 1x1 conv_pre into the fixed gabor bank.  Valid because the
    # pointwise affine map commutes with replicate padding:
    #   conv1(conv_pre(x)) = sum_{kh,kw} x_pad @ (w_pre @ w_g[kh,kw])
    #                        + b_pre @ sum_{kh,kw} w_g[kh,kw] + b_g
    w_fold = jnp.einsum("ic,hwck->hwik", w_pre, w_gab)    # (KS, KS, Cin, K)
    b_fold = params["b_gabor"] + b_pre @ jnp.sum(w_gab, axis=(0, 1))   # (1,K)

    def pad2(a, rows, cols):
        return jnp.pad(a, ((0, rows - a.shape[0]), (0, cols - a.shape[1])))

    # per-kh matrices with (kw, cin) flattened onto the contraction axis,
    # zero-padded to kp lanes, cast to bf16 (MXU-native input dtype).
    wg = jnp.pad(w_fold.reshape(KS, KS * Cin, K),
                 ((0, 0), (0, 0), (0, kp - K))).astype(jnp.bfloat16)

    return dict(
        wg=wg,                                            # (KS, KS*Cin, kp) bf16
        bg=pad2(b_fold, 1, kp),                           # (1, kp)
        wfc1=pad2(params["w_fc1"], kp, sp),               # (kp, sp)
        bfc1=pad2(params["b_fc1"], 1, sp),
        wfc2=pad2(params["w_fc2"], sp, kp),               # (sp, kp)
        bfc2=pad2(params["b_fc2"], 1, kp),
        wc2=pad2(params["w_c2"], kp, cp).astype(jnp.bfloat16),   # (kp, cp)
        bc2=pad2(params["b_c2"], 1, cp),
        wsc=pad2(params["w_sc"], Cin, cp).astype(jnp.bfloat16),  # (Cin, cp)
        bsc=pad2(params["b_sc"], 1, cp),
    )


# ----------------------------------------------------------------------------
# Pallas kernel.
# ----------------------------------------------------------------------------
def _avgpool_3x3_s2(x):
    """AvgPool2d(kernel_size=3, stride=2, padding=1, count_include_pad=True)
    on an NHWC value, as a separable (3 + 3)-tap shifted sum (pure VPU work,
    no pooling matrix, no strided slices on the lane axis)."""
    B, H, W, C = x.shape
    Ho, Wo = H // 2, W // 2
    # pool along H: taps {2ho-1, 2ho, 2ho+1}, zero pad at h = -1.
    xh = x.reshape(B, Ho, 2, W, C)
    ev, od = xh[:, :, 0], xh[:, :, 1]                      # (B, Ho, W, C)
    od_up = jnp.concatenate([jnp.zeros_like(od[:, :1]), od[:, :-1]], axis=1)
    th = (ev + od + od_up) * (1.0 / 3.0)                   # (B, Ho, W, C)
    # pool along W.
    tw = th.reshape(B, Ho, Wo, 2, C)
    evw, odw = tw[:, :, :, 0], tw[:, :, :, 1]              # (B, Ho, Wo, C)
    odw_up = jnp.concatenate(
        [jnp.zeros_like(odw[:, :, :1]), odw[:, :, :-1]], axis=2)
    return (evw + odw + odw_up) * (1.0 / 3.0)              # (B, Ho, Wo, C)


def _oriented_powermap_kernel(
    xw_ref,               # (B, Hp, W, KS*Cin)  kw-grouped padded input, f32
    xo_ref,               # (B, H, W, Cin)      original unpadded input, f32
    wg_ref,               # (KS, KS*Cin, Kp)    folded conv_pre+gabor, bf16
    bg_ref,               # (1, Kp)
    wfc1_ref, bfc1_ref,   # (Kp, Sp), (1, Sp)
    wfc2_ref, bfc2_ref,   # (Sp, Kp), (1, Kp)
    wc2_ref, bc2_ref,     # (Kp, Cp) bf16, (1, Cp)
    wsc_ref,              # (Cin, Cp) bf16
    scb_ref,              # (Ho, Wo, Cp) shortcut bias map (border-corrected)
    out_ref,              # (B, Ho, Wo, Cp)
    acc_ref,              # VMEM scratch (B*H*W, Kp) f32
):
    B, Hp, W, KSC = xw_ref.shape
    KS, _, Kp = wg_ref.shape
    H = Hp - (KS - 1)
    Ho, Wo = H // 2, W // 2
    Cp = wc2_ref.shape[1]
    Cin = xo_ref.shape[3]

    # --- conv_pre ∘ conv_1 (folded gabor conv) + ReLU ------------------------
    # KS matmuls with contraction KS*Cin, bf16 inputs, f32 accumulation into a
    # VMEM scratch (bounds the accumulator live range across the unroll).
    xw = xw_ref[...].astype(jnp.bfloat16)
    for kh in range(KS):
        patch = xw[:, kh:kh + H].reshape(B * H * W, KSC)
        term = jnp.dot(patch, wg_ref[kh], preferred_element_type=jnp.float32)
        if kh == 0:
            acc_ref[...] = term
        else:
            acc_ref[...] += term
    feat = jnp.maximum(acc_ref[...] + bg_ref[...], 0.0)    # (B*H*W, Kp)

    # --- change_res: separable AvgPool2d(3, 2, 1) ----------------------------
    pooled = _avgpool_3x3_s2(feat.reshape(B, H, W, Kp))    # (B, Ho, Wo, Kp)

    # --- SqueezeExcitation (global mean -> fc1 -> ReLU -> fc2 -> sigmoid) ----
    s = jnp.mean(pooled, axis=(1, 2))                      # (B, Kp)
    z = jnp.maximum(
        jnp.dot(s, wfc1_ref[...], preferred_element_type=jnp.float32)
        + bfc1_ref[...], 0.0)                              # (B, Sp)
    g = jax.nn.sigmoid(
        jnp.dot(z, wfc2_ref[...], preferred_element_type=jnp.float32)
        + bfc2_ref[...])                                   # (B, Kp)
    scaled = pooled * g[:, None, None, :]                  # (B, Ho, Wo, Kp)

    # --- conv_2 (1x1) + ReLU --------------------------------------------------
    main = jnp.maximum(
        jnp.dot(scaled.reshape(B * Ho * Wo, Kp).astype(jnp.bfloat16),
                wc2_ref[...], preferred_element_type=jnp.float32)
        + bc2_ref[...], 0.0)                               # (B*Ho*Wo, Cp)
    main = main.reshape(B, Ho, Wo, Cp)

    # --- shortcut: pool, then 1x1 conv (commuted), exact bias map -------------
    sc_pool = _avgpool_3x3_s2(xo_ref[...])                 # (B, Ho, Wo, Cin)
    sc = jnp.dot(sc_pool.reshape(B * Ho * Wo, Cin).astype(jnp.bfloat16),
                 wsc_ref[...], preferred_element_type=jnp.float32)
    sc = sc.reshape(B, Ho, Wo, Cp) + scb_ref[...][None]    # (B, Ho, Wo, Cp)

    out_ref[...] = (0.5 * (main + sc)).astype(out_ref.dtype)


# ----------------------------------------------------------------------------
# Wrapper: layout plumbing + pallas_call.
# ----------------------------------------------------------------------------
def oriented_powermap_forward(x_nchw, params, *, batch_tile=1):
    packed = _fold_and_pad_params(params)
    KS = params["w_gabor"].shape[0]
    Cin = params["w_gabor"].shape[2]
    Cout = params["w_c2"].shape[1]
    kp = packed["wg"].shape[-1]
    sp = packed["wfc1"].shape[-1]
    cp = packed["wc2"].shape[-1]
    pad = KS // 2

    x = jnp.transpose(x_nchw, (0, 2, 3, 1)).astype(jnp.float32)    # NHWC
    N, H, W, _ = x.shape
    assert H % 2 == 0 and W % 2 == 0
    assert N % batch_tile == 0
    Ho, Wo = H // 2, W // 2
    Hp = H + 2 * pad
    KSC = KS * Cin
    BT = batch_tile

    # Replicate padding + kw-grouping of the gabor taps onto the lane axis:
    #   xw[n, h, w, kw*Cin + c] = x_pad[n, h, w + kw, c]
    # (layout plumbing only; the conv itself runs inside the kernel).
    xp = jnp.pad(x, ((0, 0), (pad, pad), (pad, pad), (0, 0)), mode="edge")
    xw = jnp.concatenate([xp[:, :, kw:kw + W, :] for kw in range(KS)], axis=-1)

    # AvgPool(count_include_pad=True) applied after a 1x1 conv scales the bias
    # by (#valid taps)/9 at the borders; precompute that map once.
    def frac(n):
        f = np.full((n // 2,), 1.0, dtype=np.float32)
        f[0] = 2.0 / 3.0
        return f
    bscale = jnp.asarray(np.outer(frac(H), frac(W)), dtype=jnp.float32)
    scb = bscale[:, :, None] * packed["bsc"][0][None, None, :]     # (Ho,Wo,Cp)

    weights = [packed["wg"], packed["bg"], packed["wfc1"], packed["bfc1"],
               packed["wfc2"], packed["bfc2"], packed["wc2"], packed["bc2"],
               packed["wsc"], scb]

    def full_spec(a):
        nd = a.ndim
        return pl.BlockSpec(a.shape, lambda n, _nd=nd: (0,) * _nd)

    grid_spec = pltpu.PrefetchScalarGridSpec(
        num_scalar_prefetch=0,
        grid=(N // BT,),
        in_specs=(
            [pl.BlockSpec((BT, Hp, W, KSC), lambda n: (n, 0, 0, 0)),
             pl.BlockSpec((BT, H, W, Cin), lambda n: (n, 0, 0, 0))]
            + [full_spec(w) for w in weights]
        ),
        out_specs=pl.BlockSpec((BT, Ho, Wo, cp), lambda n: (n, 0, 0, 0)),
        scratch_shapes=[pltpu.VMEM((BT * H * W, kp), jnp.float32)],
    )

    flops = N * (KS * H * W * KSC * kp * 2          # gabor conv (dominant)
                 + 8 * H * W * kp                   # separable pooling (VPU)
                 + Ho * Wo * kp * cp * 2            # conv_2
                 + Ho * Wo * Cin * cp * 2           # shortcut 1x1
                 + 2 * kp * sp * 2)                 # SE fcs
    bytes_accessed = (int(xw.size) + int(x.size) + N * Ho * Wo * cp) * 4 \
        + sum(int(np.prod(w.shape)) * int(w.dtype.itemsize) for w in weights)

    out_nhwc = pl.pallas_call(
        _oriented_powermap_kernel,
        out_shape=jax.ShapeDtypeStruct((N, Ho, Wo, cp), jnp.float32),
        grid_spec=grid_spec,
        compiler_params=pltpu.CompilerParams(
            dimension_semantics=("parallel",),       # v7x: shard batch over TCs
            vmem_limit_bytes=48 * 1024 * 1024),
        cost_estimate=pl.CostEstimate(
            flops=int(flops),
            transcendentals=int(N * kp),
            bytes_accessed=int(bytes_accessed)),
    )(xw, x, *weights)

    # Slice off the lane padding and go back to NCHW.
    return jnp.transpose(out_nhwc[..., :Cout], (0, 3, 1, 2))


# ----------------------------------------------------------------------------
if __name__ == "__main__":
    key = jax.random.PRNGKey(0)
    k_x, k_p = jax.random.split(key)

    N, Cin, Hs, Ws = 2, 4, 16, 16
    x = jax.random.normal(k_x, (N, Cin, Hs, Ws), dtype=jnp.float32)

    params = init_params(k_p, in_channels=Cin, kernel_size=11, directions=7)
    Cout = params["w_c2"].shape[1]            # kernel_count // 2 = 40

    fwd = jax.jit(oriented_powermap_forward)
    out = fwd(x, params)
    out = jax.block_until_ready(out)

    assert out.shape == (N, Cout, Hs // 2, Ws // 2), out.shape
    assert bool(jnp.all(jnp.isfinite(out)))
    print("KERNEL_OK")
</pallas_src>

<mosaic_0001>
module attributes {stable_mosaic.version = 11 : i64} {
  func.func @_oriented_powermap_kernel(%arg0: i32, %arg1: memref<1x26x16x44xf32, #tpu.memory_space<vmem>>, %arg2: memref<1x16x16x4xf32, #tpu.memory_space<vmem>>, %arg3: memref<11x44x128xbf16, #tpu.memory_space<vmem>>, %arg4: memref<1x128xf32, #tpu.memory_space<vmem>>, %arg5: memref<128x128xf32, #tpu.memory_space<vmem>>, %arg6: memref<1x128xf32, #tpu.memory_space<vmem>>, %arg7: memref<128x128xf32, #tpu.memory_space<vmem>>, %arg8: memref<1x128xf32, #tpu.memory_space<vmem>>, %arg9: memref<128x128xbf16, #tpu.memory_space<vmem>>, %arg10: memref<1x128xf32, #tpu.memory_space<vmem>>, %arg11: memref<4x128xbf16, #tpu.memory_space<vmem>>, %arg12: memref<8x8x128xf32, #tpu.memory_space<vmem>>, %arg13: memref<1x8x8x128xf32, #tpu.memory_space<vmem>>, %arg14: memref<256x128xf32, #tpu.memory_space<vmem>>) attributes {dimension_semantics = [#tpu.dimension_semantics<parallel>], iteration_bounds = array<i64: 2>, scalar_prefetch = 0 : i64, scratch_operands = 1 : i64, tpu.core_type = #tpu.core_type<tc>, window_params = [{transform_indices = @transform_0, window_bounds = array<i64: 1, 26, 16, 44>}, {transform_indices = @transform_1, window_bounds = array<i64: 1, 16, 16, 4>}, {pipeline_mode = #tpu.pipeline_mode<synchronous>, transform_indices = @transform_2, window_bounds = array<i64: 11, 44, 128>}, {pipeline_mode = #tpu.pipeline_mode<synchronous>, transform_indices = @transform_3, window_bounds = array<i64: 1, 128>}, {pipeline_mode = #tpu.pipeline_mode<synchronous>, transform_indices = @transform_4, window_bounds = array<i64: 128, 128>}, {pipeline_mode = #tpu.pipeline_mode<synchronous>, transform_indices = @transform_5, window_bounds = array<i64: 1, 128>}, {pipeline_mode = #tpu.pipeline_mode<synchronous>, transform_indices = @transform_6, window_bounds = array<i64: 128, 128>}, {pipeline_mode = #tpu.pipeline_mode<synchronous>, transform_indices = @transform_7, window_bounds = array<i64: 1, 128>}, {pipeline_mode = #tpu.pipeline_mode<synchronous>, transform_indices = @transform_8, window_bounds = array<i64: 128, 128>}, {pipeline_mode = #tpu.pipeline_mode<synchronous>, transform_indices = @transform_9, window_bounds = array<i64: 1, 128>}, {pipeline_mode = #tpu.pipeline_mode<synchronous>, transform_indices = @transform_10, window_bounds = array<i64: 4, 128>}, {pipeline_mode = #tpu.pipeline_mode<synchronous>, transform_indices = @transform_11, window_bounds = array<i64: 8, 8, 128>}, {transform_indices = @transform_12, window_bounds = array<i64: 1, 8, 8, 128>}]} {
    %c0 = arith.constant 0 : index
    %c0_0 = arith.constant 0 : index
    %c0_1 = arith.constant 0 : index
    %c0_2 = arith.constant 0 : index
    %0 = vector.load %arg1[%c0, %c0_0, %c0_1, %c0_2] : memref<1x26x16x44xf32, #tpu.memory_space<vmem>>, vector<1x26x16x44xf32>
    %1 = arith.truncf %0 : vector<1x26x16x44xf32> to vector<1x26x16x44xbf16>
    %2 = vector.extract_strided_slice %1 {offsets = [0, 0, 0, 0], sizes = [1, 16, 16, 44], strides = [1, 1, 1, 1]} : vector<1x26x16x44xbf16> to vector<1x16x16x44xbf16>
    %3 = vector.shape_cast %2 : vector<1x16x16x44xbf16> to vector<256x44xbf16>
    %c0_3 = arith.constant 0 : index
    %c0_4 = arith.constant 0 : index
    %c0_5 = arith.constant 0 : index
    %4 = vector.load %arg3[%c0_3, %c0_4, %c0_5] : memref<11x44x128xbf16, #tpu.memory_space<vmem>>, vector<1x44x128xbf16>
    %5 = vector.shape_cast %4 : vector<1x44x128xbf16> to vector<44x128xbf16>
    %cst = arith.constant dense<0.000000e+00> : vector<256x128xf32>
    %6 = tpu.matmul %3, %5, %cst {dimension_numbers = #tpu.dot_dimension_numbers<[1], [0], [0], [1], [0, 0, 1, 1], [], []>} : vector<256x44xbf16>, vector<44x128xbf16>, vector<256x128xf32> -> vector<256x128xf32>
    %c0_6 = arith.constant 0 : index
    %c0_7 = arith.constant 0 : index
    %7 = vector.load %arg14[%c0_6, %c0_7] : memref<256x128xf32, #tpu.memory_space<vmem>>, vector<256x128xf32>
    tpu.vector_store %arg14[%c0_6, %c0_7], %6 {strides = array<i32>} : memref<256x128xf32, #tpu.memory_space<vmem>>, vector<256x128xf32>,
    %8 = vector.extract_strided_slice %1 {offsets = [0, 1, 0, 0], sizes = [1, 16, 16, 44], strides = [1, 1, 1, 1]} : vector<1x26x16x44xbf16> to vector<1x16x16x44xbf16>
    %9 = vector.shape_cast %8 : vector<1x16x16x44xbf16> to vector<256x44xbf16>
    %c1 = arith.constant 1 : index
    %c0_8 = arith.constant 0 : index
    %c0_9 = arith.constant 0 : index
    %10 = vector.load %arg3[%c1, %c0_8, %c0_9] : memref<11x44x128xbf16, #tpu.memory_space<vmem>>, vector<1x44x128xbf16>
    %11 = vector.shape_cast %10 : vector<1x44x128xbf16> to vector<44x128xbf16>
    %cst_10 = arith.constant dense<0.000000e+00> : vector<256x128xf32>
    %12 = tpu.matmul %9, %11, %cst_10 {dimension_numbers = #tpu.dot_dimension_numbers<[1], [0], [0], [1], [0, 0, 1, 1], [], []>} : vector<256x44xbf16>, vector<44x128xbf16>, vector<256x128xf32> -> vector<256x128xf32>
    %c0_11 = arith.constant 0 : index
    %c0_12 = arith.constant 0 : index
    %13 = vector.load %arg14[%c0_11, %c0_12] : memref<256x128xf32, #tpu.memory_space<vmem>>, vector<256x128xf32>
    %14 = arith.addf %13, %12 : vector<256x128xf32>
    %c0_13 = arith.constant 0 : index
    %c0_14 = arith.constant 0 : index
    %15 = vector.load %arg14[%c0_13, %c0_14] : memref<256x128xf32, #tpu.memory_space<vmem>>, vector<256x128xf32>
    tpu.vector_store %arg14[%c0_13, %c0_14], %14 {strides = array<i32>} : memref<256x128xf32, #tpu.memory_space<vmem>>, vector<256x128xf32>,
    %16 = vector.extract_strided_slice %1 {offsets = [0, 2, 0, 0], sizes = [1, 16, 16, 44], strides = [1, 1, 1, 1]} : vector<1x26x16x44xbf16> to vector<1x16x16x44xbf16>
    %17 = vector.shape_cast %16 : vector<1x16x16x44xbf16> to vector<256x44xbf16>
    %c2 = arith.constant 2 : index
    %c0_15 = arith.constant 0 : index
    %c0_16 = arith.constant 0 : index
    %18 = vector.load %arg3[%c2, %c0_15, %c0_16] : memref<11x44x128xbf16, #tpu.memory_space<vmem>>, vector<1x44x128xbf16>
    %19 = vector.shape_cast %18 : vector<1x44x128xbf16> to vector<44x128xbf16>
    %cst_17 = arith.constant dense<0.000000e+00> : vector<256x128xf32>
    %20 = tpu.matmul %17, %19, %cst_17 {dimension_numbers = #tpu.dot_dimension_numbers<[1], [0], [0], [1], [0, 0, 1, 1], [], []>} : vector<256x44xbf16>, vector<44x128xbf16>, vector<256x128xf32> -> vector<256x128xf32>
    %c0_18 = arith.constant 0 : index
    %c0_19 = arith.constant 0 : index
    %21 = vector.load %arg14[%c0_18, %c0_19] : memref<256x128xf32, #tpu.memory_space<vmem>>, vector<256x128xf32>
    %22 = arith.addf %21, %20 : vector<256x128xf32>
    %c0_20 = arith.constant 0 : index
    %c0_21 = arith.constant 0 : index
    %23 = vector.load %arg14[%c0_20, %c0_21] : memref<256x128xf32, #tpu.memory_space<vmem>>, vector<256x128xf32>
    tpu.vector_store %arg14[%c0_20, %c0_21], %22 {strides = array<i32>} : memref<256x128xf32, #tpu.memory_space<vmem>>, vector<256x128xf32>,
    %24 = vector.extract_strided_slice %1 {offsets = [0, 3, 0, 0], sizes = [1, 16, 16, 44], strides = [1, 1, 1, 1]} : vector<1x26x16x44xbf16> to vector<1x16x16x44xbf16>
    %25 = vector.shape_cast %24 : vector<1x16x16x44xbf16> to vector<256x44xbf16>
    %c3 = arith.constant 3 : index
    %c0_22 = arith.constant 0 : index
    %c0_23 = arith.constant 0 : index
    %26 = vector.load %arg3[%c3, %c0_22, %c0_23] : memref<11x44x128xbf16, #tpu.memory_space<vmem>>, vector<1x44x128xbf16>
    %27 = vector.shape_cast %26 : vector<1x44x128xbf16> to vector<44x128xbf16>
    %cst_24 = arith.constant dense<0.000000e+00> : vector<256x128xf32>
    %28 = tpu.matmul %25, %27, %cst_24 {dimension_numbers = #tpu.dot_dimension_numbers<[1], [0], [0], [1], [0, 0, 1, 1], [], []>} : vector<256x44xbf16>, vector<44x128xbf16>, vector<256x128xf32> -> vector<256x128xf32>
    %c0_25 = arith.constant 0 : index
    %c0_26 = arith.constant 0 : index
    %29 = vector.load %arg14[%c0_25, %c0_26] : memref<256x128xf32, #tpu.memory_space<vmem>>, vector<256x128xf32>
    %30 = arith.addf %29, %28 : vector<256x128xf32>
    %c0_27 = arith.constant 0 : index
    %c0_28 = arith.constant 0 : index
    %31 = vector.load %arg14[%c0_27, %c0_28] : memref<256x128xf32, #tpu.memory_space<vmem>>, vector<256x128xf32>
    tpu.vector_store %arg14[%c0_27, %c0_28], %30 {strides = array<i32>} : memref<256x128xf32, #tpu.memory_space<vmem>>, vector<256x128xf32>,
    %32 = vector.extract_strided_slice %1 {offsets = [0, 4, 0, 0], sizes = [1, 16, 16, 44], strides = [1, 1, 1, 1]} : vector<1x26x16x44xbf16> to vector<1x16x16x44xbf16>
    %33 = vector.shape_cast %32 : vector<1x16x16x44xbf16> to vector<256x44xbf16>
    %c4 = arith.constant 4 : index
    %c0_29 = arith.constant 0 : index
    %c0_30 = arith.constant 0 : index
    %34 = vector.load %arg3[%c4, %c0_29, %c0_30] : memref<11x44x128xbf16, #tpu.memory_space<vmem>>, vector<1x44x128xbf16>
    %35 = vector.shape_cast %34 : vector<1x44x128xbf16> to vector<44x128xbf16>
    %cst_31 = arith.constant dense<0.000000e+00> : vector<256x128xf32>
    %36 = tpu.matmul %33, %35, %cst_31 {dimension_numbers = #tpu.dot_dimension_numbers<[1], [0], [0], [1], [0, 0, 1, 1], [], []>} : vector<256x44xbf16>, vector<44x128xbf16>, vector<256x128xf32> -> vector<256x128xf32>
    %c0_32 = arith.constant 0 : index
    %c0_33 = arith.constant 0 : index
    %37 = vector.load %arg14[%c0_32, %c0_33] : memref<256x128xf32, #tpu.memory_space<vmem>>, vector<256x128xf32>
    %38 = arith.addf %37, %36 : vector<256x128xf32>
    %c0_34 = arith.constant 0 : index
    %c0_35 = arith.constant 0 : index
    %39 = vector.load %arg14[%c0_34, %c0_35] : memref<256x128xf32, #tpu.memory_space<vmem>>, vector<256x128xf32>
    tpu.vector_store %arg14[%c0_34, %c0_35], %38 {strides = array<i32>} : memref<256x128xf32, #tpu.memory_space<vmem>>, vector<256x128xf32>,
    %40 = vector.extract_strided_slice %1 {offsets = [0, 5, 0, 0], sizes = [1, 16, 16, 44], strides = [1, 1, 1, 1]} : vector<1x26x16x44xbf16> to vector<1x16x16x44xbf16>
    %41 = vector.shape_cast %40 : vector<1x16x16x44xbf16> to vector<256x44xbf16>
    %c5 = arith.constant 5 : index
    %c0_36 = arith.constant 0 : index
    %c0_37 = arith.constant 0 : index
    %42 = vector.load %arg3[%c5, %c0_36, %c0_37] : memref<11x44x128xbf16, #tpu.memory_space<vmem>>, vector<1x44x128xbf16>
    %43 = vector.shape_cast %42 : vector<1x44x128xbf16> to vector<44x128xbf16>
    %cst_38 = arith.constant dense<0.000000e+00> : vector<256x128xf32>
    %44 = tpu.matmul %41, %43, %cst_38 {dimension_numbers = #tpu.dot_dimension_numbers<[1], [0], [0], [1], [0, 0, 1, 1], [], []>} : vector<256x44xbf16>, vector<44x128xbf16>, vector<256x128xf32> -> vector<256x128xf32>
    %c0_39 = arith.constant 0 : index
    %c0_40 = arith.constant 0 : index
    %45 = vector.load %arg14[%c0_39, %c0_40] : memref<256x128xf32, #tpu.memory_space<vmem>>, vector<256x128xf32>
    %46 = arith.addf %45, %44 : vector<256x128xf32>
    %c0_41 = arith.constant 0 : index
    %c0_42 = arith.constant 0 : index
    %47 = vector.load %arg14[%c0_41, %c0_42] : memref<256x128xf32, #tpu.memory_space<vmem>>, vector<256x128xf32>
    tpu.vector_store %arg14[%c0_41, %c0_42], %46 {strides = array<i32>} : memref<256x128xf32, #tpu.memory_space<vmem>>, vector<256x128xf32>,
    %48 = vector.extract_strided_slice %1 {offsets = [0, 6, 0, 0], sizes = [1, 16, 16, 44], strides = [1, 1, 1, 1]} : vector<1x26x16x44xbf16> to vector<1x16x16x44xbf16>
    %49 = vector.shape_cast %48 : vector<1x16x16x44xbf16> to vector<256x44xbf16>
    %c6 = arith.constant 6 : index
    %c0_43 = arith.constant 0 : index
    %c0_44 = arith.constant 0 : index
    %50 = vector.load %arg3[%c6, %c0_43, %c0_44] : memref<11x44x128xbf16, #tpu.memory_space<vmem>>, vector<1x44x128xbf16>
    %51 = vector.shape_cast %50 : vector<1x44x128xbf16> to vector<44x128xbf16>
    %cst_45 = arith.constant dense<0.000000e+00> : vector<256x128xf32>
    %52 = tpu.matmul %49, %51, %cst_45 {dimension_numbers = #tpu.dot_dimension_numbers<[1], [0], [0], [1], [0, 0, 1, 1], [], []>} : vector<256x44xbf16>, vector<44x128xbf16>, vector<256x128xf32> -> vector<256x128xf32>
    %c0_46 = arith.constant 0 : index
    %c0_47 = arith.constant 0 : index
    %53 = vector.load %arg14[%c0_46, %c0_47] : memref<256x128xf32, #tpu.memory_space<vmem>>, vector<256x128xf32>
    %54 = arith.addf %53, %52 : vector<256x128xf32>
    %c0_48 = arith.constant 0 : index
    %c0_49 = arith.constant 0 : index
    %55 = vector.load %arg14[%c0_48, %c0_49] : memref<256x128xf32, #tpu.memory_space<vmem>>, vector<256x128xf32>
    tpu.vector_store %arg14[%c0_48, %c0_49], %54 {strides = array<i32>} : memref<256x128xf32, #tpu.memory_space<vmem>>, vector<256x128xf32>,
    %56 = vector.extract_strided_slice %1 {offsets = [0, 7, 0, 0], sizes = [1, 16, 16, 44], strides = [1, 1, 1, 1]} : vector<1x26x16x44xbf16> to vector<1x16x16x44xbf16>
    %57 = vector.shape_cast %56 : vector<1x16x16x44xbf16> to vector<256x44xbf16>
    %c7 = arith.constant 7 : index
    %c0_50 = arith.constant 0 : index
    %c0_51 = arith.constant 0 : index
    %58 = vector.load %arg3[%c7, %c0_50, %c0_51] : memref<11x44x128xbf16, #tpu.memory_space<vmem>>, vector<1x44x128xbf16>
    %59 = vector.shape_cast %58 : vector<1x44x128xbf16> to vector<44x128xbf16>
    %cst_52 = arith.constant dense<0.000000e+00> : vector<256x128xf32>
    %60 = tpu.matmul %57, %59, %cst_52 {dimension_numbers = #tpu.dot_dimension_numbers<[1], [0], [0], [1], [0, 0, 1, 1], [], []>} : vector<256x44xbf16>, vector<44x128xbf16>, vector<256x128xf32> -> vector<256x128xf32>
    %c0_53 = arith.constant 0 : index
    %c0_54 = arith.constant 0 : index
    %61 = vector.load %arg14[%c0_53, %c0_54] : memref<256x128xf32, #tpu.memory_space<vmem>>, vector<256x128xf32>
    %62 = arith.addf %61, %60 : vector<256x128xf32>
    %c0_55 = arith.constant 0 : index
    %c0_56 = arith.constant 0 : index
    %63 = vector.load %arg14[%c0_55, %c0_56] : memref<256x128xf32, #tpu.memory_space<vmem>>, vector<256x128xf32>
    tpu.vector_store %arg14[%c0_55, %c0_56], %62 {strides = array<i32>} : memref<256x128xf32, #tpu.memory_space<vmem>>, vector<256x128xf32>,
    %64 = vector.extract_strided_slice %1 {offsets = [0, 8, 0, 0], sizes = [1, 16, 16, 44], strides = [1, 1, 1, 1]} : vector<1x26x16x44xbf16> to vector<1x16x16x44xbf16>
    %65 = vector.shape_cast %64 : vector<1x16x16x44xbf16> to vector<256x44xbf16>
    %c8 = arith.constant 8 : index
    %c0_57 = arith.constant 0 : index
    %c0_58 = arith.constant 0 : index
    %66 = vector.load %arg3[%c8, %c0_57, %c0_58] : memref<11x44x128xbf16, #tpu.memory_space<vmem>>, vector<1x44x128xbf16>
    %67 = vector.shape_cast %66 : vector<1x44x128xbf16> to vector<44x128xbf16>
    %cst_59 = arith.constant dense<0.000000e+00> : vector<256x128xf32>
    %68 = tpu.matmul %65, %67, %cst_59 {dimension_numbers = #tpu.dot_dimension_numbers<[1], [0], [0], [1], [0, 0, 1, 1], [], []>} : vector<256x44xbf16>, vector<44x128xbf16>, vector<256x128xf32> -> vector<256x128xf32>
    %c0_60 = arith.constant 0 : index
    %c0_61 = arith.constant 0 : index
    %69 = vector.load %arg14[%c0_60, %c0_61] : memref<256x128xf32, #tpu.memory_space<vmem>>, vector<256x128xf32>
    %70 = arith.addf %69, %68 : vector<256x128xf32>
    %c0_62 = arith.constant 0 : index
    %c0_63 = arith.constant 0 : index
    %71 = vector.load %arg14[%c0_62, %c0_63] : memref<256x128xf32, #tpu.memory_space<vmem>>, vector<256x128xf32>
    tpu.vector_store %arg14[%c0_62, %c0_63], %70 {strides = array<i32>} : memref<256x128xf32, #tpu.memory_space<vmem>>, vector<256x128xf32>,
    %72 = vector.extract_strided_slice %1 {offsets = [0, 9, 0, 0], sizes = [1, 16, 16, 44], strides = [1, 1, 1, 1]} : vector<1x26x16x44xbf16> to vector<1x16x16x44xbf16>
    %73 = vector.shape_cast %72 : vector<1x16x16x44xbf16> to vector<256x44xbf16>
    %c9 = arith.constant 9 : index
    %c0_64 = arith.constant 0 : index
    %c0_65 = arith.constant 0 : index
    %74 = vector.load %arg3[%c9, %c0_64, %c0_65] : memref<11x44x128xbf16, #tpu.memory_space<vmem>>, vector<1x44x128xbf16>
    %75 = vector.shape_cast %74 : vector<1x44x128xbf16> to vector<44x128xbf16>
    %cst_66 = arith.constant dense<0.000000e+00> : vector<256x128xf32>
    %76 = tpu.matmul %73, %75, %cst_66 {dimension_numbers = #tpu.dot_dimension_numbers<[1], [0], [0], [1], [0, 0, 1, 1], [], []>} : vector<256x44xbf16>, vector<44x128xbf16>, vector<256x128xf32> -> vector<256x128xf32>
    %c0_67 = arith.constant 0 : index
    %c0_68 = arith.constant 0 : index
    %77 = vector.load %arg14[%c0_67, %c0_68] : memref<256x128xf32, #tpu.memory_space<vmem>>, vector<256x128xf32>
    %78 = arith.addf %77, %76 : vector<256x128xf32>
    %c0_69 = arith.constant 0 : index
    %c0_70 = arith.constant 0 : index
    %79 = vector.load %arg14[%c0_69, %c0_70] : memref<256x128xf32, #tpu.memory_space<vmem>>, vector<256x128xf32>
    tpu.vector_store %arg14[%c0_69, %c0_70], %78 {strides = array<i32>} : memref<256x128xf32, #tpu.memory_space<vmem>>, vector<256x128xf32>,
    %80 = vector.extract_strided_slice %1 {offsets = [0, 10, 0, 0], sizes = [1, 16, 16, 44], strides = [1, 1, 1, 1]} : vector<1x26x16x44xbf16> to vector<1x16x16x44xbf16>
    %81 = vector.shape_cast %80 : vector<1x16x16x44xbf16> to vector<256x44xbf16>
    %c10 = arith.constant 10 : index
    %c0_71 = arith.constant 0 : index
    %c0_72 = arith.constant 0 : index
    %82 = vector.load %arg3[%c10, %c0_71, %c0_72] : memref<11x44x128xbf16, #tpu.memory_space<vmem>>, vector<1x44x128xbf16>
    %83 = vector.shape_cast %82 : vector<1x44x128xbf16> to vector<44x128xbf16>
    %cst_73 = arith.constant dense<0.000000e+00> : vector<256x128xf32>
    %84 = tpu.matmul %81, %83, %cst_73 {dimension_numbers = #tpu.dot_dimension_numbers<[1], [0], [0], [1], [0, 0, 1, 1], [], []>} : vector<256x44xbf16>, vector<44x128xbf16>, vector<256x128xf32> -> vector<256x128xf32>
    %c0_74 = arith.constant 0 : index
    %c0_75 = arith.constant 0 : index
    %85 = vector.load %arg14[%c0_74, %c0_75] : memref<256x128xf32, #tpu.memory_space<vmem>>, vector<256x128xf32>
    %86 = arith.addf %85, %84 : vector<256x128xf32>
    %c0_76 = arith.constant 0 : index
    %c0_77 = arith.constant 0 : index
    %87 = vector.load %arg14[%c0_76, %c0_77] : memref<256x128xf32, #tpu.memory_space<vmem>>, vector<256x128xf32>
    tpu.vector_store %arg14[%c0_76, %c0_77], %86 {strides = array<i32>} : memref<256x128xf32, #tpu.memory_space<vmem>>, vector<256x128xf32>,
    %c0_78 = arith.constant 0 : index
    %c0_79 = arith.constant 0 : index
    %88 = vector.load %arg14[%c0_78, %c0_79] : memref<256x128xf32, #tpu.memory_space<vmem>>, vector<256x128xf32>
    %c0_80 = arith.constant 0 : index
    %c0_81 = arith.constant 0 : index
    %89 = vector.load %arg4[%c0_80, %c0_81] : memref<1x128xf32, #tpu.memory_space<vmem>>, vector<1x128xf32>
    %90 = vector.broadcast %89 : vector<1x128xf32> to vector<256x128xf32>
    %91 = arith.addf %88, %90 : vector<256x128xf32>
    %cst_82 = arith.constant 0.000000e+00 : f32
    %92 = vector.broadcast %cst_82 : f32 to vector<256x128xf32>
    %93 = arith.maximumf %91, %92 : vector<256x128xf32>
    %94 = vector.shape_cast %93 : vector<256x128xf32> to vector<1x16x16x128xf32>
    %95 = vector.shape_cast %94 : vector<1x16x16x128xf32> to vector<1x8x2x16x128xf32>
    %96 = vector.extract_strided_slice %95 {offsets = [0, 0, 0, 0, 0], sizes = [1, 8, 1, 16, 128], strides = [1, 1, 1, 1, 1]} : vector<1x8x2x16x128xf32> to vector<1x8x1x16x128xf32>
    %97 = vector.shape_cast %96 : vector<1x8x1x16x128xf32> to vector<1x8x16x128xf32>
    %98 = vector.extract_strided_slice %95 {offsets = [0, 0, 1, 0, 0], sizes = [1, 8, 1, 16, 128], strides = [1, 1, 1, 1, 1]} : vector<1x8x2x16x128xf32> to vector<1x8x1x16x128xf32>
    %99 = vector.shape_cast %98 : vector<1x8x1x16x128xf32> to vector<1x8x16x128xf32>
    %cst_83 = arith.constant 0.000000e+00 : f32
    %100 = vector.broadcast %cst_83 : f32 to vector<1x1x16x128xf32>
    %101 = vector.extract_strided_slice %99 {offsets = [0, 0, 0, 0], sizes = [1, 7, 16, 128], strides = [1, 1, 1, 1]} : vector<1x8x16x128xf32> to vector<1x7x16x128xf32>
    %102 = tpu.concatenate %100, %101 in 1 : vector<1x1x16x128xf32>, vector<1x7x16x128xf32> -> vector<1x8x16x128xf32>
    %103 = arith.addf %97, %99 : vector<1x8x16x128xf32>
    %104 = arith.addf %103, %102 : vector<1x8x16x128xf32>
    %cst_84 = arith.constant 0.333333343 : f32
    %105 = vector.broadcast %cst_84 : f32 to vector<1x8x16x128xf32>
    %106 = arith.mulf %104, %105 : vector<1x8x16x128xf32>
    %107 = vector.shape_cast %106 : vector<1x8x16x128xf32> to vector<1x8x8x2x128xf32>
    %108 = vector.extract_strided_slice %107 {offsets = [0, 0, 0, 0, 0], sizes = [1, 8, 8, 1, 128], strides = [1, 1, 1, 1, 1]} : vector<1x8x8x2x128xf32> to vector<1x8x8x1x128xf32>
    %109 = vector.shape_cast %108 : vector<1x8x8x1x128xf32> to vector<1x8x8x128xf32>
    %110 = vector.extract_strided_slice %107 {offsets = [0, 0, 0, 1, 0], sizes = [1, 8, 8, 1, 128], strides = [1, 1, 1, 1, 1]} : vector<1x8x8x2x128xf32> to vector<1x8x8x1x128xf32>
    %111 = vector.shape_cast %110 : vector<1x8x8x1x128xf32> to vector<1x8x8x128xf32>
    %cst_85 = arith.constant 0.000000e+00 : f32
    %112 = vector.broadcast %cst_85 : f32 to vector<1x8x1x128xf32>
    %113 = vector.extract_strided_slice %111 {offsets = [0, 0, 0, 0], sizes = [1, 8, 7, 128], strides = [1, 1, 1, 1]} : vector<1x8x8x128xf32> to vector<1x8x7x128xf32>
    %114 = tpu.concatenate %112, %113 in 2 : vector<1x8x1x128xf32>, vector<1x8x7x128xf32> -> vector<1x8x8x128xf32>
    %115 = arith.addf %109, %111 : vector<1x8x8x128xf32>
    %116 = arith.addf %115, %114 : vector<1x8x8x128xf32>
    %cst_86 = arith.constant 0.333333343 : f32
    %117 = vector.broadcast %cst_86 : f32 to vector<1x8x8x128xf32>
    %118 = arith.mulf %116, %117 : vector<1x8x8x128xf32>
    %cst_87 = arith.constant dense<0.000000e+00> : vector<1x128xf32>
    %119 = vector.multi_reduction <add>, %118, %cst_87 [1, 2] : vector<1x8x8x128xf32> to vector<1x128xf32>
    %cst_88 = arith.constant 6.400000e+01 : f32
    %120 = vector.broadcast %cst_88 : f32 to vector<1x128xf32>
    %121 = arith.divf %119, %120 : vector<1x128xf32>
    %c0_89 = arith.constant 0 : index
    %c0_90 = arith.constant 0 : index
    %122 = vector.load %arg5[%c0_89, %c0_90] : memref<128x128xf32, #tpu.memory_space<vmem>>, vector<128x128xf32>
    %cst_91 = arith.constant dense<0.000000e+00> : vector<1x128xf32>
    %123 = tpu.matmul %121, %122, %cst_91 {dimension_numbers = #tpu.dot_dimension_numbers<[1], [0], [0], [1], [0, 0, 1, 1], [], []>} : vector<1x128xf32>, vector<128x128xf32>, vector<1x128xf32> -> vector<1x128xf32>
    %c0_92 = arith.constant 0 : index
    %c0_93 = arith.constant 0 : index
    %124 = vector.load %arg6[%c0_92, %c0_93] : memref<1x128xf32, #tpu.memory_space<vmem>>, vector<1x128xf32>
    %125 = arith.addf %123, %124 : vector<1x128xf32>
    %cst_94 = arith.constant 0.000000e+00 : f32
    %126 = vector.broadcast %cst_94 : f32 to vector<1x128xf32>
    %127 = arith.maximumf %125, %126 : vector<1x128xf32>
    %c0_95 = arith.constant 0 : index
    %c0_96 = arith.constant 0 : index
    %128 = vector.load %arg7[%c0_95, %c0_96] : memref<128x128xf32, #tpu.memory_space<vmem>>, vector<128x128xf32>
    %cst_97 = arith.constant dense<0.000000e+00> : vector<1x128xf32>
    %129 = tpu.matmul %127, %128, %cst_97 {dimension_numbers = #tpu.dot_dimension_numbers<[1], [0], [0], [1], [0, 0, 1, 1], [], []>} : vector<1x128xf32>, vector<128x128xf32>, vector<1x128xf32> -> vector<1x128xf32>
    %c0_98 = arith.constant 0 : index
    %c0_99 = arith.constant 0 : index
    %130 = vector.load %arg8[%c0_98, %c0_99] : memref<1x128xf32, #tpu.memory_space<vmem>>, vector<1x128xf32>
    %131 = arith.addf %129, %130 : vector<1x128xf32>
    %132 = arith.negf %131 : vector<1x128xf32>
    %133 = math.exp %132 : vector<1x128xf32>
    %cst_100 = arith.constant 1.000000e+00 : f32
    %134 = vector.broadcast %cst_100 : f32 to vector<1x128xf32>
    %135 = arith.addf %134, %133 : vector<1x128xf32>
    %136 = arith.divf %134, %135 : vector<1x128xf32>
    %137 = vector.shape_cast %136 : vector<1x128xf32> to vector<1x1x1x128xf32>
    %138 = vector.broadcast %137 : vector<1x1x1x128xf32> to vector<1x8x8x128xf32>
    %139 = arith.mulf %118, %138 : vector<1x8x8x128xf32>
    %140 = vector.shape_cast %139 : vector<1x8x8x128xf32> to vector<64x128xf32>
    %141 = arith.truncf %140 : vector<64x128xf32> to vector<64x128xbf16>
    %c0_101 = arith.constant 0 : index
    %c0_102 = arith.constant 0 : index
    %142 = vector.load %arg9[%c0_101, %c0_102] : memref<128x128xbf16, #tpu.memory_space<vmem>>, vector<128x128xbf16>
    %cst_103 = arith.constant dense<0.000000e+00> : vector<64x128xf32>
    %143 = tpu.matmul %141, %142, %cst_103 {dimension_numbers = #tpu.dot_dimension_numbers<[1], [0], [0], [1], [0, 0, 1, 1], [], []>} : vector<64x128xbf16>, vector<128x128xbf16>, vector<64x128xf32> -> vector<64x128xf32>
    %c0_104 = arith.constant 0 : index
    %c0_105 = arith.constant 0 : index
    %144 = vector.load %arg10[%c0_104, %c0_105] : memref<1x128xf32, #tpu.memory_space<vmem>>, vector<1x128xf32>
    %145 = vector.broadcast %144 : vector<1x128xf32> to vector<64x128xf32>
    %146 = arith.addf %143, %145 : vector<64x128xf32>
    %cst_106 = arith.constant 0.000000e+00 : f32
    %147 = vector.broadcast %cst_106 : f32 to vector<64x128xf32>
    %148 = arith.maximumf %146, %147 : vector<64x128xf32>
    %149 = vector.shape_cast %148 : vector<64x128xf32> to vector<1x8x8x128xf32>
    %c0_107 = arith.constant 0 : index
    %c0_108 = arith.constant 0 : index
    %c0_109 = arith.constant 0 : index
    %c0_110 = arith.constant 0 : index
    %150 = vector.load %arg2[%c0_107, %c0_108, %c0_109, %c0_110] : memref<1x16x16x4xf32, #tpu.memory_space<vmem>>, vector<1x16x16x4xf32>
    %151 = vector.shape_cast %150 : vector<1x16x16x4xf32> to vector<1x8x2x16x4xf32>
    %152 = vector.extract_strided_slice %151 {offsets = [0, 0, 0, 0, 0], sizes = [1, 8, 1, 16, 4], strides = [1, 1, 1, 1, 1]} : vector<1x8x2x16x4xf32> to vector<1x8x1x16x4xf32>
    %153 = vector.shape_cast %152 : vector<1x8x1x16x4xf32> to vector<1x8x16x4xf32>
    %154 = vector.extract_strided_slice %151 {offsets = [0, 0, 1, 0, 0], sizes = [1, 8, 1, 16, 4], strides = [1, 1, 1, 1, 1]} : vector<1x8x2x16x4xf32> to vector<1x8x1x16x4xf32>
    %155 = vector.shape_cast %154 : vector<1x8x1x16x4xf32> to vector<1x8x16x4xf32>
    %cst_111 = arith.constant 0.000000e+00 : f32
    %156 = vector.broadcast %cst_111 : f32 to vector<1x1x16x4xf32>
    %157 = vector.extract_strided_slice %155 {offsets = [0, 0, 0, 0], sizes = [1, 7, 16, 4], strides = [1, 1, 1, 1]} : vector<1x8x16x4xf32> to vector<1x7x16x4xf32>
    %158 = tpu.concatenate %156, %157 in 1 : vector<1x1x16x4xf32>, vector<1x7x16x4xf32> -> vector<1x8x16x4xf32>
    %159 = arith.addf %153, %155 : vector<1x8x16x4xf32>
    %160 = arith.addf %159, %158 : vector<1x8x16x4xf32>
    %cst_112 = arith.constant 0.333333343 : f32
    %161 = vector.broadcast %cst_112 : f32 to vector<1x8x16x4xf32>
    %162 = arith.mulf %160, %161 : vector<1x8x16x4xf32>
    %163 = vector.shape_cast %162 : vector<1x8x16x4xf32> to vector<1x8x8x2x4xf32>
    %164 = vector.extract_strided_slice %163 {offsets = [0, 0, 0, 0, 0], sizes = [1, 8, 8, 1, 4], strides = [1, 1, 1, 1, 1]} : vector<1x8x8x2x4xf32> to vector<1x8x8x1x4xf32>
    %165 = vector.shape_cast %164 : vector<1x8x8x1x4xf32> to vector<1x8x8x4xf32>
    %166 = vector.extract_strided_slice %163 {offsets = [0, 0, 0, 1, 0], sizes = [1, 8, 8, 1, 4], strides = [1, 1, 1, 1, 1]} : vector<1x8x8x2x4xf32> to vector<1x8x8x1x4xf32>
    %167 = vector.shape_cast %166 : vector<1x8x8x1x4xf32> to vector<1x8x8x4xf32>
    %cst_113 = arith.constant 0.000000e+00 : f32
    %168 = vector.broadcast %cst_113 : f32 to vector<1x8x1x4xf32>
    %169 = vector.extract_strided_slice %167 {offsets = [0, 0, 0, 0], sizes = [1, 8, 7, 4], strides = [1, 1, 1, 1]} : vector<1x8x8x4xf32> to vector<1x8x7x4xf32>
    %170 = tpu.concatenate %168, %169 in 2 : vector<1x8x1x4xf32>, vector<1x8x7x4xf32> -> vector<1x8x8x4xf32>
    %171 = arith.addf %165, %167 : vector<1x8x8x4xf32>
    %172 = arith.addf %171, %170 : vector<1x8x8x4xf32>
    %cst_114 = arith.constant 0.333333343 : f32
    %173 = vector.broadcast %cst_114 : f32 to vector<1x8x8x4xf32>
    %174 = arith.mulf %172, %173 : vector<1x8x8x4xf32>
    %175 = vector.shape_cast %174 : vector<1x8x8x4xf32> to vector<64x4xf32>
    %176 = arith.truncf %175 : vector<64x4xf32> to vector<64x4xbf16>
    %c0_115 = arith.constant 0 : index
    %c0_116 = arith.constant 0 : index
    %177 = vector.load %arg11[%c0_115, %c0_116] : memref<4x128xbf16, #tpu.memory_space<vmem>>, vector<4x128xbf16>
    %cst_117 = arith.constant dense<0.000000e+00> : vector<64x128xf32>
    %178 = tpu.matmul %176, %177, %cst_117 {dimension_numbers = #tpu.dot_dimension_numbers<[1], [0], [0], [1], [0, 0, 1, 1], [], []>} : vector<64x4xbf16>, vector<4x128xbf16>, vector<64x128xf32> -> vector<64x128xf32>
    %179 = vector.shape_cast %178 : vector<64x128xf32> to vector<1x8x8x128xf32>
    %c0_118 = arith.constant 0 : index
    %c0_119 = arith.constant 0 : index
    %c0_120 = arith.constant 0 : index
    %180 = vector.load %arg12[%c0_118, %c0_119, %c0_120] : memref<8x8x128xf32, #tpu.memory_space<vmem>>, vector<8x8x128xf32>
    %181 = vector.shape_cast %180 : vector<8x8x128xf32> to vector<1x8x8x128xf32>
    %182 = arith.addf %179, %181 : vector<1x8x8x128xf32>
    %183 = arith.addf %149, %182 : vector<1x8x8x128xf32>
    %cst_121 = arith.constant 5.000000e-01 : f32
    %184 = vector.broadcast %cst_121 : f32 to vector<1x8x8x128xf32>
    %185 = arith.mulf %184, %183 : vector<1x8x8x128xf32>
    %c0_122 = arith.constant 0 : index
    %c0_123 = arith.constant 0 : index
    %c0_124 = arith.constant 0 : index
    %c0_125 = arith.constant 0 : index
    %186 = vector.load %arg13[%c0_122, %c0_123, %c0_124, %c0_125] : memref<1x8x8x128xf32, #tpu.memory_space<vmem>>, vector<1x8x8x128xf32>
    tpu.vector_store %arg13[%c0_122, %c0_123, %c0_124, %c0_125], %185 {strides = array<i32>} : memref<1x8x8x128xf32, #tpu.memory_space<vmem>>, vector<1x8x8x128xf32>,
    return
  }
  func.func @transform_0(%arg0: i32) -> (i32, i32, i32, i32) {
    %c0_i32 = arith.constant 0 : i32
    %c0_i32_0 = arith.constant 0 : i32
    %c0_i32_1 = arith.constant 0 : i32
    %c0_i32_2 = arith.constant 0 : i32
    return %arg0, %c0_i32, %c0_i32_0, %c0_i32_1 : i32, i32, i32, i32
  }
  func.func @transform_1(%arg0: i32) -> (i32, i32, i32, i32) {
    %c0_i32 = arith.constant 0 : i32
    %c0_i32_0 = arith.constant 0 : i32
    %c0_i32_1 = arith.constant 0 : i32
    %c0_i32_2 = arith.constant 0 : i32
    return %arg0, %c0_i32, %c0_i32_0, %c0_i32_1 : i32, i32, i32, i32
  }
  func.func @transform_2(%arg0: i32) -> (i32, i32, i32) {
    %c0_i32 = arith.constant 0 : i32
    %c0_i32_0 = arith.constant 0 : i32
    %c0_i32_1 = arith.constant 0 : i32
    %c0_i32_2 = arith.constant 0 : i32
    return %c0_i32, %c0_i32_0, %c0_i32_1 : i32, i32, i32
  }
  func.func @transform_3(%arg0: i32) -> (i32, i32) {
    %c0_i32 = arith.constant 0 : i32
    %c0_i32_0 = arith.constant 0 : i32
    %c0_i32_1 = arith.constant 0 : i32
    return %c0_i32, %c0_i32_0 : i32, i32
  }
  func.func @transform_4(%arg0: i32) -> (i32, i32) {
    %c0_i32 = arith.constant 0 : i32
    %c0_i32_0 = arith.constant 0 : i32
    %c0_i32_1 = arith.constant 0 : i32
    return %c0_i32, %c0_i32_0 : i32, i32
  }
  func.func @transform_5(%arg0: i32) -> (i32, i32) {
    %c0_i32 = arith.constant 0 : i32
    %c0_i32_0 = arith.constant 0 : i32
    %c0_i32_1 = arith.constant 0 : i32
    return %c0_i32, %c0_i32_0 : i32, i32
  }
  func.func @transform_6(%arg0: i32) -> (i32, i32) {
    %c0_i32 = arith.constant 0 : i32
    %c0_i32_0 = arith.constant 0 : i32
    %c0_i32_1 = arith.constant 0 : i32
    return %c0_i32, %c0_i32_0 : i32, i32
  }
  func.func @transform_7(%arg0: i32) -> (i32, i32) {
    %c0_i32 = arith.constant 0 : i32
    %c0_i32_0 = arith.constant 0 : i32
    %c0_i32_1 = arith.constant 0 : i32
    return %c0_i32, %c0_i32_0 : i32, i32
  }
  func.func @transform_8(%arg0: i32) -> (i32, i32) {
    %c0_i32 = arith.constant 0 : i32
    %c0_i32_0 = arith.constant 0 : i32
    %c0_i32_1 = arith.constant 0 : i32
    return %c0_i32, %c0_i32_0 : i32, i32
  }
  func.func @transform_9(%arg0: i32) -> (i32, i32) {
    %c0_i32 = arith.constant 0 : i32
    %c0_i32_0 = arith.constant 0 : i32
    %c0_i32_1 = arith.constant 0 : i32
    return %c0_i32, %c0_i32_0 : i32, i32
  }
  func.func @transform_10(%arg0: i32) -> (i32, i32) {
    %c0_i32 = arith.constant 0 : i32
    %c0_i32_0 = arith.constant 0 : i32
    %c0_i32_1 = arith.constant 0 : i32
    return %c0_i32, %c0_i32_0 : i32, i32
  }
  func.func @transform_11(%arg0: i32) -> (i32, i32, i32) {
    %c0_i32 = arith.constant 0 : i32
    %c0_i32_0 = arith.constant 0 : i32
    %c0_i32_1 = arith.constant 0 : i32
    %c0_i32_2 = arith.constant 0 : i32
    return %c0_i32, %c0_i32_0, %c0_i32_1 : i32, i32, i32
  }
  func.func @transform_12(%arg0: i32) -> (i32, i32, i32, i32) {
    %c0_i32 = arith.constant 0 : i32
    %c0_i32_0 = arith.constant 0 : i32
    %c0_i32_1 = arith.constant 0 : i32
    %c0_i32_2 = arith.constant 0 : i32
    return %arg0, %c0_i32, %c0_i32_0, %c0_i32_1 : i32, i32, i32, i32
  }
}

</mosaic_0001>

<bundles_post_ra>
// kernel: oriented_powermap_forward.1
= control target key start
LH: loop header
LB: loop body
LE: loop exit
PB: predicated region body
PF: predicated region fallthrough
CT: control target
= control target key end

     0   :  { %s9784_s21 = smov 0   ;;  %s12425_s0 = inlined_call_operand.vmem [shape: f32[2,26,16,44], index: 0, kind: input, shape index: {}]   ;;  %s12426_s1 = inlined_call_operand.vmem [shape: f32[2,16,16,4], index: 1, kind: input, shape index: {}]   ;;  %s12427_s2 = inlined_call_operand.vmem [shape: bf16[11,44,128], index: 2, kind: input, shape index: {}]   ;;  %s12428_s3 = inlined_call_operand.vmem [shape: f32[1,128], index: 3, kind: input, shape index: {}]   ;;  %s12429_s4 = inlined_call_operand.vmem [shape: f32[128,128], index: 4, kind: input, shape index: {}]   ;;  %s12430_s5 = inlined_call_operand.vmem [shape: f32[1,128], index: 5, kind: input, shape index: {}]   ;;  %s12431_s6 = inlined_call_operand.vmem [shape: f32[128,128], index: 6, kind: input, shape index: {}]   ;;  %s12432_s7 = inlined_call_operand.vmem [shape: f32[1,128], index: 7, kind: input, shape index: {}]   ;;  %s12433_s8 = inlined_call_operand.vmem [shape: bf16[128,128], index: 8, kind: input, shape index: {}]   ;;  %s12434_s9 = inlined_call_operand.vmem [shape: f32[1,128], index: 9, kind: input, shape index: {}]   ;;  %s12435_s10 = inlined_call_operand.vmem [shape: bf16[4,128], index: 10, kind: input, shape index: {}]   ;;  %s12436_s11 = inlined_call_operand.vmem [shape: f32[8,8,128], index: 11, kind: input, shape index: {}]   ;;  %s12437_s12 = inlined_call_operand.vmem [shape: f32[2,8,8,128], index: 12, kind: output, shape index: {}]  }
   0x1 LB: > { %s8051_s22 = sadd.s32 4294967295, %s9713_s21   ;;  %p8055_p0 = scmp.ge.s32.totalorder %s9713_s21, 1  ;;  %s9713_s21 = sphi %s9784_s21, %s22_s21  }
   0x2   : > { %p372_p1 = scmp.lt.s32.totalorder %s9713_s21, 3 }
   0x4   : > { %p373_p2 = pnand %p8055_p0, %p372_p1 }
   0x6   : > { %376 = sbr.rel (%p373_p2) target bundleno = 1712 (0x6b0), region = 68 }
   0xd   : > { %v9659_v0 = vld [vmem:[%s12427_s2] sm:$0xff]   ;;  %p419_p3 = scmp.lt.s32.totalorder %s8051_s22, 1  ;;  %v9661_v2 = vld [vmem:[%s12427_s2 + $0x8] sm:$0xff]   ;;  %vm585_vm0 = vcmask 1045504   ;;  %v9663_v4 = vld [vmem:[%s12427_s2 + $0x10] sm:$0x3f]  }
   0xe   : > { %v9798_v1 = vld [vmem:[%s12427_s2 + $0x60] sm:$0xff]   ;;  %8737 = vmatprep.subr.bf16.mxu1 %v9659_v0  ;;  %v9807_v3 = vld [vmem:[%s12427_s2 + $0x68] sm:$0xff]   ;;  %v9819_v5 = vld [vmem:[%s12427_s2 + $0x70] sm:$0x3f]   ;;  %v587_v6 = vsel %vm585_vm0, %v9663_v4, 0  ;;  %vm536_vm1 = vcmask 359424  }
   0xf   : > { %8889 = vmatprep.subr.bf16.mxu0 %v9798_v1  ;;  %8738 = vmatpush3.bf16.msra.mxu1 %v9659_v0  ;;  %s12710_s22 = smov (!%p419_p3, %s8051_s22), 1  ;;  %v9665_v7 = vld [vmem:[%s12427_s2 + $0x78] sm:$0xff]   ;;  %v9837_v8 = vsel %vm585_vm0, %v9819_v5, 0  ;;  %v9666_v25 = vld [vmem:[%s12427_s2 + $0x80] sm:$0xff]   ;;  %v9667_v32 = vld [vmem:[%s12427_s2 + $0x88] sm:$0x3f]  }
  0x10   : > { %8890 = vmatpush3.bf16.msra.mxu0 %v9798_v1  ;;  %8739 = vmatprep.subr.bf16.mxu1 %v9661_v2  ;;  %s9646_s17 = smul.u32 416, %s12710_s22  ;;  %v1958_v35 = vsel %vm585_vm0, %v9667_v32, 0  ;;  %v9668_v36 = vld [vmem:[%s12427_s2 + $0x90] sm:$0xff]   ;;  %v9670_v37 = vld [vmem:[%s12427_s2 + $0x18] sm:$0xff]   ;;  %v9671_v38 = vld [vmem:[%s12427_s2 + $0x20] sm:$0xff]   ;;  %vm4379_vm2 = vcmask 1042434  }
  0x11   : > { %8891 = vmatprep.subr.bf16.mxu0 %v9807_v3  ;;  %v9669_v39 = vld [vmem:[%s12427_s2 + $0x98] sm:$0xff]   ;;  %v9673_v42 = vld [vmem:[%s12427_s2 + $0x28] sm:$0x3f]   ;;  %v9672_v45 = vld [vmem:[%s12427_s2 + $0xa0] sm:$0x3f]   ;;  %vm4381_vm3 = vcmask 1043459  }
  0x12   : > { %s9828_s20 = scalar_lea.vmem %s12425_s0, %s9646_s17  ;;  %v810_v46 = vsel %vm585_vm0, %v9673_v42, 0  ;;  %v9932_v47 = vld [vmem:[%s12427_s2 + $0x30] sm:$0xff]   ;;  %v2245_v50 = vsel %vm585_vm0, %v9672_v45, 0  ;;  %v9943_v51 = vld [vmem:[%s12427_s2 + $0xa8] sm:$0xff]   ;;  %vm4383_vm4 = vcmask 1044484   ;;  %vm4385_vm5 = vcmask 1045509  }
  0x13   : > { %8740 = vmatpush3.bf16.msra.mxu1 %v9661_v2  ;;  %v435_v9 = vld [vmem:[%s9828_s20] sm:$0xff]  ;;  %v436_v10 = vld [vmem:[%s9828_s20 + $0x8] sm:$0xff]  ;;  %v437_v14 = vld [vmem:[%s9828_s20 + $0x10] sm:$0xff]  ;;  %vm4387_vm6 = vcmask 1046534   ;;  %vm4389_vm7 = vcmask 1047559   ;;  %vm4441_vm8 = vcmask 1040384  }
  0x14   : > { %8892 = vmatpush3.bf16.msra.mxu0 %v9807_v3  ;;  %9633 = vmatprep.subr.msk.bf16.mxu1 %vm585_vm0, %v9663_v4  ;;  %v443_v11 = vld [vmem:[%s9828_s20 + $0x40] sm:$0xff]  ;;  %v487_v12 = vpack.c.bf16 %v436_v10, %v435_v9  ;;  %v444_v13 = vld [vmem:[%s9828_s20 + $0x48] sm:$0xff]  ;;  %v438_v15 = vld [vmem:[%s9828_s20 + $0x18] sm:$0xff]  ;;  %vm5394_vm9 = vcmask 1041409   ;;  %vm9717_vm10 = vmmov 0   ;;  %vm7875_vm11 = vcmask 1041408  }
  0x15   : > { %9637 = vmatprep.subr.msk.bf16.mxu0 %vm585_vm0, %v9819_v5  ;;  %v9845_v16 = vpack.c.bf16 %v444_v13, %v443_v11  ;;  %v9847_v17 = vpack.c.bf16 %v438_v15, %v437_v14  ;;  %v445_v18 = vld [vmem:[%s9828_s20 + $0x50] sm:$0xff]  ;;  %v446_v19 = vld [vmem:[%s9828_s20 + $0x58] sm:$0xff]  ;;  %v439_v20 = vld [vmem:[%s9828_s20 + $0x20] sm:$0xff]  ;;  %s8475_s24 = sshll.u32 %s12710_s22, 8  ;;  %vm7862_vm12 = vcmask 31744   ;;  %s8476_s19 = sshll.u32 %s12710_s22, 6 }
  0x16   : > { %8743 = vmatprep.mubr.msk.bf16.mxu1 %vm536_vm1, %v487_v12  ;;  %v9854_v21 = vpack.c.bf16 %v446_v19, %v445_v18  ;;  %v440_v22 = vld [vmem:[%s9828_s20 + $0x28] sm:$0xff]  ;;  %v447_v23 = vld [vmem:[%s9828_s20 + $0x60] sm:$0xff]  ;;  %v441_v28 = vld [vmem:[%s9828_s20 + $0x30] sm:$0xff]  ;;  %s11508_s27 = scalar_lea.vmem %s12426_s1, %s8475_s24 }
  0x17   : > { %8742 = vmatpush3.bf16.msra.mxu1 %v587_v6  ;;  %v448_v24 = vld [vmem:[%s9828_s20 + $0x68] sm:$0xff]  ;;  %8895 = vmatprep.mubr.msk.bf16.mxu0 %vm536_vm1, %v9845_v16  ;;  %v9864_v26 = vpack.c.bf16 %v440_v22, %v439_v20  ;;  %v442_v29 = vld [vmem:[%s9828_s20 + $0x38] sm:$0xff]  ;;  %v449_v30 = vld [vmem:[%s9828_s20 + $0x70] sm:$0xff] }
  0x18   : > { %8894 = vmatpush3.bf16.msra.mxu0 %v9837_v8  ;;  %v9866_v27 = vpack.c.bf16 %v448_v24, %v447_v23  ;;  %v450_v31 = vld [vmem:[%s9828_s20 + $0x78] sm:$0xff]  ;;  %v9883_v33 = vpack.c.bf16 %v442_v29, %v441_v28  ;;  %8775 = vmatprep.subr.bf16.mxu1 %v9670_v37  ;;  %v451_v40 = vld [vmem:[%s9828_s20 + $0x80] sm:$0xff]  ;;  %v452_v41 = vld [vmem:[%s9828_s20 + $0x88] sm:$0xff] }
  0x19   : > { %8927 = vmatprep.subr.bf16.mxu0 %v9665_v7  ;;  %v9885_v34 = vpack.c.bf16 %v450_v31, %v449_v30  ;;  %v453_v43 = vld [vmem:[%s9828_s20 + $0x90] sm:$0xff]  ;;  %v454_v44 = vld [vmem:[%s9828_s20 + $0x98] sm:$0xff]  ;;  %v9934_v48 = vpack.c.bf16 %v452_v41, %v451_v40  ;;  %v455_v52 = vld [vmem:[%s9828_s20 + $0xa0] sm:$0xff] }
  0x1a   : > { %8744 = vmatmul.mubr.msk.bf16.vlgmr.msra.gmra.mrb[0].mxu1 %vm536_vm1, %v9847_v17  ;;  %v9936_v49 = vpack.c.bf16 %v454_v44, %v453_v43  ;;  %v456_v53 = vld [vmem:[%s9828_s20 + $0xa8] sm:$0xff]  ;;  %v457_v54 = vld [vmem:[%s9828_s20 + $0xb0] sm:$0xff]  ;;  %v458_v55 = vld [vmem:[%s9828_s20 + $0xb8] sm:$0xff] }
  0x1b   : > { %8896 = vmatmul.mubr.msk.bf16.vlgmr.msra.gmra.mrb[0].mxu0 %vm536_vm1, %v9854_v21  ;;  %8747 = vmatprep.mubr.msk.bf16.mxu1 %vm536_vm1, %v9864_v26  ;;  %v9959_v56 = vpack.c.bf16 %v456_v53, %v455_v52  ;;  %v9961_v57 = vpack.c.bf16 %v458_v55, %v457_v54  ;;  %v459_v58 = vld [vmem:[%s9828_s20 + $0xc0] sm:$0xff]  ;;  %v460_v59 = vld [vmem:[%s9828_s20 + $0xc8] sm:$0xff]  ;;  %v461_v60 = vld [vmem:[%s9828_s20 + $0xd0] sm:$0xff] }
  0x1c   : > { %8928 = vmatpush3.bf16.msra.mxu0 %v9665_v7  ;;  %8899 = vmatprep.mubr.msk.bf16.mxu0 %vm536_vm1, %v9866_v27  ;;  %v462_v61 = vld [vmem:[%s9828_s20 + $0xd8] sm:$0xff]  ;;  %v9975_v62 = vpack.c.bf16 %v460_v59, %v459_v58  ;;  %v463_v0 = vld [vmem:[%s9828_s20 + $0xe0] sm:$0xff]  ;;  %v464_v2 = vld [vmem:[%s9828_s20 + $0xe8] sm:$0xff] }
  0x1d   : > { %8929 = vmatprep.subr.bf16.mxu0 %v9666_v25  ;;  %8776 = vmatpush3.bf16.msra.mxu1 %v9670_v37  ;;  %v9977_v63 = vpack.c.bf16 %v462_v61, %v461_v60  ;;  %v465_v4 = vld [vmem:[%s9828_s20 + $0xf0] sm:$0xff]  ;;  %v466_v6 = vld [vmem:[%s9828_s20 + $0xf8] sm:$0xff]  ;;  %v9991_v7 = vpack.c.bf16 %v464_v2, %v463_v0  ;;  %v467_v10 = vld [vmem:[%s9828_s20 + $0x100] sm:$0xff] }
  0x1e   : > { %8777 = vmatprep.subr.bf16.mxu1 %v9671_v38  ;;  %v9993_v9 = vpack.c.bf16 %v466_v6, %v465_v4  ;;  %v468_v11 = vld [vmem:[%s9828_s20 + $0x108] sm:$0xff]  ;;  %v469_v12 = vld [vmem:[%s9828_s20 + $0x110] sm:$0xff]  ;;  %v470_v13 = vld [vmem:[%s9828_s20 + $0x118] sm:$0xff] }
  0x1f   : > { %v10007_v14 = vpack.c.bf16 %v468_v11, %v467_v10  ;;  %v10009_v15 = vpack.c.bf16 %v470_v13, %v469_v12  ;;  %v471_v18 = vld [vmem:[%s9828_s20 + $0x120] sm:$0xff]  ;;  %v472_v19 = vld [vmem:[%s9828_s20 + $0x128] sm:$0xff]  ;;  %v473_v20 = vld [vmem:[%s9828_s20 + $0x130] sm:$0xff] }
  0x20   : > { %8930 = vmatpush3.bf16.msra.mxu0 %v9666_v25  ;;  %v474_v22 = vld [vmem:[%s9828_s20 + $0x138] sm:$0xff]  ;;  %v10023_v23 = vpack.c.bf16 %v472_v19, %v471_v18  ;;  %v476_v28 = vld [vmem:[%s9828_s20 + $0x148] sm:$0xff]  ;;  %v9679_v29 = vld [vmem:[%s12427_s2 + $0x40] sm:$0x3f]  }
  0x21   : > { %9639 = vmatprep.subr.msk.bf16.mxu0 %vm585_vm0, %v9667_v32  ;;  %8778 = vmatpush3.bf16.msra.mxu1 %v9671_v38  ;;  %v10025_v24 = vpack.c.bf16 %v474_v22, %v473_v20  ;;  %v9677_v25 = vld [vmem:[%s12427_s2 + $0x38] sm:$0xff]   ;;  %v1097_v31 = vsel %vm585_vm0, %v9679_v29, 0  ;;  %v9682_v32 = vld [vmem:[%s12427_s2 + $0x48] sm:$0xff]   ;;  %v9680_v38 = vld [vmem:[%s12427_s2 + $0xc0] sm:$0xff]  }
  0x22   : > { %8748 = vmatmul.mubr.msk.bf16.gmra.mrb[4].mxu1 %vm536_vm1, %v9883_v33  ;;  %9634 = vmatprep.subr.msk.bf16.mxu1 %vm585_vm0, %v9673_v42  ;;  %v478_v40 = vld [vmem:[%s9828_s20 + $0x158] sm:$0xff]  ;;  %v9681_v44 = vld [vmem:[%s12427_s2 + $0xc8] sm:$0xff]   ;;  %v483_v52 = vld [vmem:[%s9828_s20 + $0x180] sm:$0xff] }
  0x23   : > { %8900 = vmatmul.mubr.msk.bf16.gmra.mrb[4].mxu0 %vm536_vm1, %v9885_v34  ;;  %8751 = vmatprep.mubr.msk.bf16.mxu1 %vm536_vm1, %v9845_v16  ;;  %v9685_v41 = vld [vmem:[%s12427_s2 + $0x58] sm:$0x3f]   ;;  %v484_v53 = vld [vmem:[%s9828_s20 + $0x188] sm:$0xff]  ;;  %v485_v55 = vld [vmem:[%s9828_s20 + $0x190] sm:$0xff] }
  0x24   : > { %8932 = vmatpush3.bf16.msra.mxu0 %v1958_v35  ;;  %8933 = vmatprep.mubr.msk.bf16.mxu0 %vm536_vm1, %v9854_v21  ;;  %v9675_v35 = vld [vmem:[%s12427_s2 + $0xb0] sm:$0xff]   ;;  %v1384_v43 = vsel %vm585_vm0, %v9685_v41, 0  ;;  %v511_v54 = vpack.c.bf16 %v484_v53, %v483_v52 }
  0x25   : > { %8965 = vmatprep.subr.bf16.mxu0 %v9668_v36  ;;  %8780 = vmatpush3.bf16.msra.mxu1 %v810_v46 }
  0x26   : > { %8813 = vmatprep.subr.bf16.mxu1 %v9932_v47 }
  0x2a   : > { %8752 = vmatmul.mubr.msk.bf16.gmra.mrb[8].mxu1 %vm536_vm1, %v9854_v21 }
  0x2b   : > { %8934 = vmatmul.mubr.msk.bf16.vlgmr.msra.gmra.mrb[0].mxu0 %vm536_vm1, %v9866_v27  ;;  %8755 = vmatprep.mubr.msk.bf16.mxu1 %vm536_vm1, %v9866_v27 }
  0x2c   : > { %8966 = vmatpush3.bf16.msra.mxu0 %v9668_v36  ;;  %8937 = vmatprep.mubr.msk.bf16.mxu0 %vm536_vm1, %v9885_v34  ;;  %v9678_v36 = vld [vmem:[%s12427_s2 + $0xb8] sm:$0x3f]  }
  0x2d   : > { %8967 = vmatprep.subr.bf16.mxu0 %v9669_v39  ;;  %v2532_v37 = vsel %vm585_vm0, %v9678_v36, 0 }
  0x30   : > { %8968 = vmatpush3.bf16.msra.mxu0 %v9669_v39  ;;  %v9683_v39 = vld [vmem:[%s12427_s2 + $0x50] sm:$0xff]  }
  0x31   : > { %9640 = vmatprep.subr.msk.bf16.mxu0 %vm585_vm0, %v9672_v45  ;;  %v9684_v45 = vld [vmem:[%s12427_s2 + $0xd0] sm:$0x3f]  }
  0x32   : > { %8756 = vmatmul.mubr.msk.bf16.gmra.mrb[12].mxu1 %vm536_vm1, %v9885_v34  ;;  %v2819_v46 = vsel %vm585_vm0, %v9684_v45, 0 }
  0x33   : > { %8938 = vmatmul.mubr.msk.bf16.gmra.mrb[4].mxu0 %vm536_vm1, %v9934_v48  ;;  %8759 = vmatprep.mubr.msk.bf16.mxu1 %vm536_vm1, %v9934_v48 }
  0x34   : > { %8941 = vmatprep.mubr.msk.bf16.mxu0 %vm536_vm1, %v9936_v49  ;;  %8970 = vmatpush3.bf16.msra.mxu0 %v2245_v50  ;;  %v479_v50 = vld [vmem:[%s9828_s20 + $0x160] sm:$0xff] }
  0x35   : > { %9003 = vmatprep.subr.bf16.mxu0 %v9943_v51 }
  0x3a   : > { %8760 = vmatmul.mubr.msk.bf16.gmra.mrb[16].mxu1 %vm536_vm1, %v9936_v49 }
  0x3b   : > { %8942 = vmatmul.mubr.msk.bf16.gmra.mrb[8].mxu0 %vm536_vm1, %v9959_v56  ;;  %8763 = vmatprep.mubr.msk.bf16.mxu1 %vm536_vm1, %v9959_v56 }
  0x3c   : > { %8945 = vmatprep.mubr.msk.bf16.mxu0 %vm536_vm1, %v9961_v57 }
  0x42   : > { %8764 = vmatmul.mubr.msk.bf16.gmra.mrb[20].mxu1 %vm536_vm1, %v9961_v57 }
  0x43   : > { %8946 = vmatmul.mubr.msk.bf16.gmra.mrb[12].mxu0 %vm536_vm1, %v9975_v62  ;;  %8767 = vmatprep.mubr.msk.bf16.mxu1 %vm536_vm1, %v9975_v62 }
  0x44   : > { %8949 = vmatprep.mubr.msk.bf16.mxu0 %vm536_vm1, %v9977_v63 }
  0x4a   : > { %8768 = vmatmul.mubr.msk.bf16.gmra.mrb[24].mxu1 %vm536_vm1, %v9977_v63 }
  0x4b   : > { %8950 = vmatmul.mubr.msk.bf16.gmra.mrb[16].mxu0 %vm536_vm1, %v9991_v7  ;;  %8771 = vmatprep.mubr.msk.bf16.mxu1 %vm536_vm1, %v9991_v7 }
  0x4c   : > { %8953 = vmatprep.mubr.msk.bf16.mxu0 %vm536_vm1, %v9993_v9 }
  0x52   : > { %8772 = vmatmul.mubr.msk.bf16.gmra.mrb[28].mxu1 %vm536_vm1, %v9993_v9 }
  0x53   : > { %8954 = vmatmul.mubr.msk.bf16.gmra.mrb[20].mxu0 %vm536_vm1, %v10007_v14  ;;  %8781 = vmatprep.mubr.msk.bf16.mxu1 %vm536_vm1, %v9847_v17  ;;  %v475_v17 = vld [vmem:[%s9828_s20 + $0x140] sm:$0xff] }
  0x54   : > { %8957 = vmatprep.mubr.msk.bf16.mxu0 %vm536_vm1, %v10009_v15  ;;  %v10044_v30 = vpack.c.bf16 %v476_v28, %v475_v17 }
  0x5a   : > { %8782 = vmatmul.mubr.msk.bf16.vlgmr.msra.gmra.mrb[0].mxu1 %vm536_vm1, %v9864_v26 }
  0x5b   : > { %8958 = vmatmul.mubr.msk.bf16.gmra.mrb[24].mxu0 %vm536_vm1, %v10023_v23  ;;  %8785 = vmatprep.mubr.msk.bf16.mxu1 %vm536_vm1, %v9883_v33 }
  0x5c   : > { %8961 = vmatprep.mubr.msk.bf16.mxu0 %vm536_vm1, %v10025_v24  ;;  %8814 = vmatpush3.bf16.msra.mxu1 %v9932_v47  ;;  %v9686_v47 = vld [vmem:[%s12427_s2 + $0xd8] sm:$0xff]  }
  0x5d   : > { %8815 = vmatprep.subr.bf16.mxu1 %v9677_v25 }
  0x60   : > { %8816 = vmatpush3.bf16.msra.mxu1 %v9677_v25 }
  0x61   : > { %9635 = vmatprep.subr.msk.bf16.mxu1 %vm585_vm0, %v9679_v29 }
  0x62   : > { %8786 = vmatmul.mubr.msk.bf16.gmra.mrb[4].mxu1 %vm536_vm1, %v9845_v16 }
  0x63   : > { %8962 = vmatmul.mubr.msk.bf16.gmra.mrb[28].mxu0 %vm536_vm1, %v10044_v30  ;;  %8789 = vmatprep.mubr.msk.bf16.mxu1 %vm536_vm1, %v9854_v21 }
  0x64   : > { %8971 = vmatprep.mubr.msk.bf16.mxu0 %vm536_vm1, %v9866_v27  ;;  %8818 = vmatpush3.bf16.msra.mxu1 %v1097_v31 }
  0x65   : > { %8851 = vmatprep.subr.bf16.mxu1 %v9682_v32 }
  0x6a   : > { %8790 = vmatmul.mubr.msk.bf16.gmra.mrb[8].mxu1 %vm536_vm1, %v9866_v27 }
  0x6b   : > { %8972 = vmatmul.mubr.msk.bf16.vlgmr.msra.gmra.mrb[0].mxu0 %vm536_vm1, %v9885_v34  ;;  %8793 = vmatprep.mubr.msk.bf16.mxu1 %vm536_vm1, %v9885_v34 }
  0x6c   : > { %9004 = vmatpush3.bf16.msra.mxu0 %v9943_v51  ;;  %8975 = vmatprep.mubr.msk.bf16.mxu0 %vm536_vm1, %v9934_v48  ;;  %v480_v51 = vld [vmem:[%s9828_s20 + $0x168] sm:$0xff] }
  0x6d   : > { %9005 = vmatprep.subr.bf16.mxu0 %v9675_v35 }
  0x70   : > { %9006 = vmatpush3.bf16.msra.mxu0 %v9675_v35 }
  0x71   : > { %9641 = vmatprep.subr.msk.bf16.mxu0 %vm585_vm0, %v9678_v36 }
  0x72   : > { %8794 = vmatmul.mubr.msk.bf16.gmra.mrb[12].mxu1 %vm536_vm1, %v9934_v48 }
  0x73   : > { %8976 = vmatmul.mubr.msk.bf16.gmra.mrb[4].mxu0 %vm536_vm1, %v9936_v49  ;;  %8797 = vmatprep.mubr.msk.bf16.mxu1 %vm536_vm1, %v9936_v49 }
  0x74   : > { %8979 = vmatprep.mubr.msk.bf16.mxu0 %vm536_vm1, %v9959_v56  ;;  %9008 = vmatpush3.bf16.msra.mxu0 %v2532_v37  ;;  %v10447_v37 = vld [vmem:[%s12428_s3] ss:$0 sm:$0xff] }
  0x75   : > { %9041 = vmatprep.subr.bf16.mxu0 %v9680_v38 }
  0x7a   : > { %8798 = vmatmul.mubr.msk.bf16.gmra.mrb[16].mxu1 %vm536_vm1, %v9959_v56 }
  0x7b   : > { %8980 = vmatmul.mubr.msk.bf16.gmra.mrb[8].mxu0 %vm536_vm1, %v9961_v57  ;;  %8801 = vmatprep.mubr.msk.bf16.mxu1 %vm536_vm1, %v9961_v57 }
  0x7c   : > { %8983 = vmatprep.mubr.msk.bf16.mxu0 %vm536_vm1, %v9975_v62 }
  0x82   : > { %8802 = vmatmul.mubr.msk.bf16.gmra.mrb[20].mxu1 %vm536_vm1, %v9975_v62 }
  0x83   : > { %8984 = vmatmul.mubr.msk.bf16.gmra.mrb[12].mxu0 %vm536_vm1, %v9977_v63  ;;  %8805 = vmatprep.mubr.msk.bf16.mxu1 %vm536_vm1, %v9977_v63 }
  0x84   : > { %8987 = vmatprep.mubr.msk.bf16.mxu0 %vm536_vm1, %v9991_v7 }
  0x8a   : > { %8806 = vmatmul.mubr.msk.bf16.gmra.mrb[24].mxu1 %vm536_vm1, %v9991_v7 }
  0x8b   : > { %8988 = vmatmul.mubr.msk.bf16.gmra.mrb[16].mxu0 %vm536_vm1, %v9993_v9  ;;  %8809 = vmatprep.mubr.msk.bf16.mxu1 %vm536_vm1, %v9993_v9 }
  0x8c   : > { %8991 = vmatprep.mubr.msk.bf16.mxu0 %vm536_vm1, %v10007_v14 }
  0x92   : > { %8810 = vmatmul.mubr.msk.bf16.gmra.mrb[28].mxu1 %vm536_vm1, %v10007_v14 }
  0x93   : > { %8992 = vmatmul.mubr.msk.bf16.gmra.mrb[20].mxu0 %vm536_vm1, %v10009_v15  ;;  %8819 = vmatprep.mubr.msk.bf16.mxu1 %vm536_vm1, %v9864_v26  ;;  %v477_v26 = vld [vmem:[%s9828_s20 + $0x150] sm:$0xff] }
  0x94   : > { %8995 = vmatprep.mubr.msk.bf16.mxu0 %vm536_vm1, %v10023_v23  ;;  %v10135_v42 = vpack.c.bf16 %v478_v40, %v477_v26  ;;  %v3823_v26 = vlaneseq }
  0x9a   : > { %8820 = vmatmul.mubr.msk.bf16.vlgmr.msra.gmra.mrb[0].mxu1 %vm536_vm1, %v9883_v33 }
  0x9b   : > { %8996 = vmatmul.mubr.msk.bf16.gmra.mrb[24].mxu0 %vm536_vm1, %v10025_v24  ;;  %8823 = vmatprep.mubr.msk.bf16.mxu1 %vm536_vm1, %v9845_v16 }
  0x9c   : > { %8999 = vmatprep.mubr.msk.bf16.mxu0 %vm536_vm1, %v10044_v30  ;;  %8852 = vmatpush3.bf16.msra.mxu1 %v9682_v32 }
  0x9d   : > { %8853 = vmatprep.subr.bf16.mxu1 %v9683_v39 }
  0xa0   : > { %8854 = vmatpush3.bf16.msra.mxu1 %v9683_v39 }
  0xa1   : > { %9636 = vmatprep.subr.msk.bf16.mxu1 %vm585_vm0, %v9685_v41 }
  0xa2   : > { %8824 = vmatmul.mubr.msk.bf16.gmra.mrb[4].mxu1 %vm536_vm1, %v9854_v21 }
  0xa3   : > { %9000 = vmatmul.mubr.msk.bf16.gmra.mrb[28].mxu0 %vm536_vm1, %v10135_v42  ;;  %8827 = vmatprep.mubr.msk.bf16.mxu1 %vm536_vm1, %v9866_v27 }
  0xa4   : > { %9009 = vmatprep.mubr.msk.bf16.mxu0 %vm536_vm1, %v9885_v34  ;;  %8856 = vmatpush3.bf16.msra.mxu1 %v1384_v43 }
  0xa5   : > { %9307 = vmatprep.subr.bf16.mxu1 %v9798_v1 }
  0xaa   : > { %8828 = vmatmul.mubr.msk.bf16.gmra.mrb[8].mxu1 %vm536_vm1, %v9885_v34 }
  0xab   : > { %9010 = vmatmul.mubr.msk.bf16.vlgmr.msra.gmra.mrb[0].mxu0 %vm536_vm1, %v9934_v48  ;;  %8831 = vmatprep.mubr.msk.bf16.mxu1 %vm536_vm1, %v9934_v48 }
  0xac   : > { %9042 = vmatpush3.bf16.msra.mxu0 %v9680_v38  ;;  %9013 = vmatprep.mubr.msk.bf16.mxu0 %vm536_vm1, %v9936_v49  ;;  %v9715_v38 = vmov 1983009808  }
  0xad   : > { %9043 = vmatprep.subr.bf16.mxu0 %v9681_v44  ;;  %v3821_v39 = vunpack.c.l.s4 %v9715_v38 }
  0xb0   : > { %9044 = vmatpush3.bf16.msra.mxu0 %v9681_v44 }
  0xb1   : > { %9642 = vmatprep.subr.msk.bf16.mxu0 %vm585_vm0, %v9684_v45 }
  0xb2   : > { %8832 = vmatmul.mubr.msk.bf16.gmra.mrb[12].mxu1 %vm536_vm1, %v9936_v49 }
  0xb3   : > { %9014 = vmatmul.mubr.msk.bf16.gmra.mrb[4].mxu0 %vm536_vm1, %v9959_v56  ;;  %8835 = vmatprep.mubr.msk.bf16.mxu1 %vm536_vm1, %v9959_v56 }
  0xb4   : > { %9017 = vmatprep.mubr.msk.bf16.mxu0 %vm536_vm1, %v9961_v57  ;;  %9046 = vmatpush3.bf16.msra.mxu0 %v2819_v46 }
  0xb5   : > { %9079 = vmatprep.subr.bf16.mxu0 %v9686_v47 }
  0xba   : > { %8836 = vmatmul.mubr.msk.bf16.gmra.mrb[16].mxu1 %vm536_vm1, %v9961_v57 }
  0xbb   : > { %9018 = vmatmul.mubr.msk.bf16.gmra.mrb[8].mxu0 %vm536_vm1, %v9975_v62  ;;  %8839 = vmatprep.mubr.msk.bf16.mxu1 %vm536_vm1, %v9975_v62 }
  0xbc   : > { %9021 = vmatprep.mubr.msk.bf16.mxu0 %vm536_vm1, %v9977_v63 }
  0xc2   : > { %8840 = vmatmul.mubr.msk.bf16.gmra.mrb[20].mxu1 %vm536_vm1, %v9977_v63 }
  0xc3   : > { %9022 = vmatmul.mubr.msk.bf16.gmra.mrb[12].mxu0 %vm536_vm1, %v9991_v7  ;;  %8843 = vmatprep.mubr.msk.bf16.mxu1 %vm536_vm1, %v9991_v7 }
  0xc4   : > { %9025 = vmatprep.mubr.msk.bf16.mxu0 %vm536_vm1, %v9993_v9 }
  0xca   : > { %8844 = vmatmul.mubr.msk.bf16.gmra.mrb[24].mxu1 %vm536_vm1, %v9993_v9 }
  0xcb   : > { %9026 = vmatmul.mubr.msk.bf16.gmra.mrb[16].mxu0 %vm536_vm1, %v10007_v14  ;;  %8847 = vmatprep.mubr.msk.bf16.mxu1 %vm536_vm1, %v10007_v14 }
  0xcc   : > { %9029 = vmatprep.mubr.msk.bf16.mxu0 %vm536_vm1, %v10009_v15 }
  0xd2   : > { %8848 = vmatmul.mubr.msk.bf16.gmra.mrb[28].mxu1 %vm536_vm1, %v10009_v15 }
  0xd3   : > { %9030 = vmatmul.mubr.msk.bf16.gmra.mrb[20].mxu0 %vm536_vm1, %v10023_v23  ;;  %8857 = vmatprep.mubr.msk.bf16.mxu1 %vm536_vm1, %v9883_v33  ;;  %v10219_v33 = vpack.c.bf16 %v480_v51, %v479_v50  ;;  %v3822_v50 = vunpack.c.0.s8 %v3821_v39  ;;  %v3824_v51 = vshrl.u32 %v3823_v26, 7 }
  0xd4   : > { %9033 = vmatprep.mubr.msk.bf16.mxu0 %vm536_vm1, %v10025_v24 }
  0xd5   : > { %v10472_v38 = vsub.s32 0, %v3824_v51 }
  0xda   : > { %8858 = vmatmul.mubr.msk.bf16.vlgmr.msra.gmra.mrb[0].mxu1 %vm536_vm1, %v9845_v16  ;;  %v481_v16 = vld [vmem:[%s9828_s20 + $0x170] sm:$0xff] }
  0xdb   : > { %9034 = vmatmul.mubr.msk.bf16.gmra.mrb[24].mxu0 %vm536_vm1, %v10044_v30  ;;  %8861 = vmatprep.mubr.msk.bf16.mxu1 %vm536_vm1, %v9854_v21  ;;  %v482_v21 = vld [vmem:[%s9828_s20 + $0x178] sm:$0xff] }
  0xdc   : > { %9037 = vmatprep.mubr.msk.bf16.mxu0 %vm536_vm1, %v10135_v42  ;;  %9310 = vmatpush3.bf16.msra.mxu1 %v9798_v1  ;;  %v9687_v1 = vld [vmem:[%s12427_s2 + $0xe0] sm:$0xff]  }
  0xdd   : > { %9308 = vmatprep.subr.bf16.mxu1 %v9807_v3 }
  0xe0   : > { %9311 = vmatpush3.bf16.msra.mxu1 %v9807_v3  ;;  %v9688_v3 = vld [vmem:[%s12427_s2 + $0xe8] sm:$0x3f]  }
  0xe1   : > { %9638 = vmatprep.subr.msk.bf16.mxu1 %vm585_vm0, %v9819_v5  ;;  %v3106_v5 = vsel %vm585_vm0, %v9688_v3, 0 }
  0xe2   : > { %8862 = vmatmul.mubr.msk.bf16.gmra.mrb[4].mxu1 %vm536_vm1, %v9866_v27  ;;  %v510_v27 = vpack.c.bf16 %v482_v21, %v481_v16 }
  0xe3   : > { %9038 = vmatmul.mubr.msk.bf16.gmra.mrb[28].mxu0 %vm536_vm1, %v10219_v33  ;;  %8865 = vmatprep.mubr.msk.bf16.mxu1 %vm536_vm1, %v9885_v34  ;;  %v9690_v34 = vld [vmem:[%s12427_s2 + $0xf8] sm:$0xff]  }
  0xe4   : > { %9047 = vmatprep.mubr.msk.bf16.mxu0 %vm536_vm1, %v9934_v48  ;;  %9312 = vmatpush3.bf16.msra.mxu1 %v9837_v8  ;;  %v9689_v8 = vld [vmem:[%s12427_s2 + $0xf0] sm:$0xff]  }
  0xea   : > { %8866 = vmatmul.mubr.msk.bf16.gmra.mrb[8].mxu1 %vm536_vm1, %v9934_v48 }
  0xeb   : > { %9048 = vmatmul.mubr.msk.bf16.vlgmr.msra.gmra.mrb[0].mxu0 %vm536_vm1, %v9936_v49  ;;  %8869 = vmatprep.mubr.msk.bf16.mxu1 %vm536_vm1, %v9936_v49 }
  0xec   : > { %9080 = vmatpush3.bf16.msra.mxu0 %v9686_v47  ;;  %9051 = vmatprep.mubr.msk.bf16.mxu0 %vm536_vm1, %v9959_v56 }
  0xed   : > { %9081 = vmatprep.subr.bf16.mxu0 %v9687_v1 }
  0xf0   : > { %9082 = vmatpush3.bf16.msra.mxu0 %v9687_v1 }
  0xf1   : > { %9643 = vmatprep.subr.msk.bf16.mxu0 %vm585_vm0, %v9688_v3 }
  0xf2   : > { %8870 = vmatmul.mubr.msk.bf16.gmra.mrb[12].mxu1 %vm536_vm1, %v9959_v56 }
  0xf3   : > { %9052 = vmatmul.mubr.msk.bf16.gmra.mrb[4].mxu0 %vm536_vm1, %v9961_v57  ;;  %8873 = vmatprep.mubr.msk.bf16.mxu1 %vm536_vm1, %v9961_v57 }
  0xf4   : > { %9055 = vmatprep.mubr.msk.bf16.mxu0 %vm536_vm1, %v9975_v62  ;;  %9084 = vmatpush3.bf16.msra.mxu0 %v3106_v5 }
  0xf5   : > { %9117 = vmatprep.subr.bf16.mxu0 %v9689_v8 }
  0xfa   : > { %8874 = vmatmul.mubr.msk.bf16.gmra.mrb[16].mxu1 %vm536_vm1, %v9975_v62 }
  0xfb   : > { %9056 = vmatmul.mubr.msk.bf16.gmra.mrb[8].mxu0 %vm536_vm1, %v9977_v63  ;;  %8877 = vmatprep.mubr.msk.bf16.mxu1 %vm536_vm1, %v9977_v63 }
  0xfc   : > { %9059 = vmatprep.mubr.msk.bf16.mxu0 %vm536_vm1, %v9991_v7 }
 0x102   : > { %8878 = vmatmul.mubr.msk.bf16.gmra.mrb[20].mxu1 %vm536_vm1, %v9991_v7 }
 0x103   : > { %9060 = vmatmul.mubr.msk.bf16.gmra.mrb[12].mxu0 %vm536_vm1, %v9993_v9  ;;  %8881 = vmatprep.mubr.msk.bf16.mxu1 %vm536_vm1, %v9993_v9 }
 0x104   : > { %9063 = vmatprep.mubr.msk.bf16.mxu0 %vm536_vm1, %v10007_v14 }
 0x10a   : > { %8882 = vmatmul.mubr.msk.bf16.gmra.mrb[24].mxu1 %vm536_vm1, %v10007_v14 }
 0x10b   : > { %9064 = vmatmul.mubr.msk.bf16.gmra.mrb[16].mxu0 %vm536_vm1, %v10009_v15  ;;  %8885 = vmatprep.mubr.msk.bf16.mxu1 %vm536_vm1, %v10009_v15 }
 0x10c   : > { %9067 = vmatprep.mubr.msk.bf16.mxu0 %vm536_vm1, %v10023_v23 }
 0x112   : > { %8886 = vmatmul.mubr.msk.bf16.gmra.mrb[28].mxu1 %vm536_vm1, %v10023_v23 }
 0x113   : > { %9068 = vmatmul.mubr.msk.bf16.gmra.mrb[20].mxu0 %vm536_vm1, %v10025_v24  ;;  %8903 = vmatprep.mubr.msk.bf16.mxu1 %vm536_vm1, %v9934_v48  ;;  %v9691_v48 = vld [vmem:[%s12427_s2 + $0x100] sm:$0x3f]  }
 0x114   : > { %9071 = vmatprep.mubr.msk.bf16.mxu0 %vm536_vm1, %v10044_v30 }
 0x11a   : > { %8904 = vmatmul.mubr.msk.bf16.vlgmr.msra.gmra.mrb[8].mxu1 %vm536_vm1, %v9936_v49 }
 0x11b   : > { %9072 = vmatmul.mubr.msk.bf16.gmra.mrb[24].mxu0 %vm536_vm1, %v10135_v42  ;;  %8907 = vmatprep.mubr.msk.bf16.mxu1 %vm536_vm1, %v9959_v56 }
 0x11c   : > { %9075 = vmatprep.mubr.msk.bf16.mxu0 %vm536_vm1, %v10219_v33 }
 0x122   : > { %8908 = vmatmul.mubr.msk.bf16.gmra.mrb[12].mxu1 %vm536_vm1, %v9961_v57 }
 0x123   : > { %9076 = vmatmul.mubr.msk.bf16.gmra.mrb[28].mxu0 %vm536_vm1, %v510_v27  ;;  %8911 = vmatprep.mubr.msk.bf16.mxu1 %vm536_vm1, %v9975_v62 }
 0x124   : > { %9085 = vmatprep.mubr.msk.bf16.mxu0 %vm536_vm1, %v9936_v49  ;;  %v3393_v49 = vsel %vm585_vm0, %v9691_v48, 0 }
 0x12a   : > { %8912 = vmatmul.mubr.msk.bf16.gmra.mrb[16].mxu1 %vm536_vm1, %v9977_v63 }
 0x12b   : > { %9086 = vmatmul.mubr.msk.bf16.vlgmr.msra.gmra.mrb[0].mxu0 %vm536_vm1, %v9959_v56  ;;  %8915 = vmatprep.mubr.msk.bf16.mxu1 %vm536_vm1, %v9991_v7 }
 0x12c   : > { %9118 = vmatpush3.bf16.msra.mxu0 %v9689_v8  ;;  %9089 = vmatprep.mubr.msk.bf16.mxu0 %vm536_vm1, %v9961_v57 }
 0x12d   : > { %9119 = vmatprep.subr.bf16.mxu0 %v9690_v34 }
 0x130   : > { %9120 = vmatpush3.bf16.msra.mxu0 %v9690_v34 }
 0x131   : > { %9644 = vmatprep.subr.msk.bf16.mxu0 %vm585_vm0, %v9691_v48 }
 0x132   : > { %8916 = vmatmul.mubr.msk.bf16.gmra.mrb[20].mxu1 %vm536_vm1, %v9993_v9 }
 0x133   : > { %9090 = vmatmul.mubr.msk.bf16.gmra.mrb[4].mxu0 %vm536_vm1, %v9975_v62  ;;  %8919 = vmatprep.mubr.msk.bf16.mxu1 %vm536_vm1, %v10007_v14 }
 0x134   : > { %9093 = vmatprep.mubr.msk.bf16.mxu0 %vm536_vm1, %v9977_v63  ;;  %9122 = vmatpush3.bf16.msra.mxu0 %v3393_v49  ;;  %v10463_v49 = vsub.s32 1, %v3824_v51 }
 0x13a   : > { %8920 = vmatmul.mubr.msk.bf16.gmra.mrb[24].mxu1 %vm536_vm1, %v10009_v15 }
 0x13b   : > { %9094 = vmatmul.mubr.msk.bf16.gmra.mrb[8].mxu0 %vm536_vm1, %v9991_v7  ;;  %8923 = vmatprep.mubr.msk.bf16.mxu1 %vm536_vm1, %v10023_v23 }
 0x13c   : > { %9097 = vmatprep.mubr.msk.bf16.mxu0 %vm536_vm1, %v9993_v9 }
 0x142   : > { %8924 = vmatmul.mubr.msk.bf16.gmra.mrb[28].mxu1 %vm536_vm1, %v10025_v24 }
 0x143   : > { %9098 = vmatmul.mubr.msk.bf16.gmra.mrb[12].mxu0 %vm536_vm1, %v10007_v14 }
 0x144   : > { %9101 = vmatprep.mubr.msk.bf16.mxu0 %vm536_vm1, %v10009_v15 }
 0x14b   : > { %9102 = vmatmul.mubr.msk.bf16.gmra.mrb[16].mxu0 %vm536_vm1, %v10023_v23 }
 0x14c   : > { %9105 = vmatprep.mubr.msk.bf16.mxu0 %vm536_vm1, %v10025_v24 }
 0x153   : > { %9106 = vmatmul.mubr.msk.bf16.gmra.mrb[20].mxu0 %vm536_vm1, %v10044_v30 }
 0x154   : > { %9109 = vmatprep.mubr.msk.bf16.mxu0 %vm536_vm1, %v10135_v42 }
 0x15b   : > { %9110 = vmatmul.mubr.msk.bf16.gmra.mrb[24].mxu0 %vm536_vm1, %v10219_v33 }
 0x15c   : > { %9113 = vmatprep.mubr.msk.bf16.mxu0 %vm536_vm1, %v510_v27 }
 0x163   : > { %9114 = vmatmul.mubr.msk.bf16.gmra.mrb[28].mxu0 %vm536_vm1, %v511_v54 }
 0x164   : > { %9123 = vmatprep.mubr.msk.bf16.mxu0 %vm536_vm1, %v9959_v56  ;;  %v486_v56 = vld [vmem:[%s9828_s20 + $0x198] sm:$0xff] }
 0x16b   : > { %9124 = vmatmul.mubr.msk.bf16.vlgmr.msra.gmra.mrb[0].mxu0 %vm536_vm1, %v9961_v57  ;;  %v512_v57 = vpack.c.bf16 %v486_v56, %v485_v55 }
 0x16c   : > { %9127 = vmatprep.mubr.msk.bf16.mxu0 %vm536_vm1, %v9975_v62 }
 0x173   : > { %9128 = vmatmul.mubr.msk.bf16.gmra.mrb[4].mxu0 %vm536_vm1, %v9977_v63 }
 0x174   : > { %9131 = vmatprep.mubr.msk.bf16.mxu0 %vm536_vm1, %v9991_v7 }
 0x17b   : > { %9132 = vmatmul.mubr.msk.bf16.gmra.mrb[8].mxu0 %vm536_vm1, %v9993_v9 }
 0x17c   : > { %9135 = vmatprep.mubr.msk.bf16.mxu0 %vm536_vm1, %v10007_v14 }
 0x183   : > { %9136 = vmatmul.mubr.msk.bf16.gmra.mrb[12].mxu0 %vm536_vm1, %v10009_v15 }
 0x184   : > { %9139 = vmatprep.mubr.msk.bf16.mxu0 %vm536_vm1, %v10023_v23 }
 0x18b   : > { %9140 = vmatmul.mubr.msk.bf16.gmra.mrb[16].mxu0 %vm536_vm1, %v10025_v24 }
 0x18c   : > { %9143 = vmatprep.mubr.msk.bf16.mxu0 %vm536_vm1, %v10044_v30 }
 0x193   : > { %9144 = vmatmul.mubr.msk.bf16.gmra.mrb[20].mxu0 %vm536_vm1, %v10135_v42 }
 0x194   : > { %9147 = vmatprep.mubr.msk.bf16.mxu0 %vm536_vm1, %v10219_v33 }
 0x19b   : > { %9148 = vmatmul.mubr.msk.bf16.gmra.mrb[24].mxu0 %vm536_vm1, %v510_v27  ;;  %v10461_v27 = vsub.s32 %v3822_v50, %v3824_v51 }
 0x19c   : > { %9151 = vmatprep.mubr.msk.bf16.mxu0 %vm536_vm1, %v511_v54 }
 0x19d   : > { %12522 = vst [vmem:[#allocation11_spill] sm:$0xff] %v10461_v27 }
 0x1a3   : > { %9152 = vmatmul.mubr.msk.bf16.gmra.mrb[28].mxu0 %vm536_vm1, %v512_v57 }
 0x1ad   : > { %v8859_v58 = vpop.f32.mrb[0].mxu1 }
 0x1ae   : > { %v1420_v59 = vpop.f32.mrb[1].mxu1 }
 0x1af   : > { %v8860_v60 = vpop.f32.mrb[2].mxu1 }
 0x1b0   : > { %v1423_v61 = vpop.f32.mrb[3].mxu1 }
 0x1b5   : > { %v8863_v62 = vpop.f32.mrb[4].mxu1 }
 0x1b6   : > { %v1436_v63 = vpop.f32.mrb[5].mxu1 }
 0x1b7   : > { %v10392_v0 = vpop.f32.mrb[6].mxu1 }
 0x1b8   : > { %v10394_v2 = vpop.f32.mrb[7].mxu1 }
 0x1ed   : > { %v10396_v4 = vpop.f32.mrb[8].mxu1 }
 0x1ee   : > { %v10398_v6 = vpop.f32.mrb[9].mxu1 }
 0x1ef   : > { %v10400_v7 = vpop.f32.mrb[10].mxu1 }
 0x1f0   : > { %v10402_v9 = vpop.f32.mrb[11].mxu1 }
 0x1f5   : > { %v10404_v10 = vpop.f32.mrb[12].mxu1 }
 0x1f6   : > { %v10406_v11 = vpop.f32.mrb[13].mxu1 }
 0x1f7   : > { %v10408_v12 = vpop.f32.mrb[14].mxu1 }
 0x1f8   : > { %v10410_v13 = vpop.f32.mrb[15].mxu1 }
 0x1fd   : > { %v10412_v14 = vpop.f32.mrb[16].mxu1 }
 0x1fe   : > { %v10414_v15 = vpop.f32.mrb[17].mxu1 }
 0x1ff   : > { %v10416_v18 = vpop.f32.mrb[18].mxu1 }
 0x200   : > { %v10418_v19 = vpop.f32.mrb[19].mxu1 }
 0x205   : > { %v10420_v20 = vpop.f32.mrb[20].mxu1 }
 0x206   : > { %v10422_v22 = vpop.f32.mrb[21].mxu1 }
 0x207   : > { %v10424_v23 = vpop.f32.mrb[22].mxu1 }
 0x208   : > { %v10426_v24 = vpop.f32.mrb[23].mxu1 }
 0x20d   : > { %v10428_v25 = vpop.f32.mrb[24].mxu1 }
 0x20e   : > { %12514 = vst [vmem:[#allocation3_spill] sm:$0xff] %v10428_v25  ;;  %v10430_v17 = vpop.f32.mrb[25].mxu1 }
 0x20f   : > { %12515 = vst [vmem:[#allocation4_spill] sm:$0xff] %v10430_v17  ;;  %v10432_v28 = vpop.f32.mrb[26].mxu1 }
 0x210   : > { %12516 = vst [vmem:[#allocation5_spill] sm:$0xff] %v10432_v28  ;;  %v10434_v29 = vpop.f32.mrb[27].mxu1 }
 0x211   : > { %12517 = vst [vmem:[#allocation6_spill] sm:$0xff] %v10434_v29 }
 0x215   : > { %v10436_v30 = vpop.f32.mrb[28].mxu1 }
 0x216   : > { %12518 = vst [vmem:[#allocation7_spill] sm:$0xff] %v10436_v30  ;;  %v10438_v31 = vpop.f32.mrb[29].mxu1 }
 0x217   : > { %12519 = vst [vmem:[#allocation8_spill] sm:$0xff] %v10438_v31  ;;  %v10440_v32 = vpop.f32.mrb[30].mxu1 }
 0x218   : > { %12520 = vst [vmem:[#allocation9_spill] sm:$0xff] %v10440_v32  ;;  %v10442_v35 = vpop.f32.mrb[31].mxu1 }
 0x219   : > { %12521 = vst [vmem:[#allocation10_spill] sm:$0xff] %v10442_v35 }
 0x23e   : > { %v9125_v36 = vpop.f32.mrb[0].mxu0 }
 0x23f   : > { %v9313_v40 = vadd.f32 %v9125_v36, %v8859_v58  ;;  %v3429_v41 = vpop.f32.mrb[1].mxu0 }
 0x240   : > { %v9314_v42 = vadd.f32 %v3429_v41, %v1420_v59  ;;  %v9126_v43 = vpop.f32.mrb[2].mxu0 }
 0x241   : > { %v10450_v44 = vadd.f32 %v9313_v40, %v10447_v37  ;;  %v9315_v45 = vadd.f32 %v9126_v43, %v8860_v60  ;;  %v3432_v46 = vpop.f32.mrb[3].mxu0 }
 0x242   : > { %v3691_v47 = vadd.f32 %v9314_v42, %v10447_v37  ;;  %v9316_v33 = vadd.f32 %v3432_v46, %v1423_v61 }
 0x243   : > { %v12439_v1 = vmax.f32 %v10450_v44, 0.0  ;;  %v10455_v3 = vadd.f32 %v9315_v45, %v10447_v37 }
 0x244   : > { %v3723_v5 = vmax.f32 %v3691_v47, 0.0  ;;  %v3692_v8 = vadd.f32 %v9316_v33, %v10447_v37 }
 0x245   : > { %v12438_v16 = vmax.f32 %v10455_v3, 0.0 }
 0x246   : > { %v3755_v21 = vadd.f32 %v12439_v1, %v3723_v5  ;;  %v3724_v34 = vmax.f32 %v3692_v8, 0.0  ;;  %v9129_v48 = vpop.f32.mrb[4].mxu0 }
 0x247   : > { %v9317_v52 = vadd.f32 %v9129_v48, %v8863_v62  ;;  %v3445_v53 = vpop.f32.mrb[5].mxu0 }
 0x248   : > { %v3787_v54 = vmul.f32 0.33333334, %v3755_v21  ;;  %v3756_v55 = vadd.f32 %v12438_v16, %v3724_v34  ;;  %v9318_v56 = vadd.f32 %v3445_v53, %v1436_v63  ;;  %v9130_v57 = vpop.f32.mrb[6].mxu0 }
 0x249   : > { %v10468_v58 = vadd.f32 %v9317_v52, %v10447_v37  ;;  %v9319_v59 = vadd.f32 %v9130_v57, %v10392_v0  ;;  %v3448_v60 = vpop.f32.mrb[7].mxu0 }
 0x24a   : > { %v3819_v61 = vcombine.high %v3787_v54, %v3787_v54  ;;  %v3826_v36 = vrot.slane %v3787_v54, %v10461_v27  ;;  %v3788_v62 = vmul.f32 0.33333334, %v3756_v55  ;;  %v3695_v39 = vadd.f32 %v9318_v56, %v10447_v37 }
 0x24b   : > { %v9320_v63 = vadd.f32 %v3448_v60, %v10394_v2  ;;  %v10479_v0 = vadd.f32 %v9319_v59, %v10447_v37 }
 0x24c   : > { %v3833_v26 = vrot.slane %v3819_v61, %v10461_v27  ;;  %v3834_v40 = vcombine.high %v3826_v36, %v3826_v36  ;;  %v4158_v42 = vrot.slane %v3826_v36, %v10463_v49  ;;  %v8331_v43 = vrot.slane %v3826_v36, 9 }
 0x24d   : > { %v3836_v45 = vcombine.high %v3788_v62, %v3788_v62  ;;  %v3843_v46 = vrot.slane %v3788_v62, %v10461_v27  ;;  %v3727_v34 = vmax.f32 %v3695_v39, 0.0 }
 0x24e   : > { %v3835_v47 = vcombine.high %v3833_v26, %v3833_v26  ;;  %v4162_v50 = vrot.slane %v3834_v40, %v10463_v49  ;;  %v4166_v51 = vrot.slane %v3833_v26, %v10463_v49  ;;  %v8332_v2 = vrot.slane %v3834_v40, 9  ;;  %v9133_v33 = vpop.f32.mrb[8].mxu0 }
 0x24f   : > { %v8333_v5 = vrot.slane %v3833_v26, 9  ;;  %v3850_v8 = vrot.slane %v3836_v45, %v10461_v27  ;;  %v3851_v21 = vcombine.high %v3843_v46, %v3843_v46  ;;  %v3461_v48 = vpop.f32.mrb[9].mxu0  ;;  %v4642_v59 = vadd.f32 %v8331_v43, %v3826_v36 }
 0x250   : > { %v4170_v52 = vrot.slane %v3835_v47, %v10463_v49  ;;  %v4380_v53 = vsel %vm4379_vm2, %v4162_v50, %v4158_v42  ;;  %v8334_v54 = vrot.slane %v3835_v47, 9  ;;  %v9134_v56 = vpop.f32.mrb[10].mxu0  ;;  %v4174_v61 = vrot.slane %v3843_v46, %v10463_v49 }
 0x251   : > { %v4382_v57 = vsel %vm4381_vm3, %v4166_v51, %v4380_v53  ;;  %v3852_v60 = vcombine.high %v3850_v8, %v3850_v8  ;;  %v3464_v62 = vpop.f32.mrb[11].mxu0  ;;  %v4643_v16 = vadd.f32 %v8332_v2, %v3834_v40  ;;  %v4644_v45 = vadd.f32 %v8333_v5, %v3833_v26 }
 0x252   : > { %v4178_v39 = vrot.slane %v3851_v21, %v10463_v49  ;;  %v4384_v1 = vsel %vm4383_vm4, %v4170_v52, %v4382_v57  ;;  %v4182_v41 = vrot.slane %v3850_v8, %v10463_v49  ;;  %v8335_v50 = vrot.slane %v3843_v46, 9 }
 0x253   : > { %v4386_v42 = vsel %vm4385_vm5, %v4174_v61, %v4384_v1  ;;  %v8336_v55 = vrot.slane %v3851_v21, 9  ;;  %v4645_v35 = vadd.f32 %v8334_v54, %v3835_v47  ;;  %v12523_v36 = vmax.f32 %v10468_v58, 0.0 }
 0x254   : > { %v4388_v51 = vsel %vm4387_vm6, %v4178_v39, %v4386_v42  ;;  %v3696_v53 = vadd.f32 %v9320_v63, %v10447_v37  ;;  %v8337_v40 = vrot.slane %v3850_v8, 9  ;;  %v8338_v2 = vrot.slane %v3852_v60, 9 }
 0x255   : > { %v3757_v43 = vadd.f32 %v12523_v36, %v3727_v34  ;;  %v4390_v26 = vsel %vm4389_vm7, %v4182_v41, %v4388_v51  ;;  %v4646_v5 = vadd.f32 %v8335_v50, %v3843_v46  ;;  %v4647_v57 = vadd.f32 %v8336_v55, %v3851_v21 }
 0x256   : > { %v4442_v52 = vsel %vm4441_vm8, 0.0, %v4390_v26  ;;  %v12524_v1 = vmax.f32 %v10450_v44, 0.0  ;;  %v3728_v32 = vmax.f32 %v3696_v53, 0.0  ;;  %v10503_v47 = vpop.f32.mrb[12].mxu0  ;;  %v9321_v34 = vadd.f32 %v9133_v33, %v10396_v4 }
 0x257   : > { %v4714_v54 = vcombine.high %v4442_v52, %v4442_v52  ;;  %v4721_v39 = vrot.slane %v4442_v52, %v10461_v27  ;;  %v10508_v63 = vadd.f32 %v3461_v48, %v10398_v6  ;;  %v10510_v41 = vpop.f32.mrb[13].mxu0  ;;  %v12525_v42 = vmax.f32 %v10479_v0, 0.0 }
 0x258   : > { %v3773_v61 = vadd.f32 %v3757_v43, %v12524_v1  ;;  %v10515_v44 = vadd.f32 %v9134_v56, %v10400_v7  ;;  %v10518_v55 = vadd.f32 %v3464_v62, %v10402_v9  ;;  %v10520_v50 = vpop.f32.mrb[14].mxu0  ;;  %v4648_v36 = vadd.f32 %v8337_v40, %v3850_v8 }
 0x259   : > { %v3758_v21 = vadd.f32 %v12525_v42, %v3728_v32  ;;  %v4728_v51 = vrot.slane %v4714_v54, %v10461_v27  ;;  %v4729_v4 = vcombine.high %v4721_v39, %v4721_v39  ;;  %v4850_v33 = vrot.slane %v4721_v39, 1  ;;  %v10523_v48 = vpop.f32.mrb[15].mxu0 }
 0x25a   : > { %v3789_v46 = vmul.f32 0.33333334, %v3773_v61  ;;  %v4946_v6 = vadd.f32 %v4721_v39, %v4642_v59  ;;  %v4649_v43 = vadd.f32 %v8338_v2, %v3852_v60  ;;  %v12526_v32 = vmax.f32 %v10455_v3, 0.0 }
 0x25b   : > { %v4730_v7 = vcombine.high %v4728_v51, %v4728_v51  ;;  %v4851_v56 = vrot.slane %v4729_v4, 1  ;;  %v4852_v52 = vrot.slane %v4728_v51, 1  ;;  %v4947_v9 = vadd.f32 %v4850_v33, %v4643_v16 }
 0x25c   : > { %v3853_v53 = vcombine.high %v3789_v46, %v3789_v46  ;;  %v3774_v26 = vadd.f32 %v3758_v21, %v12526_v32  ;;  %v4948_v62 = vadd.f32 %v4729_v4, %v4644_v45  ;;  %v4950_v1 = vadd.f32 %v4728_v51, %v4646_v5 }
 0x25d   : > { %v10527_v61 = vmul.f32 0.33333334, %v4946_v6  ;;  %v3860_v54 = vrot.slane %v3789_v46, %v10461_v27  ;;  %v4853_v42 = vrot.slane %v4730_v7, 1  ;;  %v4949_v59 = vadd.f32 %v4851_v56, %v4645_v35 }
 0x25e   : > { %v4951_v39 = vadd.f32 %v4852_v52, %v4647_v57  ;;  %v4952_v31 = vadd.f32 %v4730_v7, %v4648_v36  ;;  %v10530_v8 = vmul.f32 0.33333334, %v4947_v9  ;;  %v10532_v60 = vmul.f32 0.33333334, %v4948_v62  ;;  %v10545_v57 = vpop.f32.mrb[16].mxu0 }
 0x25f   : > { %12527 = vst [vmem:[#allocation12_spill] sm:$0xff] %v10527_v61  ;;  %v3867_v3 = vrot.slane %v3853_v53, %v10461_v27  ;;  %v10535_v40 = vadd.f32 %v4853_v42, %v4649_v43  ;;  %v10537_v2 = vmul.f32 0.33333334, %v4949_v59  ;;  %v5141_v16 = vrot.slane %v10527_v61, %v10472_v38  ;;  %v10551_v51 = vpop.f32.mrb[17].mxu0 }
 0x260   : > { %12528 = vst [vmem:[#allocation13_spill] sm:$0xff] %v10530_v8  ;;  %12529 = vst [vmem:[#allocation14_spill] sm:$0xff] %v10532_v60  ;;  %v5145_v45 = vrot.slane %v10530_v8, %v10472_v38  ;;  %v5149_v35 = vrot.slane %v10532_v60, %v10472_v38  ;;  %v3868_v5 = vcombine.high %v3860_v54, %v3860_v54  ;;  %v10547_v46 = vmul.f32 0.33333334, %v4950_v1  ;;  %v10556_v43 = vpop.f32.mrb[18].mxu0 }
 0x261   : > { %12530 = vst [vmem:[#allocation15_spill] sm:$0xff] %v10537_v2  ;;  %v10549_v21 = vmul.f32 0.33333334, %v4951_v39  ;;  %v3869_v33 = vcombine.high %v3867_v3, %v3867_v3  ;;  %v4186_v6 = vrot.slane %v3860_v54, %v10463_v49  ;;  %v5153_v53 = vrot.slane %v10537_v2, %v10472_v38  ;;  %v10561_v7 = vpop.f32.mrb[19].mxu0 }
 0x262   : > { %12531 = vst [vmem:[#allocation16_spill] sm:$0xff] %v10547_v46  ;;  %v5395_v4 = vsel %vm5394_vm9, %v5145_v45, %v5141_v16  ;;  %v4190_v36 = vrot.slane %v3868_v5, %v10463_v49  ;;  %v4194_v32 = vrot.slane %v3867_v3, %v10463_v49  ;;  %v10567_v62 = vadd.f32 %v9321_v34, %v10447_v37 }
 0x263   : > { %12532 = vst [vmem:[#allocation17_spill] sm:$0xff] %v10549_v21  ;;  %v5396_v56 = vsel %vm4379_vm2, %v5149_v35, %v5395_v4  ;;  %v4198_v52 = vrot.slane %v3869_v33, %v10463_v49  ;;  %v10570_v42 = vmul.f32 0.33333334, %v4952_v31  ;;  %v5157_v59 = vrot.slane %v10547_v46, %v10472_v38 }
 0x264   : > { %v4391_v9 = vsel %vm4379_vm2, %v4190_v36, %v4186_v6  ;;  %v3790_v16 = vmul.f32 0.33333334, %v3774_v26  ;;  %v5397_v35 = vsel %vm4381_vm3, %v5153_v53, %v5396_v56  ;;  %v8339_v4 = vrot.slane %v3860_v54, 9 }
 0x265   : > { %v4392_v1 = vsel %vm4381_vm3, %v4194_v32, %v4391_v9  ;;  %12533 = vst [vmem:[#allocation18_spill] sm:$0xff] %v10570_v42  ;;  %v8340_v6 = vrot.slane %v3868_v5, 9  ;;  %v8341_v36 = vrot.slane %v3867_v3, 9  ;;  %v3699_v26 = vadd.f32 %v10508_v63, %v10447_v37 }
 0x266   : > { %v10576_v45 = vpop.f32.mrb[20].mxu0  ;;  %v3870_v2 = vcombine.high %v3790_v16, %v3790_v16  ;;  %v3877_v31 = vrot.slane %v3790_v16, %v10461_v27  ;;  %v4393_v32 = vsel %vm4383_vm4, %v4198_v52, %v4392_v1  ;;  %v10590_v53 = vadd.f32 %v10515_v44, %v10447_v37 }
 0x267   : > { %v10579_v34 = vpop.f32.mrb[21].mxu0  ;;  %v3700_v56 = vadd.f32 %v10518_v55, %v10447_v37  ;;  %v10596_v39 = vadd.f32 %v10503_v47, %v10404_v10  ;;  %v10601_v52 = vsel %vm4383_vm4, %v5157_v59, %v5397_v35  ;;  %v8342_v60 = vrot.slane %v3869_v33, 9 }
 0x268   : > { %v10584_v46 = vpop.f32.mrb[22].mxu0  ;;  %v3884_v1 = vrot.slane %v3870_v2, %v10461_v27  ;;  %v3885_v9 = vcombine.high %v3877_v31, %v3877_v31  ;;  %v4202_v63 = vrot.slane %v3877_v31, %v10463_v49  ;;  %v3731_v44 = vmax.f32 %v3699_v26, 0.0 }
 0x269   : > { %v10598_v16 = vpop.f32.mrb[23].mxu0  ;;  %v12445_v8 = vmax.f32 %v10590_v53, 0.0  ;;  %v3732_v61 = vmax.f32 %v3700_v56, 0.0  ;;  %v4650_v55 = vadd.f32 %v8339_v4, %v3860_v54  ;;  %v4651_v29 = vadd.f32 %v8340_v6, %v3868_v5 }
 0x26a   : > { %12534 = vst [vmem:[#allocation19_spill] sm:$0xff] %v10598_v16  ;;  %v3886_v30 = vcombine.high %v3884_v1, %v3884_v1  ;;  %v4206_v10 = vrot.slane %v3885_v9, %v10463_v49  ;;  %v4394_v47 = vsel %vm4385_vm5, %v4202_v63, %v4393_v32  ;;  %v4652_v28 = vadd.f32 %v8341_v36, %v3867_v3 }
 0x26b   : > { %v4210_v59 = vrot.slane %v3884_v1, %v10463_v49  ;;  %v12535_v2 = vmax.f32 %v10567_v62, 0.0  ;;  %v8343_v25 = vrot.slane %v3877_v31, 9  ;;  %v8344_v26 = vrot.slane %v3885_v9, 9 }
 0x26c   : > { %v4395_v17 = vsel %vm4387_vm6, %v4206_v10, %v4394_v47  ;;  %v3760_v56 = vadd.f32 %v12445_v8, %v3732_v61  ;;  %v4653_v4 = vadd.f32 %v8342_v60, %v3869_v33  ;;  %v8345_v32 = vrot.slane %v3884_v1, 9 }
 0x26d   : > { %v3759_v35 = vadd.f32 %v12535_v2, %v3731_v44  ;;  %v4396_v16 = vsel %vm4389_vm7, %v4210_v59, %v4395_v17  ;;  %v12536_v3 = vmax.f32 %v10468_v58, 0.0  ;;  %v8346_v63 = vrot.slane %v3886_v30, 9 }
 0x26e   : > { %v10614_v54 = vpop.f32.mrb[24].mxu0  ;;  %v4443_v36 = vsel %vm4441_vm8, 0.0, %v4396_v16  ;;  %v12537_v44 = vmax.f32 %v10479_v0, 0.0  ;;  %v10626_v61 = vadd.f32 %v10510_v41, %v10406_v11  ;;  %v10633_v58 = vadd.f32 %v10520_v50, %v10408_v12 }
 0x26f   : > { %v3775_v5 = vadd.f32 %v3759_v35, %v12536_v3  ;;  %v10619_v6 = vpop.f32.mrb[25].mxu0  ;;  %v4731_v60 = vcombine.high %v4443_v36, %v4443_v36  ;;  %v4738_v17 = vrot.slane %v4443_v36, %v10461_v27  ;;  %v4654_v16 = vadd.f32 %v8343_v25, %v3877_v31 }
 0x270   : > { %v3776_v10 = vadd.f32 %v3760_v56, %v12537_v44  ;;  %v10628_v47 = vpop.f32.mrb[26].mxu0  ;;  %v4655_v2 = vadd.f32 %v8344_v26, %v3885_v9  ;;  %v10639_v0 = vadd.f32 %v10523_v48, %v10410_v13  ;;  %v10643_v11 = vadd.f32 %v10545_v57, %v10412_v14 }
 0x271   : > { %v3791_v33 = vmul.f32 0.33333334, %v3775_v5  ;;  %v10635_v59 = vpop.f32.mrb[27].mxu0  ;;  %v4745_v41 = vrot.slane %v4731_v60, %v10461_v27  ;;  %v4746_v35 = vcombine.high %v4738_v17, %v4738_v17  ;;  %v4854_v56 = vrot.slane %v4738_v17, 1 }
 0x272   : > { %12538 = vst [vmem:[#allocation20_spill] sm:$0xff] %v10635_v59  ;;  %v4954_v3 = vadd.f32 %v4738_v17, %v4650_v55  ;;  %v4656_v5 = vadd.f32 %v8345_v32, %v3884_v1  ;;  %v4657_v12 = vadd.f32 %v8346_v63, %v3886_v30  ;;  %v3792_v36 = vmul.f32 0.33333334, %v3776_v10 }
 0x273   : > { %v3887_v50 = vcombine.high %v3791_v33, %v3791_v33  ;;  %v4747_v44 = vcombine.high %v4745_v41, %v4745_v41  ;;  %v4855_v25 = vrot.slane %v4746_v35, 1  ;;  %v4856_v31 = vrot.slane %v4745_v41, 1 }
 0x274   : > { %v4955_v9 = vadd.f32 %v4854_v56, %v4651_v29  ;;  %v4956_v26 = vadd.f32 %v4746_v35, %v4652_v28  ;;  %v4958_v13 = vadd.f32 %v4745_v41, %v4654_v16  ;;  %v10646_v48 = vmul.f32 0.33333334, %v4954_v3 }
 0x275   : > { %v3894_v14 = vrot.slane %v3791_v33, %v10461_v27  ;;  %v4857_v60 = vrot.slane %v4747_v44, 1  ;;  %v4957_v8 = vadd.f32 %v4855_v25, %v4653_v4  ;;  %v4959_v59 = vadd.f32 %v4856_v31, %v4655_v2 }
 0x276   : > { %12539 = vst [vmem:[#allocation21_spill] sm:$0xff] %v10646_v48  ;;  %v10649_v57 = vpop.f32.mrb[28].mxu0  ;;  %v4960_v55 = vadd.f32 %v4747_v44, %v4656_v5  ;;  %v10653_v30 = vmul.f32 0.33333334, %v4955_v9  ;;  %v10655_v32 = vmul.f32 0.33333334, %v4956_v26  ;;  %v3901_v29 = vrot.slane %v3887_v50, %v10461_v27 }
 0x277   : > { %v10651_v1 = vpop.f32.mrb[29].mxu0  ;;  %v10659_v28 = vmul.f32 0.33333334, %v10535_v40  ;;  %v12543_v63 = vrot.slane %v10549_v21, %v10472_v38  ;;  %v10666_v4 = vadd.f32 %v4857_v60, %v4657_v12  ;;  %v10668_v17 = vmul.f32 0.33333334, %v4957_v8 }
 0x278   : > { %12540 = vst [vmem:[#allocation22_spill] sm:$0xff] %v10651_v1  ;;  %12541 = vst [vmem:[#allocation23_spill] sm:$0xff] %v10653_v30  ;;  %v5173_v33 = vrot.slane %v10646_v48, %v10472_v38  ;;  %v5177_v16 = vrot.slane %v10653_v30, %v10472_v38  ;;  %v3902_v2 = vcombine.high %v3894_v14, %v3894_v14  ;;  %v10674_v41 = vpop.f32.mrb[30].mxu0  ;;  %v10696_v9 = vmul.f32 0.33333334, %v4958_v13 }
 0x279   : > { %12542 = vst [vmem:[#allocation24_spill] sm:$0xff] %v10655_v32  ;;  %v5399_v10 = vsel %vm4385_vm5, %v12543_v63, %v10601_v52  ;;  %12544 = vst [vmem:[#allocation25_spill] sm:$0xff] %v10668_v17  ;;  %v5165_v40 = vrot.slane %v10570_v42, %v10472_v38  ;;  %v5181_v35 = vrot.slane %v10655_v32, %v10472_v38  ;;  %v10684_v56 = vpop.f32.mrb[31].mxu0  ;;  %v8347_v63 = vrot.slane %v3894_v14, 9 }
 0x27a   : > { %12545 = vst [vmem:[#allocation26_spill] sm:$0xff] %v10674_v41  ;;  %v3904_v52 = vcombine.high %v3792_v36, %v3792_v36  ;;  %v10682_v8 = vadd.f32 %v10596_v39, %v10447_v37  ;;  %12546 = vst [vmem:[#allocation27_spill] sm:$0xff] %v10684_v56  ;;  %v5402_v3 = vsel %vm5394_vm9, %v5177_v16, %v5173_v33  ;;  %v8348_v44 = vrot.slane %v3902_v2, 9 }
 0x27b   : > { %v3903_v5 = vcombine.high %v3901_v29, %v3901_v29  ;;  %v4214_v12 = vrot.slane %v3894_v14, %v10463_v49  ;;  %v4218_v50 = vrot.slane %v3902_v2, %v10463_v49  ;;  %v10692_v25 = vsel %vm4387_vm6, %v5165_v40, %v5399_v10  ;;  %12547 = vst [vmem:[#allocation28_spill] sm:$0xff] %v10696_v9 }
 0x27c   : > { %v4222_v31 = vrot.slane %v3901_v29, %v10463_v49  ;;  %v3911_v39 = vrot.slane %v3792_v36, %v10461_v27  ;;  %v5185_v26 = vrot.slane %v10668_v17, %v10472_v38  ;;  %v5403_v33 = vsel %vm4379_vm2, %v5181_v35, %v5402_v3 }
 0x27d   : > { %v4397_v60 = vsel %vm4379_vm2, %v4218_v50, %v4214_v12  ;;  %v4226_v16 = vrot.slane %v3903_v5, %v10463_v49  ;;  %v8349_v42 = vrot.slane %v3901_v29, 9  ;;  %v3918_v36 = vrot.slane %v3904_v52, %v10461_v27 }
 0x27e   : > { %v4398_v40 = vsel %vm4381_vm3, %v4222_v31, %v4397_v60  ;;  %v3703_v13 = vadd.f32 %v10626_v61, %v10447_v37  ;;  %v10708_v21 = vmul.f32 0.33333334, %v4959_v59  ;;  %v10710_v17 = vmul.f32 0.33333334, %v4960_v55 }
 0x27f   : > { %v8350_v12 = vrot.slane %v3903_v5, 9  ;;  %v3919_v50 = vcombine.high %v3911_v39, %v3911_v39  ;;  %v5189_v35 = vrot.slane %v10696_v9, %v10472_v38  ;;  %v5404_v3 = vsel %vm4381_vm3, %v5185_v26, %v5403_v33 }
 0x280   : > { %v4658_v10 = vadd.f32 %v8347_v63, %v3894_v14  ;;  %v4230_v31 = vrot.slane %v3911_v39, %v10463_v49  ;;  %v4659_v60 = vadd.f32 %v8348_v44, %v3902_v2  ;;  %v3920_v32 = vcombine.high %v3918_v36, %v3918_v36 }
 0x281   : > { %v4234_v52 = vrot.slane %v3919_v50, %v10463_v49  ;;  %v4399_v61 = vsel %vm4383_vm4, %v4226_v16, %v4398_v40  ;;  %v4660_v59 = vadd.f32 %v8349_v42, %v3901_v29  ;;  %v4238_v55 = vrot.slane %v3918_v36, %v10463_v49 }
 0x282   : > { %v4400_v30 = vsel %vm4385_vm5, %v4230_v31, %v4399_v61  ;;  %v3735_v48 = vmax.f32 %v3703_v13, 0.0  ;;  %v4661_v56 = vadd.f32 %v8350_v12, %v3903_v5  ;;  %v8351_v41 = vrot.slane %v3911_v39, 9 }
 0x283   : > { %v4401_v9 = vsel %vm4387_vm6, %v4234_v52, %v4400_v30  ;;  %v10723_v14 = vadd.f32 %v10633_v58, %v10447_v37  ;;  %v8352_v44 = vrot.slane %v3919_v50, 9  ;;  %v8353_v26 = vrot.slane %v3918_v36, 9 }
 0x284   : > { %v4402_v2 = vsel %vm4389_vm7, %v4238_v55, %v4401_v9  ;;  %v12548_v63 = vmax.f32 %v10682_v8, 0.0  ;;  %v8354_v33 = vrot.slane %v3920_v32, 9  ;;  %v3704_v30 = vadd.f32 %v10639_v0, %v10447_v37 }
 0x285   : > { %v4444_v29 = vsel %vm4441_vm8, 0.0, %v4402_v2  ;;  %v3738_v16 = vmax.f32 %v10723_v14, 0.0  ;;  %v12549_v58 = vmax.f32 %v10567_v62, 0.0  ;;  %v9330_v9 = vadd.f32 %v10551_v51, %v10414_v15 }
 0x286   : > { %v3761_v42 = vadd.f32 %v12548_v63, %v3735_v48  ;;  %v4748_v5 = vcombine.high %v4444_v29, %v4444_v29  ;;  %v4755_v40 = vrot.slane %v4444_v29, %v10461_v27  ;;  %v4662_v12 = vadd.f32 %v8351_v41, %v3911_v39 }
 0x287   : > { %v3736_v31 = vmax.f32 %v3704_v30, 0.0  ;;  %v9331_v48 = vadd.f32 %v10556_v43, %v10416_v18  ;;  %v10741_v52 = vadd.f32 %v10561_v7, %v10418_v19  ;;  %v4663_v63 = vadd.f32 %v8352_v44, %v3919_v50 }
 0x288   : > { %v3777_v13 = vadd.f32 %v3761_v42, %v12549_v58  ;;  %v4762_v0 = vrot.slane %v4748_v5, %v10461_v27  ;;  %v4763_v61 = vcombine.high %v4755_v40, %v4755_v40  ;;  %v4858_v55 = vrot.slane %v4755_v40, 1 }
 0x289   : > { %v4962_v2 = vadd.f32 %v4755_v40, %v4658_v10  ;;  %v4664_v62 = vadd.f32 %v8353_v26, %v3918_v36  ;;  %v3762_v15 = vadd.f32 %v3738_v16, %v3736_v31  ;;  %v4665_v18 = vadd.f32 %v8354_v33, %v3920_v32 }
 0x28a   : > { %v3793_v42 = vmul.f32 0.33333334, %v3777_v13  ;;  %v4764_v51 = vcombine.high %v4762_v0, %v4762_v0  ;;  %v4859_v41 = vrot.slane %v4763_v61, 1  ;;  %v4860_v39 = vrot.slane %v4762_v0, 1 }
 0x28b   : > { %v4963_v29 = vadd.f32 %v4858_v55, %v4659_v60  ;;  %v4964_v43 = vadd.f32 %v4763_v61, %v4660_v59  ;;  %v4966_v30 = vadd.f32 %v4762_v0, %v4662_v12  ;;  %v10746_v19 = vmul.f32 0.33333334, %v4962_v2 }
 0x28c   : > { %v4861_v7 = vrot.slane %v4764_v51, 1  ;;  %v4965_v5 = vadd.f32 %v4859_v41, %v4661_v56  ;;  %v4967_v58 = vadd.f32 %v4860_v39, %v4663_v63  ;;  %v4968_v1 = vadd.f32 %v4764_v51, %v4664_v62 }
 0x28d   : > { %v5405_v10 = vsel %vm4383_vm4, %v5189_v35, %v5404_v3  ;;  %v10749_v36 = vmul.f32 0.33333334, %v4963_v29  ;;  %v10751_v50 = vmul.f32 0.33333334, %v4964_v43  ;;  %v3921_v44 = vcombine.high %v3793_v42, %v3793_v42 }
 0x28e   : > { %v12552_v60 = vrot.slane %v10659_v28, %v10472_v38  ;;  %v5193_v59 = vrot.slane %v10708_v21, %v10472_v38  ;;  %v10762_v56 = vadd.f32 %v4861_v7, %v4665_v18  ;;  %v10764_v26 = vmul.f32 0.33333334, %v4965_v5 }
 0x28f   : > { %12550 = vst [vmem:[#allocation29_spill] sm:$0xff] %v10749_v36  ;;  %12551 = vst [vmem:[#allocation30_spill] sm:$0xff] %v10751_v50  ;;  %v5205_v35 = vrot.slane %v10746_v19, %v10472_v38  ;;  %v5209_v3 = vrot.slane %v10749_v36, %v10472_v38  ;;  %v5213_v33 = vrot.slane %v10751_v50, %v10472_v38  ;;  %v10776_v12 = vmul.f32 0.33333334, %v4966_v30 }
 0x290   : > { %v10758_v32 = vsel %vm4389_vm7, %v12552_v60, %v10692_v25  ;;  %12553 = vst [vmem:[#allocation31_spill] sm:$0xff] %v10764_v26  ;;  %v3928_v40 = vrot.slane %v3793_v42, %v10461_v27  ;;  %v5197_v25 = vrot.slane %v10710_v17, %v10472_v38  ;;  %v5406_v13 = vsel %vm4385_vm5, %v5193_v59, %v5405_v10 }
 0x291   : > { %12554 = vst [vmem:[#allocation32_spill] sm:$0xff] %v10776_v12  ;;  %v5217_v31 = vrot.slane %v10764_v26, %v10472_v38  ;;  %v5409_v0 = vsel %vm5394_vm9, %v5209_v3, %v5205_v35  ;;  %v3935_v61 = vrot.slane %v3921_v44, %v10461_v27  ;;  %v10784_v2 = vadd.f32 %v10643_v11, %v10447_v37 }
 0x292   : > { %v3936_v55 = vcombine.high %v3928_v40, %v3928_v40  ;;  %v5410_v63 = vsel %vm4379_vm2, %v5213_v33, %v5409_v0  ;;  %v4242_v62 = vrot.slane %v3928_v40, %v10463_v49  ;;  %v12555_v42 = vmax.f32 %v10590_v53, 0.0 }
 0x293   : > { %v3707_v41 = vadd.f32 %v9330_v9, %v10447_v37  ;;  %v5411_v39 = vsel %vm4381_vm3, %v5217_v31, %v5410_v63  ;;  %v10792_v29 = vcombine.high %v3935_v61, %v3935_v61  ;;  %v4250_v43 = vrot.slane %v3935_v61, %v10463_v49 }
 0x294   : > { %v3778_v51 = vadd.f32 %v3762_v15, %v12555_v42  ;;  %v4246_v18 = vrot.slane %v3936_v55, %v10463_v49  ;;  %v10797_v11 = vmul.f32 0.33333334, %v10666_v4  ;;  %v10800_v30 = vsel %vm4387_vm6, %v5197_v25, %v5406_v13 }
 0x295   : > { %v5221_v53 = vrot.slane %v10776_v12, %v10472_v38  ;;  %v10805_v15 = vadd.f32 %v9331_v48, %v10447_v37  ;;  %v10807_v9 = vmul.f32 0.33333334, %v4967_v58  ;;  %v4254_v7 = vrot.slane %v10792_v29, %v10463_v49 }
 0x296   : > { %12556 = vst [vmem:[#allocation33_spill] sm:$0xff] %v10797_v11  ;;  %v4403_v5 = vsel %vm4379_vm2, %v4246_v18, %v4242_v62  ;;  %v3741_v10 = vmax.f32 %v10784_v2, 0.0  ;;  %v10813_v4 = vmul.f32 0.33333334, %v4968_v1  ;;  %v8355_v59 = vrot.slane %v3928_v40, 9 }
 0x297   : > { %12557 = vst [vmem:[#allocation34_spill] sm:$0xff] %v10807_v9  ;;  %v10816_v44 = vsel %vm4383_vm4, %v5221_v53, %v5411_v39  ;;  %v4404_v60 = vsel %vm4381_vm3, %v4250_v43, %v4403_v5  ;;  %v8356_v35 = vrot.slane %v3936_v55, 9  ;;  %v3794_v48 = vmul.f32 0.33333334, %v3778_v51  ;;  %v12559_v51 = vld [vmem:[#allocation19_spill] sm:$0xff] }
 0x298   : > { %12558 = vst [vmem:[#allocation35_spill] sm:$0xff] %v10813_v4  ;;  %v4405_v58 = vsel %vm4383_vm4, %v4254_v7, %v4404_v60  ;;  %v3739_v3 = vmax.f32 %v3707_v41, 0.0  ;;  %v12454_v33 = vmax.f32 %v10805_v15, 0.0  ;;  %v3708_v25 = vadd.f32 %v10741_v52, %v10447_v37 }
 0x299   : > { %v9333_v1 = vadd.f32 %v10576_v45, %v10420_v20  ;;  %v9334_v13 = vadd.f32 %v10579_v34, %v10422_v22  ;;  %v3938_v31 = vcombine.high %v3794_v48, %v3794_v48  ;;  %v3945_v0 = vrot.slane %v3794_v48, %v10461_v27 }
 0x29a   : > { %v3763_v2 = vadd.f32 %v3741_v10, %v3739_v3  ;;  %v10830_v63 = vadd.f32 %v10584_v46, %v10424_v23  ;;  %v3740_v62 = vmax.f32 %v3708_v25, 0.0  ;;  %v10838_v20 = vadd.f32 %v12559_v51, %v10426_v24 }
 0x29b   : > { %v10833_v42 = vadd.f32 %v9333_v1, %v10447_v37  ;;  %v3711_v52 = vadd.f32 %v9334_v13, %v10447_v37  ;;  %v8357_v45 = vrot.slane %v3935_v61, 9  ;;  %v3952_v22 = vrot.slane %v3938_v31, %v10461_v27 }
 0x29c   : > { %v3953_v34 = vcombine.high %v3945_v0, %v3945_v0  ;;  %v4258_v41 = vrot.slane %v3945_v0, %v10463_v49  ;;  %v12560_v39 = vmax.f32 %v10682_v8, 0.0  ;;  %v3764_v46 = vadd.f32 %v12454_v33, %v3740_v62 }
 0x29d   : > { %v12453_v18 = vmax.f32 %v10833_v42, 0.0  ;;  %v3743_v43 = vmax.f32 %v3711_v52, 0.0  ;;  %v4666_v53 = vadd.f32 %v8355_v59, %v3928_v40  ;;  %v3954_v7 = vcombine.high %v3952_v22, %v3952_v22 }
 0x29e   : > { %v3779_v23 = vadd.f32 %v3763_v2, %v12560_v39  ;;  %v4262_v24 = vrot.slane %v3953_v34, %v10463_v49  ;;  %v4406_v5 = vsel %vm4385_vm5, %v4258_v41, %v4405_v58  ;;  %v8358_v60 = vrot.slane %v10792_v29, 9 }
 0x29f   : > { %v4266_v48 = vrot.slane %v3952_v22, %v10463_v49  ;;  %v8359_v3 = vrot.slane %v3945_v0, 9  ;;  %v8360_v1 = vrot.slane %v3953_v34, 9  ;;  %v3780_v13 = vadd.f32 %v3764_v46, %v3738_v16 }
 0x2a0   : > { %v3795_v25 = vmul.f32 0.33333334, %v3779_v23  ;;  %v4407_v8 = vsel %vm4387_vm6, %v4262_v24, %v4406_v5  ;;  %v3765_v40 = vadd.f32 %v12453_v18, %v3743_v43  ;;  %v4667_v59 = vadd.f32 %v8356_v35, %v3936_v55 }
 0x2a1   : > { %v4668_v31 = vadd.f32 %v8357_v45, %v3935_v61  ;;  %v4408_v2 = vsel %vm4389_vm7, %v4266_v48, %v4407_v8  ;;  %v8361_v52 = vrot.slane %v3952_v22, 9  ;;  %v8362_v51 = vrot.slane %v3954_v7, 9 }
 0x2a2   : > { %v3955_v58 = vcombine.high %v3795_v25, %v3795_v25  ;;  %v4445_v62 = vsel %vm4441_vm8, 0.0, %v4408_v2  ;;  %v10859_v41 = vrot.slane %v3795_v25, %v10461_v27  ;;  %v3781_v16 = vadd.f32 %v3765_v40, %v3741_v10 }
 0x2a3   : > { %v4765_v39 = vcombine.high %v4445_v62, %v4445_v62  ;;  %v4772_v23 = vrot.slane %v4445_v62, %v10461_v27  ;;  %v4669_v55 = vadd.f32 %v8358_v60, %v10792_v29  ;;  %v4670_v61 = vadd.f32 %v8359_v3, %v3945_v0 }
 0x2a4   : > { %v10863_v14 = vrot.slane %v3955_v58, %v10461_v27  ;;  %v4671_v35 = vadd.f32 %v8360_v1, %v3953_v34  ;;  %v10868_v45 = vcombine.high %v10859_v41, %v10859_v41  ;;  %v4672_v48 = vadd.f32 %v8361_v52, %v3952_v22 }
 0x2a5   : > { %v4779_v46 = vrot.slane %v4765_v39, %v10461_v27  ;;  %v4780_v43 = vcombine.high %v4772_v23, %v4772_v23  ;;  %v4862_v24 = vrot.slane %v4772_v23, 1  ;;  %v4970_v5 = vadd.f32 %v4772_v23, %v4666_v53 }
 0x2a6   : > { %v4673_v25 = vadd.f32 %v8362_v51, %v3954_v7  ;;  %v10873_v8 = vcombine.high %v10863_v14, %v10863_v14  ;;  %v3796_v10 = vmul.f32 0.33333334, %v3780_v13  ;;  %v4274_v2 = vrot.slane %v10868_v45, %v10463_v49 }
 0x2a7   : > { %v4781_v40 = vcombine.high %v4779_v46, %v4779_v46  ;;  %v4863_v29 = vrot.slane %v4780_v43, 1  ;;  %v4864_v0 = vrot.slane %v4779_v46, 1  ;;  %v4971_v34 = vadd.f32 %v4862_v24, %v4667_v59 }
 0x2a8   : > { %v4972_v60 = vadd.f32 %v4780_v43, %v4668_v31  ;;  %v4974_v3 = vadd.f32 %v4779_v46, %v4670_v61  ;;  %v10875_v1 = vmul.f32 0.33333334, %v4970_v5  ;;  %v4270_v13 = vrot.slane %v10859_v41, %v10463_v49 }
 0x2a9   : > { %v4865_v58 = vrot.slane %v4781_v40, 1  ;;  %v4973_v53 = vadd.f32 %v4863_v29, %v4669_v55  ;;  %v4975_v22 = vadd.f32 %v4864_v0, %v4671_v35  ;;  %v4976_v7 = vadd.f32 %v4781_v40, %v4672_v48 }
 0x2aa   : > { %v10879_v62 = vmul.f32 0.33333334, %v4971_v34  ;;  %v10881_v52 = vmul.f32 0.33333334, %v4972_v60  ;;  %v4278_v59 = vrot.slane %v10863_v14, %v10463_v49  ;;  %v10888_v31 = vmul.f32 0.33333334, %v10762_v56 }
 0x2ab   : > { %v5225_v51 = vrot.slane %v10807_v9, %v10472_v38  ;;  %v4977_v39 = vadd.f32 %v4865_v58, %v4673_v25  ;;  %v10892_v23 = vmul.f32 0.33333334, %v4973_v53  ;;  %v5237_v55 = vrot.slane %v10875_v1, %v10472_v38 }
 0x2ac   : > { %12561 = vst [vmem:[#allocation19_spill] sm:$0xff] %v10879_v62  ;;  %12562 = vst [vmem:[#allocation36_spill] sm:$0xff] %v10881_v52  ;;  %v5241_v61 = vrot.slane %v10879_v62, %v10472_v38  ;;  %v5245_v35 = vrot.slane %v10881_v52, %v10472_v38  ;;  %v4409_v46 = vsel %vm4379_vm2, %v4274_v2, %v4270_v13  ;;  %v10917_v34 = vmul.f32 0.33333334, %v4974_v3 }
 0x2ad   : > { %12563 = vst [vmem:[#allocation37_spill] sm:$0xff] %v10888_v31  ;;  %12564 = vst [vmem:[#allocation38_spill] sm:$0xff] %v10892_v23  ;;  %v5201_v56 = vrot.slane %v10797_v11, %v10472_v38  ;;  %v5413_v43 = vsel %vm4385_vm5, %v5225_v51, %v10816_v44  ;;  %v4282_v24 = vrot.slane %v10873_v8, %v10463_v49  ;;  %v10919_v44 = vmul.f32 0.33333334, %v4975_v22 }
 0x2ae   : > { %v3972_v5 = vcombine.high %v3796_v10, %v3796_v10  ;;  %v5229_v48 = vrot.slane %v10813_v4, %v10472_v38  ;;  %v5249_v25 = vrot.slane %v10892_v23, %v10472_v38  ;;  %v5416_v40 = vsel %vm5394_vm9, %v5241_v61, %v5237_v55  ;;  %12565 = vst [vmem:[#allocation39_spill] sm:$0xff] %v10917_v34 }
 0x2af   : > { %v4410_v29 = vsel %vm4381_vm3, %v4278_v59, %v4409_v46  ;;  %v10915_v0 = vsel %vm4389_vm7, %v5201_v56, %v10800_v30  ;;  %12566 = vst [vmem:[#allocation40_spill] sm:$0xff] %v10919_v44  ;;  %v5417_v60 = vsel %vm4379_vm2, %v5245_v35, %v5416_v40  ;;  %v8363_v53 = vrot.slane %v10859_v41, 9 }
 0x2b0   : > { %v10925_v58 = vsel %vm4387_vm6, %v5229_v48, %v5413_v43  ;;  %v3979_v13 = vrot.slane %v3796_v10, %v10461_v27  ;;  %v8364_v59 = vrot.slane %v10868_v45, 9  ;;  %v3986_v30 = vrot.slane %v3972_v5, %v10461_v27 }
 0x2b1   : > { %v4411_v3 = vsel %vm4383_vm4, %v4282_v24, %v4410_v29  ;;  %v3797_v22 = vmul.f32 0.33333334, %v3781_v16  ;;  %v10932_v51 = vmul.f32 0.33333334, %v4976_v7  ;;  %v5418_v55 = vsel %vm4381_vm3, %v5249_v25, %v5417_v60 }
 0x2b2   : > { %v3987_v61 = vcombine.high %v3979_v13, %v3979_v13  ;;  %v4286_v35 = vrot.slane %v3979_v13, %v10463_v49  ;;  %v10936_v46 = vmul.f32 0.33333334, %v4977_v39  ;;  %v5253_v56 = vrot.slane %v10917_v34, %v10472_v38 }
 0x2b3   : > { %12567 = vst [vmem:[#allocation41_spill] sm:$0xff] %v10932_v51  ;;  %v5257_v10 = vrot.slane %v10919_v44, %v10472_v38  ;;  %v8365_v43 = vrot.slane %v10863_v14, 9  ;;  %v8366_v24 = vrot.slane %v10873_v8, 9  ;;  %v3988_v16 = vcombine.high %v3986_v30, %v3986_v30 }
 0x2b4   : > { %12568 = vst [vmem:[#allocation42_spill] sm:$0xff] %v10936_v46  ;;  %v4290_v7 = vrot.slane %v3987_v61, %v10463_v49  ;;  %v4412_v5 = vsel %vm4385_vm5, %v4286_v35, %v4411_v3  ;;  %v5419_v48 = vsel %vm4383_vm4, %v5253_v56, %v5418_v55  ;;  %v4294_v39 = vrot.slane %v3986_v30, %v10463_v49 }
 0x2b5   : > { %v8367_v25 = vrot.slane %v3979_v13, 9  ;;  %v3996_v40 = vrot.slane %v3797_v22, %v10461_v27  ;;  %v8368_v60 = vrot.slane %v3987_v61, 9  ;;  %v8369_v2 = vrot.slane %v3986_v30, 9 }
 0x2b6   : > { %v4413_v29 = vsel %vm4387_vm6, %v4290_v7, %v4412_v5  ;;  %v3989_v18 = vcombine.high %v3797_v22, %v3797_v22  ;;  %v4674_v33 = vadd.f32 %v8363_v53, %v10859_v41  ;;  %v4675_v44 = vadd.f32 %v8364_v59, %v10868_v45 }
 0x2b7   : > { %v4676_v34 = vadd.f32 %v8365_v43, %v10863_v14  ;;  %v4414_v3 = vsel %vm4389_vm7, %v4294_v39, %v4413_v29  ;;  %v4677_v55 = vadd.f32 %v8366_v24, %v10873_v8  ;;  %v8370_v56 = vrot.slane %v3988_v16, 9 }
 0x2b8   : > { %v4446_v35 = vsel %vm4441_vm8, 0.0, %v4414_v3  ;;  %v4004_v23 = vcombine.high %v3996_v40, %v3996_v40  ;;  %v5420_v52 = vsel %vm4385_vm5, %v5257_v10, %v5419_v48  ;;  %v4678_v7 = vadd.f32 %v8367_v25, %v3979_v13 }
 0x2b9   : > { %v4782_v5 = vcombine.high %v4446_v35, %v4446_v35  ;;  %v4789_v22 = vrot.slane %v4446_v35, %v10461_v27  ;;  %v4679_v62 = vadd.f32 %v8368_v60, %v3987_v61  ;;  %v4680_v41 = vadd.f32 %v8369_v2, %v3986_v30 }
 0x2ba   : > { %v10959_v45 = vrot.slane %v3989_v18, %v10461_v27  ;;  %v10963_v14 = vadd.f32 %v10830_v63, %v10447_v37  ;;  %v4681_v24 = vadd.f32 %v8370_v56, %v3988_v16  ;;  %v4298_v13 = vrot.slane %v3996_v40, %v10463_v49 }
 0x2bb   : > { %v4796_v8 = vrot.slane %v4782_v5, %v10461_v27  ;;  %v4797_v53 = vcombine.high %v4789_v22, %v4789_v22  ;;  %v4866_v59 = vrot.slane %v4789_v22, 1  ;;  %v4978_v43 = vadd.f32 %v4789_v22, %v4674_v33 }
 0x2bc   : > { %v4302_v10 = vrot.slane %v4004_v23, %v10463_v49  ;;  %v8371_v48 = vrot.slane %v3996_v40, 9  ;;  %v10970_v37 = vcombine.high %v10959_v45, %v10959_v45  ;;  %v8372_v63 = vrot.slane %v4004_v23, 9 }
 0x2bd   : > { %v4798_v61 = vcombine.high %v4796_v8, %v4796_v8  ;;  %v4867_v2 = vrot.slane %v4797_v53, 1  ;;  %v4868_v30 = vrot.slane %v4796_v8, 1  ;;  %v4979_v18 = vadd.f32 %v4866_v59, %v4675_v44 }
 0x2be   : > { %v4980_v39 = vadd.f32 %v4797_v53, %v4676_v34  ;;  %v4982_v25 = vadd.f32 %v4796_v8, %v4678_v7  ;;  %v5261_v3 = vrot.slane %v10932_v51, %v10472_v38  ;;  %v4306_v56 = vrot.slane %v10959_v45, %v10463_v49  ;;  %v10981_v34 = vld [vmem:[%s12428_s3] ss:$0 sm:$0xff] }
 0x2bf   : > { %v4869_v29 = vrot.slane %v4798_v61, 1  ;;  %v4981_v60 = vadd.f32 %v4867_v2, %v4677_v55  ;;  %v4983_v33 = vadd.f32 %v4868_v30, %v4679_v62  ;;  %v4984_v16 = vadd.f32 %v4798_v61, %v4680_v41  ;;  %v12574_v30 = vld [vmem:[#allocation4_spill] sm:$0xff] }
 0x2c0   : > { %v10974_v35 = vmul.f32 0.33333334, %v4979_v18  ;;  %v3712_v44 = vadd.f32 %v10981_v34, %v10838_v20  ;;  %v10989_v7 = vmul.f32 0.33333334, %v4978_v43  ;;  %v4415_v5 = vsel %vm4379_vm2, %v4302_v10, %v4298_v13 }
 0x2c1   : > { %v10987_v55 = vadd.f32 %v4869_v29, %v4681_v24  ;;  %v10993_v22 = vsel %vm4387_vm6, %v5261_v3, %v5420_v52  ;;  %v8373_v41 = vrot.slane %v10959_v45, 9  ;;  %v10996_v8 = vadd.f32 %v8371_v48, %v3996_v40  ;;  %v12573_v48 = vld [vmem:[#allocation3_spill] sm:$0xff]  ;;  %v12577_v29 = vld [vmem:[#allocation6_spill] sm:$0xff]  ;;  %v12578_v3 = vld [vmem:[#allocation20_spill] sm:$0xff] }
 0x2c2   : > { %12569 = vst [vmem:[#allocation43_spill] sm:$0xff] %v10974_v35  ;;  %v3746_v53 = vmax.f32 %v10963_v14, 0.0  ;;  %v10999_v59 = vmul.f32 0.33333334, %v4980_v39  ;;  %v4310_v20 = vrot.slane %v10970_v37, %v10463_v49  ;;  %v11004_v43 = vadd.f32 %v8372_v63, %v4004_v23 }
 0x2c3   : > { %v11006_v61 = vmul.f32 0.33333334, %v4982_v25  ;;  %v5273_v52 = vrot.slane %v10974_v35, %v10472_v38  ;;  %v4416_v13 = vsel %vm4381_vm3, %v4306_v56, %v4415_v5  ;;  %v3744_v40 = vmax.f32 %v3712_v44, 0.0  ;;  %v12576_v25 = vld [vmem:[#allocation5_spill] sm:$0xff]  ;;  %v12579_v5 = vld [vmem:[#allocation7_spill] sm:$0xff] }
 0x2c4   : > { %12570 = vst [vmem:[#allocation44_spill] sm:$0xff] %v10999_v59  ;;  %v11011_v10 = vmul.f32 0.33333334, %v4981_v60  ;;  %v5269_v14 = vrot.slane %v10989_v7, %v10472_v38  ;;  %v9337_v2 = vadd.f32 %v10614_v54, %v12573_v48  ;;  %v9338_v23 = vadd.f32 %v10619_v6, %v12574_v30 }
 0x2c5   : > { %12571 = vst [vmem:[#allocation45_spill] sm:$0xff] %v11006_v61  ;;  %v11019_v18 = vmul.f32 0.33333334, %v4983_v33  ;;  %v3766_v39 = vadd.f32 %v3746_v53, %v3744_v40  ;;  %v9339_v63 = vadd.f32 %v10628_v47, %v12576_v25  ;;  %v9340_v56 = vadd.f32 %v12578_v3, %v12577_v29  ;;  %v12581_v3 = vld [vmem:[#allocation8_spill] sm:$0xff] }
 0x2c6   : > { %12572 = vst [vmem:[#allocation46_spill] sm:$0xff] %v11011_v10  ;;  %v5277_v60 = vrot.slane %v10999_v59, %v10472_v38  ;;  %v11028_v44 = vadd.f32 %v10981_v34, %v9337_v2  ;;  %v3715_v54 = vadd.f32 %v10981_v34, %v9338_v23  ;;  %v9341_v6 = vadd.f32 %v10649_v57, %v12579_v5  ;;  %v12582_v23 = vld [vmem:[#allocation22_spill] sm:$0xff] }
 0x2c7   : > { %12575 = vst [vmem:[#allocation3_spill] sm:$0xff] %v11019_v18  ;;  %v5423_v33 = vsel %vm5394_vm9, %v5273_v52, %v5269_v14  ;;  %v12580_v40 = vmax.f32 %v10805_v15, 0.0  ;;  %v11037_v47 = vadd.f32 %v10981_v34, %v9339_v63  ;;  %v3716_v30 = vadd.f32 %v10981_v34, %v9340_v56  ;;  %v12583_v14 = vld [vmem:[#allocation9_spill] sm:$0xff]  ;;  %v12584_v15 = vld [vmem:[#allocation26_spill] sm:$0xff] }
 0x2c8   : > { %v12461_v25 = vmax.f32 %v11028_v44, 0.0  ;;  %v3747_v29 = vmax.f32 %v3715_v54, 0.0  ;;  %v3721_v2 = vadd.f32 %v10981_v34, %v9341_v6  ;;  %v9342_v62 = vadd.f32 %v12582_v23, %v12581_v3  ;;  %v12586_v54 = vld [vmem:[#allocation27_spill] sm:$0xff] }
 0x2c9   : > { %v3782_v48 = vadd.f32 %v3766_v39, %v12580_v40  ;;  %v12463_v57 = vmax.f32 %v11037_v47, 0.0  ;;  %v3748_v52 = vmax.f32 %v3716_v30, 0.0  ;;  %v9343_v39 = vadd.f32 %v12584_v15, %v12583_v14  ;;  %v12585_v40 = vld [vmem:[#allocation10_spill] sm:$0xff] }
 0x2ca   : > { %v3767_v63 = vadd.f32 %v12461_v25, %v3747_v29  ;;  %v3753_v5 = vmax.f32 %v3721_v2, 0.0  ;;  %v3719_v56 = vadd.f32 %v10981_v34, %v9342_v62  ;;  %v11052_v59 = vadd.f32 %v12586_v54, %v12585_v40 }
 0x2cb   : > { %v3798_v24 = vmul.f32 0.33333334, %v3782_v48  ;;  %v5281_v6 = vrot.slane %v11011_v10, %v10472_v38  ;;  %v3768_v30 = vadd.f32 %v12463_v57, %v3748_v52  ;;  %v4417_v23 = vsel %vm4383_vm4, %v4310_v20, %v4416_v13 }
 0x2cc   : > { %v12587_v29 = vmax.f32 %v10833_v42, 0.0  ;;  %v3751_v14 = vmax.f32 %v3719_v56, 0.0  ;;  %v5424_v62 = vsel %vm4379_vm2, %v5277_v60, %v5423_v33  ;;  %v12464_v25 = vmov 0.0|0.0  }
 0x2cd   : > { %v4006_v48 = vcombine.high %v3798_v24, %v3798_v24  ;;  %v4013_v3 = vrot.slane %v3798_v24, %v10461_v27  ;;  %9259 = vmatprep.subr.bf16.mxu1 %v12464_v25  ;;  %v11066_v24 = vmul.f32 0.33333334, %v4984_v16  ;;  %v3784_v52 = vadd.f32 %v3768_v30, %v3746_v53 }
 0x2ce   : > { %v3783_v2 = vadd.f32 %v3767_v63, %v12587_v29  ;;  %v11068_v57 = vadd.f32 %v3753_v5, %v3751_v14  ;;  %v5285_v42 = vrot.slane %v11006_v61, %v10472_v38  ;;  %v5425_v33 = vsel %vm4381_vm3, %v5281_v6, %v5424_v62 }
 0x2cf   : > { %v4020_v15 = vrot.slane %v4006_v48, %v10461_v27  ;;  %v4021_v40 = vcombine.high %v4013_v3, %v4013_v3  ;;  %v4314_v54 = vrot.slane %v4013_v3, %v10463_v49  ;;  %12588 = vst [vmem:[#allocation4_spill] sm:$0xff] %v11066_v24  ;;  %v4684_v63 = vadd.f32 %v8373_v41, %v10959_v45 }
 0x2d0   : > { %v3799_v10 = vmul.f32 0.33333334, %v3783_v2  ;;  %v8375_v16 = vrot.slane %v4013_v3, 9  ;;  %v11080_v29 = vmul.f32 0.33333334, %v10987_v55  ;;  %v5289_v2 = vrot.slane %v11019_v18, %v10472_v38 }
 0x2d1   : > { %v4022_v20 = vcombine.high %v4020_v15, %v4020_v15  ;;  %v4318_v13 = vrot.slane %v4021_v40, %v10463_v49  ;;  %v4418_v60 = vsel %vm4385_vm5, %v4314_v54, %v4417_v23  ;;  %v4322_v56 = vrot.slane %v4020_v15, %v10463_v49 }
 0x2d2   : > { %v8376_v53 = vrot.slane %v4021_v40, 9  ;;  %v4023_v5 = vcombine.high %v3799_v10, %v3799_v10  ;;  %v4030_v30 = vrot.slane %v3799_v10, %v10461_v27  ;;  %12589 = vst [vmem:[#allocation5_spill] sm:$0xff] %v11080_v29  ;;  %v8377_v23 = vrot.slane %v4020_v15, 9 }
 0x2d3   : > { %v4419_v48 = vsel %vm4387_vm6, %v4318_v13, %v4418_v60  ;;  %v8378_v14 = vrot.slane %v4022_v20, 9  ;;  %v5426_v54 = vsel %vm4383_vm4, %v5285_v42, %v5425_v33  ;;  %v12590_v55 = vrot.slane %v10970_v37, 9 }
 0x2d4   : > { %v4420_v45 = vsel %vm4389_vm7, %v4322_v56, %v4419_v48  ;;  %v11088_v62 = vcombine.high %v4030_v30, %v4030_v30  ;;  %v4686_v25 = vadd.f32 %v8375_v16, %v4013_v3  ;;  %v4687_v18 = vadd.f32 %v8376_v53, %v4021_v40 }
 0x2d5   : > { %v4447_v41 = vsel %vm4441_vm8, 0.0, %v4420_v45  ;;  %v4685_v10 = vadd.f32 %v12590_v55, %v10970_v37  ;;  %v11096_v6 = vrot.slane %v4023_v5, %v10461_v27  ;;  %v11099_v56 = vadd.f32 %v10981_v34, %v9343_v39 }
 0x2d6   : > { %v4799_v13 = vcombine.high %v4447_v41, %v4447_v41  ;;  %v4806_v60 = vrot.slane %v4447_v41, %v10461_v27  ;;  %v4688_v33 = vadd.f32 %v8377_v23, %v4020_v15  ;;  %v4689_v35 = vadd.f32 %v8378_v14, %v4022_v20 }
 0x2d7   : > { %v4326_v37 = vrot.slane %v4030_v30, %v10463_v49  ;;  %v4330_v3 = vrot.slane %v11088_v62, %v10463_v49  ;;  %v11109_v55 = vcombine.high %v11096_v6, %v11096_v6  ;;  %v8379_v51 = vrot.slane %v4030_v30, 9 }
 0x2d8   : > { %v4813_v48 = vrot.slane %v4799_v13, %v10461_v27  ;;  %v4814_v45 = vcombine.high %v4806_v60, %v4806_v60  ;;  %v4870_v61 = vrot.slane %v4806_v60, 1  ;;  %v4986_v42 = vadd.f32 %v4806_v60, %v10996_v8 }
 0x2d9   : > { %v4334_v8 = vrot.slane %v11096_v6, %v10463_v49  ;;  %v4421_v60 = vsel %vm4379_vm2, %v4330_v3, %v4326_v37  ;;  %v3800_v4 = vmul.f32 0.33333334, %v3784_v52  ;;  %v12600_v12 = vmax.f32 %v11037_v47, 0.0 }
 0x2da   : > { %v4815_v40 = vcombine.high %v4813_v48, %v4813_v48  ;;  %v4871_v16 = vrot.slane %v4814_v45, 1  ;;  %v4872_v53 = vrot.slane %v4813_v48, 1  ;;  %v4987_v5 = vadd.f32 %v4870_v61, %v11004_v43 }
 0x2db   : > { %v4988_v39 = vadd.f32 %v4814_v45, %v4684_v63  ;;  %v4990_v41 = vadd.f32 %v4813_v48, %v4686_v25  ;;  %v11113_v13 = vmul.f32 0.33333334, %v4986_v42  ;;  %v11119_v61 = vsel %vm4385_vm5, %v5289_v2, %v5426_v54 }
 0x2dc   : > { %v4873_v15 = vrot.slane %v4815_v40, 1  ;;  %v4989_v20 = vadd.f32 %v4871_v16, %v4685_v10  ;;  %v4991_v23 = vadd.f32 %v4872_v53, %v4687_v18  ;;  %v4992_v14 = vadd.f32 %v4815_v40, %v4688_v33 }
 0x2dd   : > { %12591 = vst [vmem:[#allocation6_spill] sm:$0xff] %v11113_v13  ;;  %v3720_v63 = vadd.f32 %v10981_v34, %v11052_v59  ;;  %v11123_v48 = vmul.f32 0.33333334, %v4987_v5  ;;  %v4338_v18 = vrot.slane %v11109_v55, %v10463_v49  ;;  %v8380_v10 = vrot.slane %v11088_v62, 9 }
 0x2de   : > { %v4993_v25 = vadd.f32 %v4873_v15, %v4689_v35  ;;  %v3754_v45 = vmax.f32 %v11099_v56, 0.0  ;;  %v11129_v52 = vmul.f32 0.33333334, %v4988_v39  ;;  %v4422_v42 = vsel %vm4381_vm3, %v4334_v8, %v4421_v60 }
 0x2df   : > { %12592 = vst [vmem:[#allocation20_spill] sm:$0xff] %v11123_v48  ;;  %v8381_v2 = vrot.slane %v11096_v6, 9  ;;  %v8382_v35 = vrot.slane %v11109_v55, 9  ;;  %v11134_v54 = vmul.f32 0.33333334, %v4990_v41  ;;  %v5301_v34 = vrot.slane %v11113_v13, %v10472_v38 }
 0x2e0   : > { %12593 = vst [vmem:[#allocation7_spill] sm:$0xff] %v11129_v52  ;;  %v4690_v59 = vadd.f32 %v8379_v51, %v4030_v30  ;;  %v4040_v33 = vcombine.high %v3800_v4, %v3800_v4  ;;  %v11138_v37 = vmul.f32 0.33333334, %v4989_v20  ;;  %v11140_v3 = vmul.f32 0.33333334, %v4991_v23 }
 0x2e1   : > { %12594 = vst [vmem:[#allocation8_spill] sm:$0xff] %v11134_v54  ;;  %v11142_v56 = vmul.f32 0.33333334, %v4992_v14  ;;  %v4047_v40 = vrot.slane %v3800_v4, %v10461_v27  ;;  %v5305_v16 = vrot.slane %v11123_v48, %v10472_v38  ;;  %v4423_v5 = vsel %vm4383_vm4, %v4338_v18, %v4422_v42 }
 0x2e2   : > { %12595 = vst [vmem:[#allocation22_spill] sm:$0xff] %v11138_v37  ;;  %12596 = vst [vmem:[#allocation9_spill] sm:$0xff] %v11140_v3  ;;  %v4054_v53 = vrot.slane %v4040_v33, %v10461_v27  ;;  %v12598_v39 = vmax.f32 %v11028_v44, 0.0  ;;  %v5309_v30 = vrot.slane %v11129_v52, %v10472_v38  ;;  %v3752_v15 = vmax.f32 %v3720_v63, 0.0  ;;  %v5474_v44 = vld [vmem:[%s12429_s4] sm:$0xff] }
 0x2e3   : > { %12597 = vst [vmem:[#allocation26_spill] sm:$0xff] %v11142_v56  ;;  %v4055_v41 = vcombine.high %v4047_v40, %v4047_v40  ;;  %v4342_v8 = vrot.slane %v4047_v40, %v10463_v49  ;;  %v11155_v20 = vmul.f32 0.33333334, %v4993_v25  ;;  %v4691_v23 = vadd.f32 %v8380_v10, %v11088_v62 }
 0x2e4   : > { %v3785_v51 = vadd.f32 %v11068_v57, %v12598_v39  ;;  %v5475_v57 = vld [vmem:[%s12429_s4 + $0x8] sm:$0xff]  ;;  %v5313_v60 = vrot.slane %v11138_v37, %v10472_v38  ;;  %v4056_v63 = vcombine.high %v4054_v53, %v4054_v53  ;;  %v4350_v42 = vrot.slane %v4054_v53, %v10463_v49 }
 0x2e5   : > { %12599 = vst [vmem:[#allocation10_spill] sm:$0xff] %v11155_v20  ;;  %v4346_v25 = vrot.slane %v4055_v41, %v10463_v49  ;;  %v4424_v18 = vsel %vm4385_vm5, %v4342_v8, %v4423_v5  ;;  %v8383_v62 = vrot.slane %v4047_v40, 9  ;;  %v8385_v10 = vrot.slane %v4054_v53, 9 }
 0x2e6   : > { %v3801_v14 = vmul.f32 0.33333334, %v3785_v51  ;;  %v3770_v43 = vadd.f32 %v3754_v45, %v3752_v15  ;;  %v9260_v4 = vpack.c.bf16 %v5475_v57, %v5474_v44  ;;  %v5430_v52 = vsel %vm5394_vm9, %v5305_v16, %v5301_v34 }
 0x2e7   : > { %v4425_v39 = vsel %vm4387_vm6, %v4346_v25, %v4424_v18  ;;  %v8384_v5 = vrot.slane %v4055_v41, 9  ;;  %v8386_v13 = vrot.slane %v4056_v63, 9  ;;  %v4692_v45 = vadd.f32 %v8381_v2, %v11096_v6 }
 0x2e8   : > { %v11172_v33 = vrot.slane %v3801_v14, %v10461_v27  ;;  %v4057_v51 = vcombine.high %v3801_v14, %v3801_v14  ;;  %v4426_v48 = vsel %vm4389_vm7, %v4350_v42, %v4425_v39  ;;  %v3786_v25 = vadd.f32 %v3770_v43, %v12600_v12  ;;  %9261 = vmatpush3.bf16.msra.mxu1 %v9260_v4 }
 0x2e9   : > { %v4448_v8 = vsel %vm4441_vm8, 0.0, %v4426_v48  ;;  %v4693_v15 = vadd.f32 %v8382_v35, %v11109_v55  ;;  %v12601_v16 = vmov 0.0|0.0   ;;  %v5431_v44 = vsel %vm4379_vm2, %v5309_v30, %v5430_v52 }
 0x2ea   : > { %v4072_v9 = vcombine.high %v11172_v33, %v11172_v33  ;;  %v4816_v14 = vcombine.high %v4448_v8, %v4448_v8  ;;  %v4823_v34 = vrot.slane %v4448_v8, %v10461_v27  ;;  %9262 = vmatprep.subr.bf16.mxu1 %v12601_v16  ;;  %v4694_v48 = vadd.f32 %v8383_v62, %v4047_v40 }
 0x2eb   : > { %v4696_v57 = vadd.f32 %v8385_v10, %v4054_v53  ;;  %v11190_v18 = vrot.slane %v4057_v51, %v10461_v27  ;;  %v4695_v6 = vadd.f32 %v8384_v5, %v4055_v41  ;;  %v4697_v2 = vadd.f32 %v8386_v13, %v4056_v63 }
 0x2ec   : > { %v4830_v47 = vrot.slane %v4816_v14, %v10461_v27  ;;  %v4831_v12 = vcombine.high %v4823_v34, %v4823_v34  ;;  %v4874_v43 = vrot.slane %v4823_v34, 1  ;;  %v4994_v4 = vadd.f32 %v4823_v34, %v4690_v59 }
 0x2ed   : > { %v4354_v55 = vrot.slane %v11172_v33, %v10463_v49  ;;  %v4358_v35 = vrot.slane %v4072_v9, %v10463_v49  ;;  %v11200_v10 = vcombine.high %v11190_v18, %v11190_v18  ;;  %v5432_v51 = vsel %vm4381_vm3, %v5313_v60, %v5431_v44 }
 0x2ee   : > { %v4832_v42 = vcombine.high %v4830_v47, %v4830_v47  ;;  %v4875_v39 = vrot.slane %v4831_v12, 1  ;;  %v4876_v52 = vrot.slane %v4830_v47, 1  ;;  %v4995_v40 = vadd.f32 %v4874_v43, %v4691_v23 }
 0x2ef   : > { %v4996_v53 = vadd.f32 %v4831_v12, %v4692_v45  ;;  %v4998_v30 = vadd.f32 %v4830_v47, %v4694_v48  ;;  %v11196_v62 = vmul.f32 0.33333334, %v4994_v4  ;;  %v4362_v23 = vrot.slane %v11190_v18, %v10463_v49  ;;  %v5476_v47 = vld [vmem:[%s12429_s4 + $0x10] sm:$0xff]  ;;  %v5477_v12 = vld [vmem:[%s12429_s4 + $0x18] sm:$0xff] }
 0x2f0   : > { %v4877_v59 = vrot.slane %v4832_v42, 1  ;;  %v4997_v41 = vadd.f32 %v4875_v39, %v4693_v15  ;;  %v4999_v13 = vadd.f32 %v4876_v52, %v4695_v6  ;;  %v5000_v63 = vadd.f32 %v4832_v42, %v4696_v57 }
 0x2f1   : > { %12602 = vst [vmem:[#allocation27_spill] sm:$0xff] %v11196_v62  ;;  %v11203_v5 = vmul.f32 0.33333334, %v4995_v40  ;;  %v11205_v8 = vmul.f32 0.33333334, %v4996_v53  ;;  %v4427_v34 = vsel %vm4379_vm2, %v4358_v35, %v4354_v55  ;;  %v8387_v48 = vrot.slane %v11172_v33, 9 }
 0x2f2   : > { %v5001_v14 = vadd.f32 %v4877_v59, %v4697_v2  ;;  %v11213_v15 = vmul.f32 0.33333334, %v4997_v41  ;;  %v5333_v60 = vrot.slane %v11196_v62, %v10472_v38  ;;  %v8388_v57 = vrot.slane %v4072_v9, 9  ;;  %v5478_v40 = vld [vmem:[%s12429_s4 + $0x20] sm:$0xff]  ;;  %v5479_v53 = vld [vmem:[%s12429_s4 + $0x28] sm:$0xff] }
 0x2f3   : > { %12603 = vst [vmem:[#allocation47_spill] sm:$0xff] %v11203_v5  ;;  %12604 = vst [vmem:[#allocation48_spill] sm:$0xff] %v11205_v8  ;;  %v5337_v44 = vrot.slane %v11203_v5, %v10472_v38  ;;  %v12606_v4 = vrot.slane %v11134_v54, %v10472_v38  ;;  %v5341_v2 = vrot.slane %v11205_v8, %v10472_v38  ;;  %v8389_v39 = vrot.slane %v11190_v18, 9 }
 0x2f4   : > { %12605 = vst [vmem:[#allocation49_spill] sm:$0xff] %v11213_v15  ;;  %v4366_v55 = vrot.slane %v11200_v10, %v10463_v49  ;;  %v4428_v42 = vsel %vm4381_vm3, %v4362_v23, %v4427_v34  ;;  %v3802_v52 = vmul.f32 0.33333334, %v3786_v25  ;;  %v11246_v59 = vmul.f32 0.33333334, %v4998_v30 }
 0x2f5   : > { %v11231_v6 = vsel %vm4383_vm4, %v12606_v4, %v5432_v51  ;;  %v5437_v35 = vsel %vm5394_vm9, %v5337_v44, %v5333_v60  ;;  %v8390_v41 = vrot.slane %v11200_v10, 9  ;;  %v11250_v51 = vadd.f32 %v8387_v48, %v11172_v33 }
 0x2f6   : > { %12607 = vst [vmem:[#allocation50_spill] sm:$0xff] %v11246_v59  ;;  %v9263_v60 = vpack.c.bf16 %v5477_v12, %v5476_v47  ;;  %v5345_v23 = vrot.slane %v11213_v15, %v10472_v38  ;;  %v11254_v25 = vadd.f32 %v8388_v57, %v4072_v9  ;;  %v4074_v34 = vcombine.high %v3802_v52, %v3802_v52  ;;  %v5480_v9 = vld [vmem:[%s12429_s4 + $0x30] sm:$0xff]  ;;  %v5482_v12 = vld [vmem:[%s12429_s4 + $0x40] sm:$0xff] }
 0x2f7   : > { %v4081_v44 = vrot.slane %v3802_v52, %v10461_v27  ;;  %v11257_v4 = vmul.f32 0.33333334, %v4999_v13  ;;  %v5438_v43 = vsel %vm4379_vm2, %v5341_v2, %v5437_v35  ;;  %v4429_v30 = vsel %vm4383_vm4, %v4366_v55, %v4428_v42  ;;  %v5481_v13 = vld [vmem:[%s12429_s4 + $0x38] sm:$0xff]  ;;  %v5483_v52 = vld [vmem:[%s12429_s4 + $0x48] sm:$0xff] }
 0x2f8   : > { %9264 = vmatpush3.bf16.msra.mxu1 %v9263_v60  ;;  %v9266_v45 = vpack.c.bf16 %v5479_v53, %v5478_v40  ;;  %v11261_v37 = vmul.f32 0.33333334, %v5000_v63  ;;  %v4088_v33 = vrot.slane %v4074_v34, %v10461_v27  ;;  %v5349_v57 = vrot.slane %v11246_v59, %v10472_v38  ;;  %v11287_v40 = vld [vmem:[%s12429_s4 + $0x50] sm:$0xff] }
 0x2f9   : > { %12608 = vst [vmem:[#allocation51_spill] sm:$0xff] %v11257_v4  ;;  %v4089_v48 = vcombine.high %v4081_v44, %v4081_v44  ;;  %v4370_v47 = vrot.slane %v4081_v44, %v10463_v49  ;;  %9265 = vmatprep.subr.bf16.mxu1 %v12601_v16  ;;  %v4700_v63 = vadd.f32 %v8389_v39, %v11190_v18  ;;  %v5485_v18 = vld [vmem:[%s12429_s4 + $0x58] sm:$0xff]  ;;  %v11294_v39 = vmul.f32 0.33333334, %v5001_v14  ;;  %v11307_v14 = vld [vmem:[%s12429_s4 + $0x60] sm:$0xff] }
 0x2fa   : > { %12609 = vst [vmem:[#allocation52_spill] sm:$0xff] %v11261_v37  ;;  %v5439_v2 = vsel %vm4381_vm3, %v5345_v23, %v5438_v43  ;;  %v4090_v55 = vcombine.high %v4088_v33, %v4088_v33  ;;  %v12478_v43 = vmov 0.0   ;;  %v5353_v53 = vrot.slane %v11257_v4, %v10472_v38 }
 0x2fb   : > { %v4374_v35 = vrot.slane %v4089_v48, %v10463_v49  ;;  %v4430_v42 = vsel %vm4385_vm5, %v4370_v47, %v4429_v30  ;;  %9187 = vmatprep.mubr.msk.f32.mxu1 %vm9717_vm10, %v12478_v43  ;;  %12610 = vst [vmem:[#allocation53_spill] sm:$0xff] %v11294_v39  ;;  %v4378_v60 = vrot.slane %v4088_v33, %v10463_v49  ;;  %v8391_v59 = vrot.slane %v4081_v44, 9 }
 0x2fc   : > { %9267 = vmatpush3.bf16.msra.mxu1 %v9266_v45  ;;  %v9269_v23 = vpack.c.bf16 %v5481_v13, %v5480_v9  ;;  %v4701_v30 = vadd.f32 %v8390_v41, %v11200_v10  ;;  %v11312_v45 = vld [vmem:[%s12429_s4 + $0x68] sm:$0xff]  ;;  %v5440_v9 = vsel %vm4383_vm4, %v5349_v57, %v5439_v2  ;;  %v9272_v10 = vpack.c.bf16 %v5483_v52, %v5482_v12 }
 0x2fd   : > { %v4431_v47 = vsel %vm4387_vm6, %v4374_v35, %v4430_v42  ;;  %9268 = vmatprep.subr.bf16.mxu1 %v12601_v16  ;;  %v9275_v41 = vpack.c.bf16 %v5485_v18, %v11287_v40  ;;  %v8392_v42 = vrot.slane %v4089_v48, 9  ;;  %v8393_v43 = vrot.slane %v4088_v33, 9 }
 0x2fe   : > { %v4432_v13 = vsel %vm4389_vm7, %v4378_v60, %v4431_v47  ;;  %v8394_v34 = vrot.slane %v4090_v55, 9  ;;  %v9278_v8 = vpack.c.bf16 %v11312_v45, %v11307_v14  ;;  %v12611_v57 = vrot.slane %v11066_v24, %v10472_v38 }
 0x2ff   : > { %v4449_v35 = vsel %vm4441_vm8, 0.0, %v4432_v13  ;;  %v4702_v2 = vadd.f32 %v8391_v59, %v4081_v44  ;;  %v12612_v52 = vrot.slane %v10888_v31, %v10472_v38  ;;  %v12613_v18 = vrot.slane %v10936_v46, %v10472_v38 }
 0x300   : > { %v4833_v4 = vcombine.high %v4449_v35, %v4449_v35  ;;  %v4840_v15 = vrot.slane %v4449_v35, %v10461_v27  ;;  %9270 = vmatpush3.bf16.msra.mxu1 %v9269_v23  ;;  %v5428_v12 = vsel %vm4387_vm6, %v12611_v57, %v11119_v61  ;;  %v12614_v23 = vrot.slane %v11140_v3, %v10472_v38 }
 0x301   : > { %9271 = vmatprep.subr.bf16.mxu1 %v12601_v16  ;;  %v5415_v40 = vsel %vm4389_vm7, %v12612_v52, %v10925_v58  ;;  %v5422_v60 = vsel %vm4389_vm7, %v12613_v18, %v10993_v22  ;;  %v4703_v45 = vadd.f32 %v8392_v42, %v4089_v48  ;;  %v4704_v58 = vadd.f32 %v8393_v43, %v4088_v33 }
 0x302   : > { %v5434_v61 = vsel %vm4385_vm5, %v12614_v23, %v11231_v6  ;;  %v4847_v59 = vrot.slane %v4833_v4, %v10461_v27  ;;  %v4848_v44 = vcombine.high %v4840_v15, %v4840_v15  ;;  %v4878_v47 = vrot.slane %v4840_v15, 1 }
 0x303   : > { %v5002_v14 = vadd.f32 %v4840_v15, %v11250_v51  ;;  %v4705_v13 = vadd.f32 %v8394_v34, %v4090_v55  ;;  %v12615_v35 = vrot.slane %v11080_v29, %v10472_v38  ;;  %v5459_v15 = vadd.f32 %v10915_v0, %v10758_v32 }
 0x304   : > { %v4849_v57 = vcombine.high %v4847_v59, %v4847_v59  ;;  %v4879_v52 = vrot.slane %v4848_v44, 1  ;;  %v4880_v18 = vrot.slane %v4847_v59, 1  ;;  %v5003_v5 = vadd.f32 %v4878_v47, %v11254_v25  ;;  %9273 = vmatpush3.bf16.msra.mxu1 %v9272_v10 }
 0x305   : > { %v5429_v22 = vsel %vm4389_vm7, %v12615_v35, %v5428_v12  ;;  %v5004_v6 = vadd.f32 %v4848_v44, %v4700_v63  ;;  %v5006_v4 = vadd.f32 %v4847_v59, %v4702_v2  ;;  %v11349_v23 = vmul.f32 0.33333334, %v5002_v14  ;;  %9274 = vmatprep.subr.bf16.mxu1 %v12601_v16 }
 0x306   : > { %v4881_v51 = vrot.slane %v4849_v57, 1  ;;  %v5005_v33 = vadd.f32 %v4879_v52, %v4701_v30  ;;  %v5007_v48 = vadd.f32 %v4880_v18, %v4703_v45  ;;  %v5008_v55 = vadd.f32 %v4849_v57, %v4704_v58 }
 0x307   : > { %12616 = vst [vmem:[#allocation54_spill] sm:$0xff] %v11349_v23  ;;  %v11354_v43 = vmul.f32 0.33333334, %v5003_v5  ;;  %v11356_v34 = vmul.f32 0.33333334, %v5004_v6  ;;  %v12619_v25 = vrot.slane %v11142_v56, %v10472_v38  ;;  %v5441_v10 = vsel %vm4385_vm5, %v5353_v53, %v5440_v9  ;;  %v5488_v53 = vld [vmem:[%s12429_s4 + $0x70] sm:$0xff] }
 0x308   : > { %v5009_v42 = vadd.f32 %v4881_v51, %v4705_v13  ;;  %v11363_v12 = vmul.f32 0.33333334, %v5006_v4  ;;  %9276 = vmatpush3.bf16.msra.mxu1 %v9275_v41  ;;  %v11365_v32 = vmul.f32 0.33333334, %v5005_v33  ;;  %v5460_v0 = vadd.f32 %v5459_v15, %v5415_v40  ;;  %v5489_v9 = vld [vmem:[%s12429_s4 + $0x78] sm:$0xff] }
 0x309   : > { %12617 = vst [vmem:[#allocation55_spill] sm:$0xff] %v11354_v43  ;;  %12618 = vst [vmem:[#allocation56_spill] sm:$0xff] %v11356_v34  ;;  %v5435_v63 = vsel %vm4387_vm6, %v12619_v25, %v5434_v61  ;;  %v11367_v30 = vmul.f32 0.33333334, %v5007_v48  ;;  %v5365_v5 = vrot.slane %v11349_v23, %v10472_v38  ;;  %v5369_v2 = vrot.slane %v11354_v43, %v10472_v38 }
 0x30a   : > { %12620 = vst [vmem:[#allocation57_spill] sm:$0xff] %v11363_v12  ;;  %12621 = vst [vmem:[#allocation58_spill] sm:$0xff] %v11365_v32  ;;  %v5373_v61 = vrot.slane %v11356_v34, %v10472_v38  ;;  %9277 = vmatprep.subr.bf16.mxu1 %v12601_v16  ;;  %v11382_v41 = vmul.f32 0.33333334, %v5008_v55  ;;  %v5377_v40 = vrot.slane %v11365_v32, %v10472_v38  ;;  %v11390_v14 = vmul.f32 0.33333334, %v5009_v42 }
 0x30b   : > { %12622 = vst [vmem:[#allocation59_spill] sm:$0xff] %v11367_v30  ;;  %v12624_v59 = vrot.slane %v11261_v37, %v10472_v38  ;;  %v5461_v47 = vadd.f32 %v5460_v0, %v5422_v60  ;;  %v5361_v45 = vrot.slane %v11294_v39, %v10472_v38  ;;  %v12626_v58 = vrot.slane %v11155_v20, %v10472_v38 }
 0x30c   : > { %12623 = vst [vmem:[#allocation60_spill] sm:$0xff] %v11382_v41  ;;  %12625 = vst [vmem:[#allocation61_spill] sm:$0xff] %v11390_v14  ;;  %v5444_v35 = vsel %vm5394_vm9, %v5369_v2, %v5365_v5  ;;  %v5381_v57 = vrot.slane %v11363_v12, %v10472_v38  ;;  %9279 = vmatpush3.bf16.msra.mxu1 %v9278_v8  ;;  %v9281_v52 = vpack.c.bf16 %v5489_v9, %v5488_v53  ;;  %v5562_v53 = vld [vmem:[%s12431_s6] sm:$0xff]  ;;  %v5563_v9 = vld [vmem:[%s12431_s6 + $0x8] sm:$0xff] }
 0x30d   : > { %v5442_v44 = vsel %vm4387_vm6, %v12624_v59, %v5441_v10  ;;  %v5436_v13 = vsel %vm4389_vm7, %v12626_v58, %v5435_v63  ;;  %v5445_v18 = vsel %vm4379_vm2, %v5373_v61, %v5444_v35  ;;  %v5462_v60 = vadd.f32 %v5461_v47, %v5429_v22  ;;  %9280 = vmatprep.subr.bf16.mxu1 %v12601_v16  ;;  %v5564_v47 = vld [vmem:[%s12431_s6 + $0x10] sm:$0xff]  ;;  %v5566_v35 = vld [vmem:[%s12431_s6 + $0x20] sm:$0xff] }
 0x30e   : > { %v5385_v6 = vrot.slane %v11367_v30, %v10472_v38  ;;  %v5443_v4 = vsel %vm4389_vm7, %v5361_v45, %v5442_v44  ;;  %v5446_v15 = vsel %vm4381_vm3, %v5377_v40, %v5445_v18  ;;  %v5389_v51 = vrot.slane %v11382_v41, %v10472_v38  ;;  %v5565_v45 = vld [vmem:[%s12431_s6 + $0x18] sm:$0xff]  ;;  %v5568_v18 = vld [vmem:[%s12431_s6 + $0x30] sm:$0xff] }
 0x30f   : > { %v5447_v33 = vsel %vm4383_vm4, %v5381_v57, %v5446_v15  ;;  %v5463_v48 = vadd.f32 %v5462_v60, %v5436_v13  ;;  %v5393_v8 = vrot.slane %v11390_v14, %v10472_v38  ;;  %v9284_v59 = vpack.c.bf16 %v5563_v9, %v5562_v53  ;;  %v5567_v57 = vld [vmem:[%s12431_s6 + $0x28] sm:$0xff]  ;;  %v5569_v60 = vld [vmem:[%s12431_s6 + $0x38] sm:$0xff] }
 0x310   : > { %v5448_v22 = vsel %vm4385_vm5, %v5385_v6, %v5447_v33  ;;  %9282 = vmatpush3.bf16.msra.mxu1 %v9281_v52  ;;  %v9287_v58 = vpack.c.bf16 %v5565_v45, %v5564_v47  ;;  %v12627_v13 = vmov 0.0   ;;  %v9290_v52 = vpack.c.bf16 %v5567_v57, %v5566_v35  ;;  %v5571_v15 = vld [vmem:[%s12431_s6 + $0x48] sm:$0xff]  ;;  %v5572_v33 = vld [vmem:[%s12431_s6 + $0x50] sm:$0xff]  ;;  %v6213_v35 = vld [vmem:[%s11508_s27 + $0x20] sm:$0xff] }
 0x311   : > { %v5449_v55 = vsel %vm4387_vm6, %v5389_v51, %v5448_v22  ;;  %v5464_v25 = vadd.f32 %v5463_v48, %v5443_v4  ;;  %9283 = vmatprep.subr.bf16.mxu1 %v12601_v16  ;;  %v9293_v6 = vpack.c.bf16 %v5569_v60, %v5568_v18  ;;  %v5570_v4 = vld [vmem:[%s12431_s6 + $0x40] sm:$0xff]  ;;  %v5573_v48 = vld [vmem:[%s12431_s6 + $0x58] sm:$0xff]  ;;  %v9693_v9 = vld [vmem:[%s12433_s8 + $0x8] sm:$0xff]  }
 0x312   : > { %v5450_v63 = vsel %vm4389_vm7, %v5393_v8, %v5449_v55  ;;  %v9296_v51 = vpack.c.bf16 %v5571_v15, %v5570_v4  ;;  %v9299_v8 = vpack.c.bf16 %v5573_v48, %v5572_v33  ;;  %v5574_v22 = vld [vmem:[%s12431_s6 + $0x60] sm:$0xff]  ;;  %v5575_v55 = vld [vmem:[%s12431_s6 + $0x68] sm:$0xff]  ;;  %v9698_v45 = vld [vmem:[%s12433_s8 + $0x30] sm:$0xff]  }
 0x313   : > { %v5465_v10 = vadd.f32 %v5464_v25, %v5450_v63  ;;  %v9302_v25 = vpack.c.bf16 %v5575_v55, %v5574_v22  ;;  %v5576_v63 = vld [vmem:[%s12431_s6 + $0x70] sm:$0xff]  ;;  %v9697_v47 = vld [vmem:[%s12433_s8 + $0x28] sm:$0xff]   ;;  %v6221_v60 = vld [vmem:[%s11508_s27 + $0x60] sm:$0xff] }
 0x314   : > { %v6215_v57 = vld [vmem:[%s11508_s27 + $0x30] sm:$0xff]  ;;  %v6209_v4 = vld [vmem:[%s11508_s27] sm:$0xff]  ;;  %v6214_v55 = vld [vmem:[%s11508_s27 + $0x28] sm:$0xff] }
 0x315   : > { %v5466_v42 = vrot.slane %v5465_v10, 4  ;;  %v6219_v18 = vld [vmem:[%s11508_s27 + $0x50] sm:$0xff] }
 0x316   : > { %v6211_v15 = vld [vmem:[%s11508_s27 + $0x10] sm:$0xff] }
 0x317   : > { %v5467_v0 = vadd.f32 %v5466_v42, %v5465_v10  ;;  %v5577_v10 = vld [vmem:[%s12431_s6 + $0x78] sm:$0xff]  ;;  %v6241_v48 = vadd.f32 %v6211_v15, %v6209_v4 }
 0x318   : > { %v9305_v42 = vpack.c.bf16 %v5577_v10, %v5576_v63  ;;  %v6218_v10 = vld [vmem:[%s11508_s27 + $0x48] sm:$0xff] }
 0x319   : > { %v5468_v5 = vrot.slane %v5467_v0, 2 }
 0x31b   : > { %v5469_v2 = vadd.f32 %v5468_v5, %v5467_v0  ;;  %v5490_v0 = vld [vmem:[%s12430_s5] sm:$0x1] }
 0x31d   : > { %v5470_v61 = vrot.slane %v5469_v2, 1 }
 0x31f   : > { %v5471_v40 = vadd.f32 %v5470_v61, %v5469_v2 }
 0x321   : > { %v5473_v44 = vmul.f32 0.015625, %v5471_v40  ;;  %v9694_v40 = vld [vmem:[%s12433_s8 + $0x10] sm:$0xff]  }
 0x323   : > { %9188 = vmatmul.mubr.f32.vlgmr.msra.gmra.mrb[32].mxu1 %v5473_v44  ;;  %v9696_v44 = vld [vmem:[%s12433_s8 + $0x20] sm:$0xff]  }
 0x324   : > { %9285 = vmatpush3.bf16.msra.mxu1 %v9284_v59  ;;  %9222 = vmatprep.mubr.msk.f32.mxu1 %vm9717_vm10, %v12627_v13  ;;  %v9695_v59 = vld [vmem:[%s12433_s8 + $0x18] sm:$0xff]   ;;  %v7617_v13 = vld [vmem:[%s12435_s10] sm:$0x3] }
 0x325   : > { %9286 = vmatprep.subr.bf16.mxu1 %v12601_v16 }
 0x328   : > { %9288 = vmatpush3.bf16.msra.mxu1 %v9287_v58  ;;  %v9699_v58 = vld [vmem:[%s12433_s8 + $0x38] sm:$0xff]  }
 0x329   : > { %9289 = vmatprep.subr.bf16.mxu1 %v12601_v16 }
 0x32c   : > { %9291 = vmatpush3.bf16.msra.mxu1 %v9290_v52  ;;  %v6217_v52 = vld [vmem:[%s11508_s27 + $0x40] sm:$0xff] }
 0x32d   : > { %9292 = vmatprep.subr.bf16.mxu1 %v12601_v16  ;;  %v6245_v33 = vadd.f32 %v6219_v18, %v6217_v52 }
 0x32f   : > { %v6261_v63 = vadd.f32 %v6245_v33, %v6215_v57 }
 0x330   : > { %9294 = vmatpush3.bf16.msra.mxu1 %v9293_v6  ;;  %v6243_v6 = vadd.f32 %v6215_v57, %v6213_v35 }
 0x331   : > { %9295 = vmatprep.subr.bf16.mxu1 %v12601_v16  ;;  %v6277_v52 = vmul.f32 0.33333334, %v6261_v63 }
 0x332   : > { %v6259_v22 = vadd.f32 %v6243_v6, %v6211_v15 }
 0x334   : > { %9297 = vmatpush3.bf16.msra.mxu1 %v9296_v51  ;;  %v6223_v51 = vld [vmem:[%s11508_s27 + $0x70] sm:$0xff] }
 0x335   : > { %9298 = vmatprep.subr.bf16.mxu1 %v12601_v16 }
 0x338   : > { %9300 = vmatpush3.bf16.msra.mxu1 %v9299_v8  ;;  %v6247_v8 = vadd.f32 %v6223_v51, %v6221_v60 }
 0x339   : > { %9301 = vmatprep.subr.bf16.mxu1 %v12601_v16 }
 0x33c   : > { %9303 = vmatpush3.bf16.msra.mxu1 %v9302_v25  ;;  %v6216_v25 = vld [vmem:[%s11508_s27 + $0x38] sm:$0xff] }
 0x33d   : > { %9304 = vmatprep.subr.bf16.mxu1 %v12601_v16  ;;  %v9692_v16 = vld [vmem:[%s12433_s8] sm:$0xff]  }
 0x340   : > { %9306 = vmatpush3.bf16.msra.mxu1 %v9305_v42  ;;  %v6220_v42 = vld [vmem:[%s11508_s27 + $0x58] sm:$0xff] }
 0x341   : > { %9225 = vmatprep.subr.bf16.mxu1 %v9692_v16 }
 0x3f6   : > { %v5557_v5 = vpop.f32.mrb[32].mxu1 }
 0x3f7   : > { %v5558_v2 = vadd.f32 %v5557_v5, %v5490_v0  ;;  %v9189_v61 = vpop.f32.mrb[33].mxu1  ;;  %v6222_v0 = vld [vmem:[%s11508_s27 + $0x68] sm:$0xff]  ;;  %v6244_v5 = vadd.f32 %v6216_v25, %v6214_v55 }
 0x3f8   : > { %v6210_v61 = vld [vmem:[%s11508_s27 + $0x8] sm:$0xff] }
 0x3f9   : > { %v5561_v53 = vmax.f32 %v5558_v2, 0.0  ;;  %v6273_v2 = vmul.f32 0.33333334, %v6241_v48 }
 0x3fb   : > { %9223 = vmatmul.mubr.f32.vlgmr.msra.gmra.mrb[34].mxu1 %v5561_v53  ;;  %v6212_v53 = vld [vmem:[%s11508_s27 + $0x18] sm:$0xff]  ;;  %v6305_v57 = vcombine.high %v6273_v2, %v6273_v2  ;;  %v11530_v15 = vrot.slane %v6273_v2, %v10461_v27 }
 0x3fc   : > { %9226 = vmatpush3.bf16.msra.mxu1 %v9692_v16  ;;  %v6224_v16 = vld [vmem:[%s11508_s27 + $0x78] sm:$0xff] }
 0x3fd   : > { %9227 = vmatprep.subr.bf16.mxu1 %v9693_v9 }
 0x400   : > { %9228 = vmatpush3.bf16.msra.mxu1 %v9693_v9  ;;  %v6246_v9 = vadd.f32 %v6220_v42, %v6218_v10 }
 0x401   : > { %9229 = vmatprep.subr.bf16.mxu1 %v9694_v40 }
 0x402   : > { %v6262_v35 = vadd.f32 %v6246_v9, %v6216_v25  ;;  %v6373_v9 = vcombine.high %v6277_v52, %v6277_v52 }
 0x404   : > { %9230 = vmatpush3.bf16.msra.mxu1 %v9694_v40  ;;  %v6263_v40 = vadd.f32 %v6247_v8, %v6219_v18  ;;  %v11535_v18 = vrot.slane %v6305_v57, %v10461_v27  ;;  %v11540_v48 = vmul.f32 0.33333334, %v6262_v35  ;;  %v11544_v8 = vcombine.high %v11530_v15, %v11530_v15 }
 0x405   : > { %9231 = vmatprep.subr.bf16.mxu1 %v9695_v59  ;;  %v11625_v37 = vrot.slane %v6373_v9, %v10461_v27 }
 0x406   : > { %v11532_v51 = vmul.f32 0.33333334, %v6263_v40  ;;  %v11556_v63 = vcombine.high %v11535_v18, %v11535_v18  ;;  %v11579_v40 = vrot.slane %v6277_v52, %v10461_v27  ;;  %v6652_v52 = vrot.slane %v11535_v18, %v10463_v49 }
 0x407   : > { %v8406_v39 = vrot.slane %v11544_v8, 9  ;;  %v8407_v20 = vrot.slane %v11535_v18, 9 }
 0x408   : > { %9232 = vmatpush3.bf16.msra.mxu1 %v9695_v59  ;;  %v6275_v59 = vmul.f32 0.33333334, %v6259_v22  ;;  %12629 = vst [vmem:[#allocation63_spill] sm:$0xff] %v11579_v40  ;;  %v6656_v57 = vrot.slane %v11556_v63, %v10463_v49 }
 0x409   : > { %9233 = vmatprep.subr.bf16.mxu1 %v9696_v44 }
 0x40a   : > { %v6339_v33 = vcombine.high %v6275_v59, %v6275_v59 }
 0x40c   : > { %9234 = vmatpush3.bf16.msra.mxu1 %v9696_v44  ;;  %v11527_v44 = vsel %vm7875_vm11, %v7617_v13, 0 }
 0x40d   : > { %9235 = vmatprep.subr.bf16.mxu1 %v9697_v47  ;;  %12628 = vst [vmem:[#allocation62_spill] sm:$0xff] %v11527_v44 }
 0x410   : > { %9236 = vmatpush3.bf16.msra.mxu1 %v9697_v47  ;;  %v6242_v47 = vadd.f32 %v6212_v53, %v6210_v61 }
 0x411   : > { %9237 = vmatprep.subr.bf16.mxu1 %v9698_v45 }
 0x412   : > { %v6274_v6 = vmul.f32 0.33333334, %v6242_v47  ;;  %v11586_v47 = vrot.slane %v11540_v48, %v10461_v27 }
 0x414   : > { %9238 = vmatpush3.bf16.msra.mxu1 %v9698_v45  ;;  %v6248_v45 = vadd.f32 %v6224_v16, %v6222_v0  ;;  %v11547_v22 = vrot.slane %v6274_v6, %v10461_v27  ;;  %v6322_v10 = vcombine.high %v6274_v6, %v6274_v6 }
 0x415   : > { %9239 = vmatprep.subr.bf16.mxu1 %v9699_v58 }
 0x416   : > { %v6264_v60 = vadd.f32 %v6248_v45, %v6220_v42  ;;  %v11559_v42 = vrot.slane %v6339_v33, %v10461_v27  ;;  %v11563_v0 = vcombine.high %v11547_v22, %v11547_v22  ;;  %v6644_v45 = vrot.slane %v11530_v15, %v10463_v49 }
 0x418   : > { %9240 = vmatpush3.bf16.msra.mxu1 %v9699_v58  ;;  %v6260_v58 = vadd.f32 %v6244_v5, %v6212_v53  ;;  %v11552_v25 = vmul.f32 0.33333334, %v6264_v60  ;;  %v6336_v53 = vrot.slane %v6322_v10, %v10461_v27  ;;  %v11576_v16 = vcombine.high %v11559_v42, %v11559_v42 }
 0x419   : > { %9645 = vmatprep.subr.msk.bf16.mxu1 %vm7875_vm11, %v7617_v13  ;;  %v11538_v13 = vrot.slane %v6275_v59, %v10461_v27  ;;  %v6660_v60 = vrot.slane %v11547_v22, %v10463_v49  ;;  %v6664_v6 = vrot.slane %v11563_v0, %v10463_v49  ;;  %v6680_v10 = vrot.slane %v11559_v42, %v10463_v49 }
 0x41a   : > { %v6276_v4 = vmul.f32 0.33333334, %v6260_v58  ;;  %v6648_v58 = vrot.slane %v11544_v8, %v10463_v49  ;;  %v6684_v35 = vrot.slane %v11576_v16, %v10463_v49 }
 0x41b   : > { %v11567_v5 = vcombine.high %v11538_v13, %v11538_v13 }
 0x41c   : > { %v11550_v55 = vrot.slane %v6276_v4, %v10461_v27  ;;  %v6356_v2 = vcombine.high %v6276_v4, %v6276_v4  ;;  %v6672_v4 = vrot.slane %v11538_v13, %v10463_v49  ;;  %v6865_v32 = vsel %vm4379_vm2, %v6648_v58, %v6644_v45 }
 0x41d   : > { %v6676_v33 = vrot.slane %v11567_v5, %v10463_v49  ;;  %v6866_v43 = vsel %vm4381_vm3, %v6652_v52, %v6865_v32  ;;  %v8414_v12 = vrot.slane %v11567_v5, 9  ;;  %v8405_v32 = vrot.slane %v11530_v15, 9 }
 0x41e   : > { %v11571_v61 = vcombine.high %v11550_v55, %v11550_v55  ;;  %v11582_v59 = vrot.slane %v6356_v2, %v10461_v27  ;;  %v6668_v2 = vrot.slane %v6336_v53, %v10463_v49  ;;  %v6688_v14 = vrot.slane %v11550_v55, %v10463_v49 }
 0x41f   : > { %v6871_v34 = vsel %vm4379_vm2, %v6676_v33, %v6672_v4  ;;  %v6867_v62 = vsel %vm4383_vm4, %v6656_v57, %v6866_v43  ;;  %v8408_v43 = vrot.slane %v11556_v63, 9  ;;  %v8411_v4 = vrot.slane %v6336_v53, 9 }
 0x420   : > { %v6692_v41 = vrot.slane %v11571_v61, %v10463_v49  ;;  %v6696_v30 = vrot.slane %v11582_v59, %v10463_v49  ;;  %v6872_v23 = vsel %vm4381_vm3, %v6680_v10, %v6871_v34  ;;  %v6868_v45 = vsel %vm4385_vm5, %v6660_v60, %v6867_v62 }
 0x421   : > { %v6873_v44 = vsel %vm4383_vm4, %v6684_v35, %v6872_v23  ;;  %v8415_v34 = vrot.slane %v11559_v42, 9  ;;  %v6869_v52 = vsel %vm4387_vm6, %v6664_v6, %v6868_v45  ;;  %v8409_v23 = vrot.slane %v11547_v22, 9 }
 0x422   : > { %v6874_v58 = vsel %vm4385_vm5, %v6688_v14, %v6873_v44  ;;  %v6338_v35 = vcombine.high %v6336_v53, %v6336_v53  ;;  %v6372_v57 = vcombine.high %v11582_v59, %v11582_v59  ;;  %v6870_v62 = vsel %vm4389_vm7, %v6668_v2, %v6869_v52 }
 0x423   : > { %v6875_v9 = vsel %vm4387_vm6, %v6692_v41, %v6874_v58  ;;  %v6921_v44 = vsel %vm4441_vm8, 0.0, %v6870_v62  ;;  %v8410_v60 = vrot.slane %v11563_v0, 9  ;;  %v8413_v6 = vrot.slane %v11538_v13, 9 }
 0x424   : > { %v6876_v14 = vsel %vm4389_vm7, %v6696_v30, %v6875_v9  ;;  %v8412_v33 = vrot.slane %v6338_v35, 9  ;;  %v8416_v10 = vrot.slane %v11576_v16, 9  ;;  %v8417_v45 = vrot.slane %v11550_v55, 9 }
 0x425   : > { %v6922_v41 = vsel %vm4441_vm8, 0.0, %v6876_v14  ;;  %v8418_v58 = vrot.slane %v11571_v61, 9  ;;  %v8419_v2 = vrot.slane %v11582_v59, 9  ;;  %v8420_v52 = vrot.slane %v6372_v57, 9 }
 0x426   : > { %v7121_v30 = vadd.f32 %v8405_v32, %v11530_v15  ;;  %v7122_v9 = vadd.f32 %v8406_v39, %v11544_v8  ;;  %v7123_v62 = vadd.f32 %v8407_v20, %v11535_v18  ;;  %v7124_v56 = vadd.f32 %v8408_v43, %v11556_v63 }
 0x427   : > { %v7125_v14 = vadd.f32 %v8409_v23, %v11547_v22  ;;  %v7126_v3 = vadd.f32 %v8410_v60, %v11563_v0  ;;  %v7127_v54 = vadd.f32 %v8411_v4, %v6336_v53  ;;  %v7128_v29 = vadd.f32 %v8412_v33, %v6338_v35 }
 0x428   : > { %v7129_v24 = vadd.f32 %v8413_v6, %v11538_v13  ;;  %v7130_v46 = vadd.f32 %v8414_v12, %v11567_v5  ;;  %v7131_v31 = vadd.f32 %v8415_v34, %v11559_v42  ;;  %v7132_v15 = vadd.f32 %v8416_v10, %v11576_v16  ;;  %v5578_v34 = vld [vmem:[%s12432_s7] sm:$0x1] }
 0x429   : > { %v7133_v39 = vadd.f32 %v8417_v45, %v11550_v55  ;;  %v7134_v20 = vadd.f32 %v8418_v58, %v11571_v61  ;;  %v7135_v18 = vadd.f32 %v8419_v2, %v11582_v59  ;;  %v7193_v8 = vcombine.high %v6921_v44, %v6921_v44 }
 0x42a   : > { %v7200_v22 = vrot.slane %v6921_v44, %v10461_v27  ;;  %v7136_v63 = vadd.f32 %v8420_v52, %v6372_v57  ;;  %v7210_v0 = vcombine.high %v6922_v41, %v6922_v41  ;;  %v7217_v53 = vrot.slane %v6922_v41, %v10461_v27 }
 0x42b   : > { %v11668_v12 = vcombine.high %v11579_v40, %v11579_v40  ;;  %v7207_v13 = vrot.slane %v7193_v8, %v10461_v27 }
 0x42c   : > { %v7208_v42 = vcombine.high %v7200_v22, %v7200_v22  ;;  %v7329_v5 = vrot.slane %v7200_v22, 1  ;;  %v7425_v55 = vadd.f32 %v7200_v22, %v7121_v30  ;;  %v7224_v61 = vrot.slane %v7210_v0, %v10461_v27 }
 0x42d   : > { %12630 = vst [vmem:[#allocation64_spill] sm:$0xff] %v11668_v12  ;;  %v7225_v16 = vcombine.high %v7217_v53, %v7217_v53  ;;  %v7333_v59 = vrot.slane %v7217_v53, 1  ;;  %v7433_v32 = vadd.f32 %v7217_v53, %v7129_v24  ;;  %v7209_v43 = vcombine.high %v7207_v13, %v7207_v13 }
 0x42e   : > { %v7330_v23 = vrot.slane %v7208_v42, 1  ;;  %v7331_v35 = vrot.slane %v7207_v13, 1  ;;  %v7426_v57 = vadd.f32 %v7329_v5, %v7122_v9  ;;  %v7226_v44 = vcombine.high %v7224_v61, %v7224_v61 }
 0x42f   : > { %v7334_v60 = vrot.slane %v7225_v16, 1  ;;  %v7335_v4 = vrot.slane %v7224_v61, 1  ;;  %v7427_v6 = vadd.f32 %v7208_v42, %v7123_v62  ;;  %v7332_v33 = vrot.slane %v7209_v43, 1 }
 0x430   : > { %v7428_v10 = vadd.f32 %v7330_v23, %v7124_v56  ;;  %v7429_v45 = vadd.f32 %v7207_v13, %v7125_v14  ;;  %v7430_v58 = vadd.f32 %v7331_v35, %v7126_v3  ;;  %v7336_v24 = vrot.slane %v7226_v44, 1 }
 0x431   : > { %v7431_v30 = vadd.f32 %v7209_v43, %v7127_v54  ;;  %v7434_v8 = vadd.f32 %v7333_v59, %v7130_v46  ;;  %v7432_v22 = vadd.f32 %v7332_v33, %v7128_v29  ;;  %v7435_v0 = vadd.f32 %v7225_v16, %v7131_v31 }
 0x432   : > { %v7436_v53 = vadd.f32 %v7334_v60, %v7132_v15  ;;  %v7437_v26 = vadd.f32 %v7224_v61, %v7133_v39  ;;  %v7438_v9 = vadd.f32 %v7335_v4, %v7134_v20  ;;  %v7439_v5 = vadd.f32 %v7226_v44, %v7135_v18 }
 0x433   : > { %v7440_v36 = vadd.f32 %v7336_v24, %v7136_v63  ;;  %v7489_v11 = vmul.f32 0.33333334, %v7425_v55  ;;  %v7490_v62 = vmul.f32 0.33333334, %v7426_v57  ;;  %v7491_v42 = vmul.f32 0.33333334, %v7427_v6 }
 0x434   : > { %v11677_v56 = vcombine.high %v11625_v37, %v11625_v37  ;;  %v7492_v3 = vmul.f32 0.33333334, %v7428_v10  ;;  %v7493_v14 = vmul.f32 0.33333334, %v7429_v45  ;;  %v7494_v54 = vmul.f32 0.33333334, %v7430_v58 }
 0x435   : > { %v7495_v46 = vmul.f32 0.33333334, %v7431_v30  ;;  %v7496_v29 = vmul.f32 0.33333334, %v7432_v22  ;;  %v7497_v31 = vmul.f32 0.33333334, %v7433_v32  ;;  %v7553_v15 = vpack.c.bf16 %v7489_v11, %v7489_v11 }
 0x436   : > { %v7498_v39 = vmul.f32 0.33333334, %v7434_v8  ;;  %v7499_v13 = vmul.f32 0.33333334, %v7435_v0  ;;  %v7500_v20 = vmul.f32 0.33333334, %v7436_v53  ;;  %v7554_v18 = vpack.c.bf16 %v7490_v62, %v7490_v62 }
 0x437   : > { %v7501_v63 = vmul.f32 0.33333334, %v7437_v26  ;;  %v7502_v55 = vmul.f32 0.33333334, %v7438_v9  ;;  %v7503_v61 = vmul.f32 0.33333334, %v7439_v5  ;;  %v7555_v16 = vpack.c.bf16 %v7491_v42, %v7491_v42 }
 0x438   : > { %v7504_v59 = vmul.f32 0.33333334, %v7440_v36  ;;  %v7557_v43 = vpack.c.bf16 %v7493_v14, %v7493_v14  ;;  %v7558_v23 = vpack.c.bf16 %v7494_v54, %v7494_v54  ;;  %v7560_v35 = vpack.c.bf16 %v7496_v29, %v7496_v29 }
 0x439   : > { %v7561_v57 = vpack.c.bf16 %v7497_v31, %v7497_v31  ;;  %v7562_v44 = vpack.c.bf16 %v7498_v39, %v7498_v39  ;;  %v7563_v60 = vpack.c.bf16 %v7499_v13, %v7499_v13  ;;  %v7564_v4 = vpack.c.bf16 %v7500_v20, %v7500_v20 }
 0x43a   : > { %v7565_v32 = vpack.c.bf16 %v7501_v63, %v7501_v63  ;;  %v7566_v11 = vpack.c.bf16 %v7502_v55, %v7502_v55  ;;  %v7567_v6 = vpack.c.bf16 %v7503_v61, %v7503_v61  ;;  %v7682_v33 = vunpack.c.l.b16 %v7553_v15 }
 0x43b   : > { %v7683_v10 = vunpack.c.l.b16 %v7554_v18  ;;  %v7684_v26 = vunpack.c.l.b16 %v7555_v16  ;;  %v7686_v58 = vunpack.c.l.b16 %v7557_v43  ;;  %v7690_v24 = vunpack.c.l.b16 %v7561_v57 }
 0x43c   : > { %v7691_v30 = vunpack.c.l.b16 %v7562_v44  ;;  %v7692_v22 = vunpack.c.l.b16 %v7563_v60  ;;  %v7693_v0 = vunpack.c.l.b16 %v7564_v4  ;;  %v7694_v53 = vunpack.c.l.b16 %v7565_v32 }
 0x43d   : > { %v7695_v9 = vunpack.c.l.b16 %v7566_v11  ;;  %v7696_v62 = vunpack.c.l.b16 %v7567_v6  ;;  %v7748_v14 = vrot.slane %v7684_v26, 6  ;;  %v11694_v60 = vcombine.high %v11586_v47, %v11586_v47 }
 0x43e   : > { %v7760_v20 = vrot.slane %v7691_v30, 7  ;;  %v7762_v18 = vrot.slane %v7692_v22, 6  ;;  %v7764_v63 = vrot.slane %v7693_v0, 5  ;;  %v7766_v61 = vrot.slane %v7694_v53, 4 }
 0x43f   : > { %v7768_v16 = vrot.slane %v7695_v9, 3  ;;  %v6407_v4 = vcombine.high %v11532_v51, %v11532_v51  ;;  %v11706_v6 = vrot.slane %v11532_v51, %v10461_v27  ;;  %v6424_v26 = vcombine.high %v11552_v25, %v11552_v25  ;;  %v12646_v9 = vld [vmem:[#allocation33_spill] sm:$0xff] }
 0x440   : > { %v7761_v43 = vsel %vm5394_vm9, %v7760_v20, %v7690_v24  ;;  %v11724_v51 = vrot.slane %v11552_v25, %v10461_v27  ;;  %v6704_v30 = vrot.slane %v11668_v12, %v10463_v49  ;;  %v6708_v22 = vrot.slane %v11625_v37, %v10463_v49 }
 0x441   : > { %v7763_v44 = vsel %vm4379_vm2, %v7762_v18, %v7761_v43  ;;  %v11734_v24 = vrot.slane %v6424_v26, %v10461_v27 }
 0x442   : > { %v7765_v11 = vsel %vm4381_vm3, %v7764_v63, %v7763_v44  ;;  %v11743_v25 = vcombine.high %v11724_v51, %v11724_v51 }
 0x4ce   : > { %v5645_v41 = vpop.f32.mrb[34].mxu1 }
 0x4cf   : > { %v5646_v2 = vadd.f32 %v5645_v41, %v5578_v34  ;;  %v9224_v52 = vpop.f32.mrb[35].mxu1  ;;  %v7556_v34 = vpack.c.bf16 %v7492_v3, %v7492_v3  ;;  %v7568_v41 = vpack.c.bf16 %v7504_v59, %v7504_v59  ;;  %v7746_v3 = vrot.slane %v7683_v10, 7 }
 0x4d0   : > { %v7689_v52 = vunpack.c.l.b16 %v7560_v35  ;;  %v7770_v59 = vrot.slane %v7696_v62, 2  ;;  %v11713_v10 = vrot.slane %v6407_v4, %v10461_v27 }
 0x4d1   : > { %v8395_v50 = vmul.f32 -1.442695, %v5646_v2  ;;  %v7685_v45 = vunpack.c.l.b16 %v7556_v34  ;;  %v7687_v2 = vunpack.c.l.b16 %v7558_v23  ;;  %v7697_v42 = vunpack.c.l.b16 %v7568_v41 }
 0x4d2   : > { %v7747_v31 = vsel %vm5394_vm9, %v7746_v3, %v7682_v33  ;;  %v7758_v39 = vrot.slane %v7689_v52, 1  ;;  %v7767_v33 = vsel %vm4383_vm4, %v7766_v61, %v7765_v11  ;;  %v11731_v52 = vcombine.high %v11713_v10, %v11713_v10 }
 0x4d3   : > { %9700 = vpow2.f32 %v8395_v50  ;;  %v7559_v50 = vpack.c.bf16 %v7495_v46, %v7495_v46  ;;  %v7750_v54 = vrot.slane %v7685_v45, 5  ;;  %v7752_v46 = vrot.slane %v7686_v58, 4 }
 0x4d4   : > { %v7754_v29 = vrot.slane %v7687_v2, 3  ;;  %v7749_v13 = vsel %vm4379_vm2, %v7748_v14, %v7747_v31  ;;  %v7772_v23 = vrot.slane %v7697_v42, 1  ;;  %v7769_v45 = vsel %vm4385_vm5, %v7768_v16, %v7767_v33 }
 0x4d5   : > { %v7688_v36 = vunpack.c.l.b16 %v7559_v50  ;;  %v7751_v55 = vsel %vm4381_vm3, %v7750_v54, %v7749_v13  ;;  %v12631_v50 = vcombine.high %v11540_v48, %v11540_v48  ;;  %v11720_v58 = vcombine.high %v11706_v6, %v11706_v6 }
 0x4d6   : > { %v7753_v34 = vsel %vm4383_vm4, %v7752_v46, %v7751_v55  ;;  %v6700_v2 = vrot.slane %v11579_v40, %v10463_v49  ;;  %v6728_v14 = vrot.slane %v11706_v6, %v10463_v49  ;;  %v6736_v46 = vrot.slane %v11713_v10, %v10463_v49 }
 0x4d7   : > { %v7756_v15 = vrot.slane %v7688_v36, 2  ;;  %v11688_v35 = vrot.slane %v12631_v50, %v10461_v27  ;;  %v7755_v57 = vsel %vm4385_vm5, %v7754_v29, %v7753_v34  ;;  %v7771_v36 = vsel %vm4387_vm6, %v7770_v59, %v7769_v45 }
 0x4d8   : > { %v6732_v54 = vrot.slane %v11720_v58, %v10463_v49  ;;  %v6877_v20 = vsel %vm4379_vm2, %v6704_v30, %v6700_v2  ;;  %v12638_v30 = vld [vmem:[#allocation16_spill] sm:$0xff] }
 0x4d9   : > { %v7757_v32 = vsel %vm4387_vm6, %v7756_v15, %v7755_v57  ;;  %v11702_v48 = vcombine.high %v11688_v35, %v11688_v35  ;;  %v11780_v63 = vsel %vm4381_vm3, %v6708_v22, %v6877_v20  ;;  %v12635_v57 = vld [vmem:[#allocation21_spill] sm:$0xff]  ;;  %v12639_v22 = vld [vmem:[#allocation23_spill] sm:$0xff] }
 0x4da   : > { %v11709_v41 = vsel %vm4389_vm7, %v7758_v39, %v7757_v32  ;;  %v6883_v18 = vsel %vm4379_vm2, %v6732_v54, %v6728_v14  ;;  %v12642_v20 = vld [vmem:[#allocation17_spill] sm:$0xff] }
 0x4db   : > { %12632 = vst [vmem:[#allocation65_spill] sm:$0xff] %v11709_v41  ;;  %v11783_v55 = vsel %vm4381_vm3, %v6736_v46, %v6883_v18  ;;  %v12641_v46 = vld [vmem:[#allocation15_spill] sm:$0xff] }
 0x4dd   : > { %v9701_v8 = vpop.eup %9700 }
 0x4de   : > { %v5652_v5 = vadd.f32 1.0, %v9701_v8  ;;  %v11739_v8 = vsel %vm4389_vm7, %v7772_v23, %v7771_v36  ;;  %v12634_v23 = vld [vmem:[#allocation12_spill] sm:$0xff]  ;;  %v12637_v36 = vld [vmem:[#allocation14_spill] sm:$0xff] }
 0x4df   : > { %12633 = vst [vmem:[#allocation66_spill] sm:$0xff] %v11739_v8 }
 0x4e0   : > { %9702 = vrcp.f32 %v5652_v5  ;;  %v11753_v5 = vcombine.high %v11734_v24, %v11734_v24 }
 0x4ea   : > { %v9703_v53 = vpop.eup %9702 }
 0x4eb   : > { %v5658_v3 = vrot.slane %v9703_v53, %v10472_v38 }
 0x4ed   : > { %v5660_v39 = vcombine.high %v5658_v3, %v5658_v3  ;;  %v11775_v13 = vrot.slane %v5658_v3, %v10461_v27  ;;  %v12640_v3 = vld [vmem:[#allocation24_spill] sm:$0xff] }
 0x4ef   : > { %v11788_v59 = vrot.slane %v5660_v39, %v10461_v27  ;;  %v11792_v34 = vcombine.high %v11775_v13, %v11775_v13  ;;  %v11795_v43 = vrot.slane %v11775_v13, 1  ;;  %v5689_v50 = vmul.f32 %v11775_v13, %v12634_v23  ;;  %v12643_v23 = vld [vmem:[#allocation18_spill] sm:$0xff] }
 0x4f0   : > { %v5697_v44 = vmul.f32 %v11775_v13, %v12635_v57  ;;  %v11803_v4 = vmul.f32 %v11775_v13, %v10746_v19  ;;  %v11807_v32 = vmul.f32 %v11775_v13, %v10875_v1  ;;  %v11811_v11 = vmul.f32 %v11775_v13, %v10989_v7  ;;  %v12636_v19 = vld [vmem:[#allocation13_spill] sm:$0xff] }
 0x4f1   : > { %v11815_v33 = vcombine.high %v11788_v59, %v11788_v59  ;;  %v11818_v26 = vrot.slane %v11792_v34, 1  ;;  %v11821_v45 = vrot.slane %v11788_v59, 1  ;;  %v5690_v2 = vmul.f32 %v11795_v43, %v12636_v19  ;;  %v12644_v19 = vld [vmem:[#allocation25_spill] sm:$0xff] }
 0x4f2   : > { %v5691_v1 = vmul.f32 %v11792_v34, %v12637_v36  ;;  %v5693_v7 = vmul.f32 %v11788_v59, %v12638_v30  ;;  %v5698_v53 = vmul.f32 %v11795_v43, %v12639_v22  ;;  %v5699_v14 = vmul.f32 %v11792_v34, %v12640_v3  ;;  %v12645_v30 = vld [vmem:[#allocation28_spill] sm:$0xff] }
 0x4f3   : > { %v11834_v54 = vrot.slane %v11815_v33, 1  ;;  %v5692_v39 = vmul.f32 %v11818_v26, %v12641_v46  ;;  %v5694_v18 = vmul.f32 %v11821_v45, %v12642_v20  ;;  %v5695_v57 = vmul.f32 %v11815_v33, %v12643_v23 }
 0x4f4   : > { %v5700_v36 = vmul.f32 %v11818_v26, %v12644_v19  ;;  %v5701_v22 = vmul.f32 %v11788_v59, %v12645_v30  ;;  %v5702_v3 = vmul.f32 %v11821_v45, %v10708_v21  ;;  %v5703_v16 = vmul.f32 %v11815_v33, %v10710_v17 }
 0x4f5   : > { %v5696_v46 = vmul.f32 %v11834_v54, %v10659_v28  ;;  %v5704_v20 = vmul.f32 %v11834_v54, %v12646_v9  ;;  %v5753_v61 = vpack.c.bf16 %v5689_v50, %v5689_v50  ;;  %v5754_v23 = vpack.c.bf16 %v5690_v2, %v5690_v2 }
 0x4f6   : > { %v5755_v38 = vpack.c.bf16 %v5691_v1, %v5691_v1  ;;  %v5756_v42 = vpack.c.bf16 %v5692_v39, %v5692_v39  ;;  %v5757_v19 = vpack.c.bf16 %v5693_v7, %v5693_v7  ;;  %v5758_v15 = vpack.c.bf16 %v5694_v18, %v5694_v18 }
 0x4f7   : > { %v5759_v62 = vpack.c.bf16 %v5695_v57, %v5695_v57  ;;  %v5760_v30 = vpack.c.bf16 %v5696_v46, %v5696_v46  ;;  %v5761_v31 = vpack.c.bf16 %v5697_v44, %v5697_v44  ;;  %v5762_v29 = vpack.c.bf16 %v5698_v53, %v5698_v53 }
 0x4f8   : > { %v5763_v21 = vpack.c.bf16 %v5699_v14, %v5699_v14  ;;  %v5764_v0 = vpack.c.bf16 %v5700_v36, %v5700_v36  ;;  %v5765_v27 = vpack.c.bf16 %v5701_v22, %v5701_v22  ;;  %v5766_v17 = vpack.c.bf16 %v5702_v3, %v5702_v3 }
 0x4f9   : > { %v5767_v12 = vpack.c.bf16 %v5703_v16, %v5703_v16  ;;  %v5768_v41 = vpack.c.bf16 %v5704_v20, %v5704_v20  ;;  %v5904_v28 = vunpack.c.l.b16 %v5753_v61  ;;  %v5905_v8 = vunpack.c.l.b16 %v5754_v23 }
 0x4fa   : > { %v5906_v40 = vunpack.c.l.b16 %v5755_v38  ;;  %v5907_v9 = vunpack.c.l.b16 %v5756_v42  ;;  %v5908_v50 = vunpack.c.l.b16 %v5757_v19  ;;  %v5909_v2 = vunpack.c.l.b16 %v5758_v15 }
 0x4fb   : > { %v5910_v1 = vunpack.c.l.b16 %v5759_v62  ;;  %v5911_v39 = vunpack.c.l.b16 %v5760_v30  ;;  %v5912_v7 = vunpack.c.l.b16 %v5761_v31  ;;  %v5913_v18 = vunpack.c.l.b16 %v5762_v29 }
 0x4fc   : > { %v5914_v57 = vunpack.c.l.b16 %v5763_v21  ;;  %v5915_v46 = vunpack.c.l.b16 %v5764_v0  ;;  %v5916_v44 = vunpack.c.l.b16 %v5765_v27  ;;  %v5917_v53 = vunpack.c.l.b16 %v5766_v17  ;;  %v12647_v21 = vld [vmem:[#allocation29_spill] sm:$0xff] }
 0x4fd   : > { %v5918_v14 = vunpack.c.l.b16 %v5767_v12  ;;  %v5919_v36 = vunpack.c.l.b16 %v5768_v41  ;;  %v5968_v22 = vrot.slane %v5905_v8, 7  ;;  %v5970_v3 = vrot.slane %v5906_v40, 6 }
 0x4fe   : > { %v5972_v16 = vrot.slane %v5907_v9, 5  ;;  %v5974_v20 = vrot.slane %v5908_v50, 4  ;;  %v5976_v61 = vrot.slane %v5909_v2, 3  ;;  %v5978_v23 = vrot.slane %v5910_v1, 2  ;;  %v12649_v1 = vld [vmem:[#allocation31_spill] sm:$0xff] }
 0x4ff   : > { %v5969_v42 = vsel %vm5394_vm9, %v5968_v22, %v5904_v28  ;;  %v5980_v38 = vrot.slane %v5911_v39, 1  ;;  %v5982_v15 = vrot.slane %v5913_v18, 7  ;;  %v5984_v62 = vrot.slane %v5914_v57, 6  ;;  %v12648_v28 = vld [vmem:[#allocation30_spill] sm:$0xff] }
 0x500   : > { %v5971_v31 = vsel %vm4379_vm2, %v5970_v3, %v5969_v42  ;;  %v5986_v29 = vrot.slane %v5915_v46, 5  ;;  %v5988_v19 = vrot.slane %v5916_v44, 4  ;;  %v5990_v0 = vrot.slane %v5917_v53, 3  ;;  %v12651_v44 = vld [vmem:[#allocation34_spill] sm:$0xff] }
 0x501   : > { %v5973_v27 = vsel %vm4381_vm3, %v5972_v16, %v5971_v31  ;;  %v5983_v12 = vsel %vm5394_vm9, %v5982_v15, %v5912_v7  ;;  %v5992_v41 = vrot.slane %v5918_v14, 2  ;;  %v5994_v40 = vrot.slane %v5919_v36, 1  ;;  %v12650_v7 = vld [vmem:[#allocation32_spill] sm:$0xff]  ;;  %v12652_v14 = vld [vmem:[#allocation35_spill] sm:$0xff]  ;;  %v12653_v16 = vld [vmem:[#allocation37_spill] sm:$0xff] }
 0x502   : > { %v5975_v8 = vsel %vm4383_vm4, %v5974_v20, %v5973_v27  ;;  %v5985_v30 = vsel %vm4379_vm2, %v5984_v62, %v5983_v12  ;;  %v5706_v17 = vmul.f32 %v11795_v43, %v12647_v21  ;;  %v5707_v9 = vmul.f32 %v11792_v34, %v12648_v28  ;;  %v12655_v15 = vld [vmem:[#allocation36_spill] sm:$0xff]  ;;  %v12656_v31 = vld [vmem:[#allocation38_spill] sm:$0xff] }
 0x503   : > { %v5977_v50 = vsel %vm4385_vm5, %v5976_v61, %v5975_v8  ;;  %v5987_v2 = vsel %vm4381_vm3, %v5986_v29, %v5985_v30  ;;  %v5708_v39 = vmul.f32 %v11818_v26, %v12649_v1  ;;  %v5709_v18 = vmul.f32 %v11788_v59, %v12650_v7  ;;  %v12654_v61 = vld [vmem:[#allocation19_spill] sm:$0xff]  ;;  %v12659_v8 = vld [vmem:[#allocation41_spill] sm:$0xff]  ;;  %v12660_v21 = vld [vmem:[#allocation42_spill] sm:$0xff] }
 0x504   : > { %v5979_v57 = vsel %vm4387_vm6, %v5978_v23, %v5977_v50  ;;  %v5989_v46 = vsel %vm4383_vm4, %v5988_v19, %v5987_v2  ;;  %v5710_v53 = vmul.f32 %v11821_v45, %v12651_v44  ;;  %v5711_v36 = vmul.f32 %v11815_v33, %v12652_v14  ;;  %v12657_v19 = vld [vmem:[#allocation39_spill] sm:$0xff] }
 0x505   : > { %v5981_v22 = vsel %vm4389_vm7, %v5980_v38, %v5979_v57  ;;  %v5991_v3 = vsel %vm4385_vm5, %v5990_v0, %v5989_v46  ;;  %v5712_v20 = vmul.f32 %v11834_v54, %v12653_v16  ;;  %v5714_v42 = vmul.f32 %v11795_v43, %v12654_v61  ;;  %v12658_v0 = vld [vmem:[#allocation40_spill] sm:$0xff] }
 0x506   : > { %v5993_v23 = vsel %vm4387_vm6, %v5992_v41, %v5991_v3  ;;  %v5715_v62 = vmul.f32 %v11792_v34, %v12655_v15  ;;  %v5716_v29 = vmul.f32 %v11818_v26, %v12656_v31  ;;  %v5717_v27 = vmul.f32 %v11788_v59, %v12657_v19 }
 0x507   : > { %v5995_v38 = vsel %vm4389_vm7, %v5994_v40, %v5993_v23  ;;  %v5718_v12 = vmul.f32 %v11821_v45, %v12658_v0  ;;  %v5719_v30 = vmul.f32 %v11815_v33, %v12659_v8  ;;  %v5720_v41 = vmul.f32 %v11834_v54, %v12660_v21 }
 0x508   : > { %v6080_v28 = vpack.c.b16 %v5995_v38, %v5981_v22  ;;  %v5769_v50 = vpack.c.bf16 %v11803_v4, %v11803_v4  ;;  %v5770_v2 = vpack.c.bf16 %v5706_v17, %v5706_v17  ;;  %v5771_v1 = vpack.c.bf16 %v5707_v9, %v5707_v9 }
 0x509   : > { %v5772_v7 = vpack.c.bf16 %v5708_v39, %v5708_v39  ;;  %v5773_v57 = vpack.c.bf16 %v5709_v18, %v5709_v18  ;;  %v5774_v46 = vpack.c.bf16 %v5710_v53, %v5710_v53  ;;  %v5775_v44 = vpack.c.bf16 %v5711_v36, %v5711_v36 }
 0x50a   : > { %9241 = vmatprep.mubr.bf16.mxu1 %v6080_v28  ;;  %v5776_v40 = vpack.c.bf16 %v5712_v20, %v5712_v20  ;;  %v5777_v14 = vpack.c.bf16 %v11807_v32, %v11807_v32  ;;  %v5778_v3 = vpack.c.bf16 %v5714_v42, %v5714_v42  ;;  %v5779_v16 = vpack.c.bf16 %v5715_v62, %v5715_v62 }
 0x50b   : > { %v5780_v61 = vpack.c.bf16 %v5716_v29, %v5716_v29  ;;  %v5781_v23 = vpack.c.bf16 %v5717_v27, %v5717_v27  ;;  %v5782_v15 = vpack.c.bf16 %v5718_v12, %v5718_v12  ;;  %v5783_v22 = vpack.c.bf16 %v5719_v30, %v5719_v30 }
 0x50c   : > { %v5784_v31 = vpack.c.bf16 %v5720_v41, %v5720_v41  ;;  %v5920_v19 = vunpack.c.l.b16 %v5769_v50  ;;  %v5921_v4 = vunpack.c.l.b16 %v5770_v2  ;;  %v5922_v17 = vunpack.c.l.b16 %v5771_v1 }
 0x50d   : > { %v5923_v9 = vunpack.c.l.b16 %v5772_v7  ;;  %v5924_v39 = vunpack.c.l.b16 %v5773_v57  ;;  %v5925_v18 = vunpack.c.l.b16 %v5774_v46  ;;  %v5926_v53 = vunpack.c.l.b16 %v5775_v44 }
 0x50e   : > { %v5927_v36 = vunpack.c.l.b16 %v5776_v40  ;;  %v5928_v38 = vunpack.c.l.b16 %v5777_v14  ;;  %v5929_v20 = vunpack.c.l.b16 %v5778_v3  ;;  %v5930_v0 = vunpack.c.l.b16 %v5779_v16 }
 0x50f   : > { %v5931_v8 = vunpack.c.l.b16 %v5780_v61  ;;  %v5932_v32 = vunpack.c.l.b16 %v5781_v23  ;;  %v5933_v42 = vunpack.c.l.b16 %v5782_v15  ;;  %v5934_v62 = vunpack.c.l.b16 %v5783_v22  ;;  %v12661_v23 = vld [vmem:[#allocation43_spill] sm:$0xff] }
 0x510   : > { %v5935_v29 = vunpack.c.l.b16 %v5784_v31  ;;  %v5996_v27 = vrot.slane %v5921_v4, 7  ;;  %v5998_v12 = vrot.slane %v5922_v17, 6  ;;  %v6000_v30 = vrot.slane %v5923_v9, 5  ;;  %v12663_v17 = vld [vmem:[#allocation46_spill] sm:$0xff] }
 0x511   : > { %v6002_v21 = vrot.slane %v5924_v39, 4  ;;  %v6004_v41 = vrot.slane %v5925_v18, 3  ;;  %v6006_v28 = vrot.slane %v5926_v53, 2  ;;  %v6008_v50 = vrot.slane %v5927_v36, 1  ;;  %v12664_v53 = vld [vmem:[#allocation45_spill] sm:$0xff] }
 0x512   : > { %v5997_v2 = vsel %vm5394_vm9, %v5996_v27, %v5920_v19  ;;  %v6010_v1 = vrot.slane %v5929_v20, 7  ;;  %v6012_v7 = vrot.slane %v5930_v0, 6  ;;  %v6014_v57 = vrot.slane %v5931_v8, 5  ;;  %v12662_v19 = vld [vmem:[#allocation44_spill] sm:$0xff] }
 0x513   : > { %v5999_v46 = vsel %vm4379_vm2, %v5998_v12, %v5997_v2  ;;  %v6016_v44 = vrot.slane %v5932_v32, 4  ;;  %v6018_v40 = vrot.slane %v5933_v42, 3  ;;  %v6020_v14 = vrot.slane %v5934_v62, 2  ;;  %v12666_v32 = vld [vmem:[#allocation4_spill] sm:$0xff]  ;;  %v12667_v62 = vld [vmem:[#allocation5_spill] sm:$0xff] }
 0x514   : > { %v6001_v3 = vsel %vm4381_vm3, %v6000_v30, %v5999_v46  ;;  %v6011_v16 = vsel %vm5394_vm9, %v6010_v1, %v5928_v38  ;;  %v6022_v61 = vrot.slane %v5935_v29, 1  ;;  %v5722_v15 = vmul.f32 %v11795_v43, %v12661_v23  ;;  %v12665_v38 = vld [vmem:[#allocation3_spill] sm:$0xff]  ;;  %v12668_v30 = vld [vmem:[#allocation6_spill] sm:$0xff] }
 0x515   : > { %v6003_v22 = vsel %vm4383_vm4, %v6002_v21, %v6001_v3  ;;  %v6013_v31 = vsel %vm4379_vm2, %v6012_v7, %v6011_v16  ;;  %v5723_v4 = vmul.f32 %v11792_v34, %v12662_v19  ;;  %v5724_v9 = vmul.f32 %v11818_v26, %v12663_v17  ;;  %v12670_v1 = vld [vmem:[#allocation7_spill] sm:$0xff]  ;;  %v12674_v23 = vld [vmem:[#allocation26_spill] sm:$0xff] }
 0x516   : > { %v6005_v39 = vsel %vm4385_vm5, %v6004_v41, %v6003_v22  ;;  %v6015_v18 = vsel %vm4381_vm3, %v6014_v57, %v6013_v31  ;;  %v5725_v36 = vmul.f32 %v11788_v59, %v12664_v53  ;;  %v5726_v20 = vmul.f32 %v11821_v45, %v12665_v38  ;;  %v12669_v41 = vld [vmem:[#allocation20_spill] sm:$0xff]  ;;  %v12671_v57 = vld [vmem:[#allocation22_spill] sm:$0xff] }
 0x517   : > { %v6007_v0 = vsel %vm4387_vm6, %v6006_v28, %v6005_v39  ;;  %v6017_v8 = vsel %vm4383_vm4, %v6016_v44, %v6015_v18  ;;  %v5727_v42 = vmul.f32 %v11815_v33, %v12666_v32  ;;  %v5728_v29 = vmul.f32 %v11834_v54, %v12667_v62  ;;  %v12672_v44 = vld [vmem:[#allocation8_spill] sm:$0xff]  ;;  %v12675_v31 = vld [vmem:[#allocation10_spill] sm:$0xff] }
 0x518   : > { %v6009_v27 = vsel %vm4389_vm7, %v6008_v50, %v6007_v0  ;;  %v6019_v12 = vsel %vm4385_vm5, %v6018_v40, %v6017_v8  ;;  %v5729_v21 = vmul.f32 %v11775_v13, %v12668_v30  ;;  %v5730_v2 = vmul.f32 %v11795_v43, %v12669_v41  ;;  %v12673_v40 = vld [vmem:[#allocation9_spill] sm:$0xff] }
 0x519   : > { %v6021_v28 = vsel %vm4387_vm6, %v6020_v14, %v6019_v12  ;;  %v5731_v7 = vmul.f32 %v11792_v34, %v12670_v1  ;;  %v5732_v46 = vmul.f32 %v11818_v26, %v12671_v57  ;;  %v5733_v3 = vmul.f32 %v11788_v59, %v12672_v44  ;;  %v12676_v57 = vld [vmem:[#allocation62_spill] sm:$0xff] }
 0x51a   : > { %v6023_v50 = vsel %vm4389_vm7, %v6022_v61, %v6021_v28  ;;  %v5734_v16 = vmul.f32 %v11821_v45, %v12673_v40  ;;  %v5735_v22 = vmul.f32 %v11815_v33, %v12674_v23  ;;  %v5736_v14 = vmul.f32 %v11834_v54, %v12675_v31 }
 0x51b   : > { %v6081_v19 = vpack.c.b16 %v6023_v50, %v6009_v27  ;;  %v5785_v17 = vpack.c.bf16 %v11811_v11, %v11811_v11  ;;  %v5786_v39 = vpack.c.bf16 %v5722_v15, %v5722_v15  ;;  %v5787_v18 = vpack.c.bf16 %v5723_v4, %v5723_v4 }
 0x51c   : > { %v5788_v53 = vpack.c.bf16 %v5724_v9, %v5724_v9  ;;  %v5789_v38 = vpack.c.bf16 %v5725_v36, %v5725_v36  ;;  %v5790_v0 = vpack.c.bf16 %v5726_v20, %v5726_v20  ;;  %v5791_v8 = vpack.c.bf16 %v5727_v42, %v5727_v42 }
 0x51d   : > { %9242 = vmatmul.mubr.bf16.vlgmr.msra.gmra.mrb[36].mxu1 %v6081_v19  ;;  %v5792_v61 = vpack.c.bf16 %v5728_v29, %v5728_v29  ;;  %v5793_v32 = vpack.c.bf16 %v5729_v21, %v5729_v21  ;;  %v5794_v62 = vpack.c.bf16 %v5730_v2, %v5730_v2  ;;  %v5795_v12 = vpack.c.bf16 %v5731_v7, %v5731_v7 }
 0x51e   : > { %v5796_v30 = vpack.c.bf16 %v5732_v46, %v5732_v46  ;;  %v5797_v41 = vpack.c.bf16 %v5733_v3, %v5733_v3  ;;  %v5798_v28 = vpack.c.bf16 %v5734_v16, %v5734_v16  ;;  %v5799_v1 = vpack.c.bf16 %v5735_v22, %v5735_v22  ;;  %9250 = vmatpush3.bf16.msra.mxu1 %v12676_v57 }
 0x51f   : > { %v5800_v27 = vpack.c.bf16 %v5736_v14, %v5736_v14  ;;  %v5936_v44 = vunpack.c.l.b16 %v5785_v17  ;;  %v5937_v11 = vunpack.c.l.b16 %v5786_v39  ;;  %v5938_v15 = vunpack.c.l.b16 %v5787_v18 }
 0x520   : > { %v5939_v4 = vunpack.c.l.b16 %v5788_v53  ;;  %v5940_v9 = vunpack.c.l.b16 %v5789_v38  ;;  %v5941_v36 = vunpack.c.l.b16 %v5790_v0  ;;  %v5942_v20 = vunpack.c.l.b16 %v5791_v8 }
 0x521   : > { %v5943_v42 = vunpack.c.l.b16 %v5792_v61  ;;  %v5944_v50 = vunpack.c.l.b16 %v5793_v32  ;;  %v5945_v29 = vunpack.c.l.b16 %v5794_v62  ;;  %v5946_v21 = vunpack.c.l.b16 %v5795_v12 }
 0x522   : > { %v5947_v2 = vunpack.c.l.b16 %v5796_v30  ;;  %v5948_v7 = vunpack.c.l.b16 %v5797_v41  ;;  %v5949_v46 = vunpack.c.l.b16 %v5798_v28  ;;  %v5950_v3 = vunpack.c.l.b16 %v5799_v1  ;;  %v12677_v41 = vld [vmem:[#allocation27_spill] sm:$0xff] }
 0x523   : > { %v5951_v40 = vunpack.c.l.b16 %v5800_v27  ;;  %v6024_v16 = vrot.slane %v5937_v11, 7  ;;  %v6026_v23 = vrot.slane %v5938_v15, 6  ;;  %v6028_v22 = vrot.slane %v5939_v4, 5  ;;  %v12678_v27 = vld [vmem:[#allocation47_spill] sm:$0xff]  ;;  %v12679_v11 = vld [vmem:[#allocation48_spill] sm:$0xff] }
 0x524   : > { %v6030_v31 = vrot.slane %v5940_v9, 4  ;;  %v6032_v14 = vrot.slane %v5941_v36, 3  ;;  %v6034_v19 = vrot.slane %v5942_v20, 2  ;;  %v6036_v17 = vrot.slane %v5943_v42, 1  ;;  %v12680_v36 = vld [vmem:[#allocation49_spill] sm:$0xff]  ;;  %v12681_v42 = vld [vmem:[#allocation50_spill] sm:$0xff] }
 0x525   : > { %v6025_v39 = vsel %vm5394_vm9, %v6024_v16, %v5936_v44  ;;  %v6038_v18 = vrot.slane %v5945_v29, 7  ;;  %v6040_v53 = vrot.slane %v5946_v21, 6  ;;  %v6042_v38 = vrot.slane %v5947_v2, 5  ;;  %v12682_v2 = vld [vmem:[#allocation51_spill] sm:$0xff] }
 0x526   : > { %v6027_v0 = vsel %vm4379_vm2, %v6026_v23, %v6025_v39  ;;  %v6044_v8 = vrot.slane %v5948_v7, 4  ;;  %v6046_v61 = vrot.slane %v5949_v46, 3  ;;  %v6048_v32 = vrot.slane %v5950_v3, 2  ;;  %v12683_v46 = vld [vmem:[#allocation52_spill] sm:$0xff]  ;;  %v12684_v23 = vld [vmem:[#allocation53_spill] sm:$0xff]  ;;  %v12686_v39 = vld [vmem:[#allocation55_spill] sm:$0xff] }
 0x527   : > { %v6029_v62 = vsel %vm4381_vm3, %v6028_v22, %v6027_v0  ;;  %v6039_v12 = vsel %vm5394_vm9, %v6038_v18, %v5944_v50  ;;  %v6050_v30 = vrot.slane %v5951_v40, 1  ;;  %v5737_v28 = vmul.f32 %v11775_v13, %v12677_v41  ;;  %v12688_v0 = vld [vmem:[#allocation58_spill] sm:$0xff] }
 0x528   : > { %v6031_v1 = vsel %vm4383_vm4, %v6030_v31, %v6029_v62  ;;  %v6041_v57 = vsel %vm4379_vm2, %v6040_v53, %v6039_v12  ;;  %v5738_v44 = vmul.f32 %v11795_v43, %v12678_v27  ;;  %v5739_v15 = vmul.f32 %v11792_v34, %v12679_v11  ;;  %v12685_v31 = vld [vmem:[#allocation54_spill] sm:$0xff]  ;;  %v12687_v53 = vld [vmem:[#allocation56_spill] sm:$0xff]  ;;  %v12690_v12 = vld [vmem:[#allocation59_spill] sm:$0xff] }
 0x529   : > { %v6033_v4 = vsel %vm4385_vm5, %v6032_v14, %v6031_v1  ;;  %v6043_v9 = vsel %vm4381_vm3, %v6042_v38, %v6041_v57  ;;  %v5740_v20 = vmul.f32 %v11818_v26, %v12680_v36  ;;  %v5741_v50 = vmul.f32 %v11788_v59, %v12681_v42  ;;  %v12692_v57 = vld [vmem:[#allocation61_spill] sm:$0xff] }
 0x52a   : > { %v6035_v29 = vsel %vm4387_vm6, %v6034_v19, %v6033_v4  ;;  %v6045_v21 = vsel %vm4383_vm4, %v6044_v8, %v6043_v9  ;;  %v5742_v7 = vmul.f32 %v11821_v45, %v12682_v2  ;;  %v5743_v3 = vmul.f32 %v11815_v33, %v12683_v46 }
 0x52b   : > { %v6037_v40 = vsel %vm4389_vm7, %v6036_v17, %v6035_v29  ;;  %v6047_v16 = vsel %vm4385_vm5, %v6046_v61, %v6045_v21  ;;  %v5744_v22 = vmul.f32 %v11834_v54, %v12684_v23  ;;  %v5745_v14 = vmul.f32 %v11775_v13, %v12685_v31  ;;  %v12689_v61 = vld [vmem:[#allocation57_spill] sm:$0xff]  ;;  %v12691_v13 = vld [vmem:[#allocation60_spill] sm:$0xff] }
 0x52c   : > { %v6049_v19 = vsel %vm4387_vm6, %v6048_v32, %v6047_v16  ;;  %v5746_v18 = vmul.f32 %v11795_v43, %v12686_v39  ;;  %v5747_v38 = vmul.f32 %v11792_v34, %v12687_v53  ;;  %v5748_v8 = vmul.f32 %v11818_v26, %v12688_v0 }
 0x52d   : > { %v6051_v17 = vsel %vm4389_vm7, %v6050_v30, %v6049_v19  ;;  %v5749_v62 = vmul.f32 %v11788_v59, %v12689_v61  ;;  %v5750_v41 = vmul.f32 %v11821_v45, %v12690_v12  ;;  %v5751_v32 = vmul.f32 %v11815_v33, %v12691_v13 }
 0x52e   : > { %v6082_v1 = vpack.c.b16 %v6051_v17, %v6037_v40  ;;  %v5752_v43 = vmul.f32 %v11834_v54, %v12692_v57  ;;  %v5801_v27 = vpack.c.bf16 %v5737_v28, %v5737_v28  ;;  %v5802_v34 = vpack.c.bf16 %v5738_v44, %v5738_v44 }
 0x52f   : > { %v5803_v11 = vpack.c.bf16 %v5739_v15, %v5739_v15  ;;  %v5804_v4 = vpack.c.bf16 %v5740_v20, %v5740_v20  ;;  %v5805_v26 = vpack.c.bf16 %v5741_v50, %v5741_v50  ;;  %v5806_v9 = vpack.c.bf16 %v5742_v7, %v5742_v7 }
 0x530   : > { %9245 = vmatprep.mubr.bf16.mxu1 %v6082_v1  ;;  %v5807_v30 = vpack.c.bf16 %v5743_v3, %v5743_v3  ;;  %v5808_v36 = vpack.c.bf16 %v5744_v22, %v5744_v22  ;;  %v5809_v59 = vpack.c.bf16 %v5745_v14, %v5745_v14  ;;  %v5810_v42 = vpack.c.bf16 %v5746_v18, %v5746_v18 }
 0x531   : > { %v5811_v29 = vpack.c.bf16 %v5747_v38, %v5747_v38  ;;  %v5812_v45 = vpack.c.bf16 %v5748_v8, %v5748_v8  ;;  %v5813_v21 = vpack.c.bf16 %v5749_v62, %v5749_v62  ;;  %v5814_v2 = vpack.c.bf16 %v5750_v41, %v5750_v41 }
 0x532   : > { %v5815_v33 = vpack.c.bf16 %v5751_v32, %v5751_v32  ;;  %v5816_v46 = vpack.c.bf16 %v5752_v43, %v5752_v43  ;;  %v5952_v40 = vunpack.c.l.b16 %v5801_v27  ;;  %v5953_v16 = vunpack.c.l.b16 %v5802_v34 }
 0x533   : > { %v5954_v54 = vunpack.c.l.b16 %v5803_v11  ;;  %v5955_v28 = vunpack.c.l.b16 %v5804_v4  ;;  %v5956_v44 = vunpack.c.l.b16 %v5805_v26  ;;  %v5957_v15 = vunpack.c.l.b16 %v5806_v9 }
 0x534   : > { %v5958_v20 = vunpack.c.l.b16 %v5807_v30  ;;  %v5959_v50 = vunpack.c.l.b16 %v5808_v36  ;;  %v5960_v7 = vunpack.c.l.b16 %v5809_v59  ;;  %v5961_v23 = vunpack.c.l.b16 %v5810_v42 }
 0x535   : > { %v5962_v3 = vunpack.c.l.b16 %v5811_v29  ;;  %v5963_v22 = vunpack.c.l.b16 %v5812_v45  ;;  %v5964_v31 = vunpack.c.l.b16 %v5813_v21  ;;  %v5965_v14 = vunpack.c.l.b16 %v5814_v2 }
 0x536   : > { %v5966_v19 = vunpack.c.l.b16 %v5815_v33  ;;  %v5967_v39 = vunpack.c.l.b16 %v5816_v46  ;;  %v6052_v18 = vrot.slane %v5953_v16, 7  ;;  %v6054_v53 = vrot.slane %v5954_v54, 6 }
 0x537   : > { %v6056_v38 = vrot.slane %v5955_v28, 5  ;;  %v6058_v0 = vrot.slane %v5956_v44, 4  ;;  %v6060_v8 = vrot.slane %v5957_v15, 3  ;;  %v6062_v17 = vrot.slane %v5958_v20, 2 }
 0x538   : > { %v6053_v61 = vsel %vm5394_vm9, %v6052_v18, %v5952_v40  ;;  %v6064_v62 = vrot.slane %v5959_v50, 1  ;;  %v6066_v12 = vrot.slane %v5961_v23, 7  ;;  %v6068_v41 = vrot.slane %v5962_v3, 6 }
 0x539   : > { %v6055_v13 = vsel %vm4379_vm2, %v6054_v53, %v6053_v61  ;;  %v6070_v32 = vrot.slane %v5963_v22, 5  ;;  %v6072_v1 = vrot.slane %v5964_v31, 4  ;;  %v6074_v57 = vrot.slane %v5965_v14, 3 }
 0x53a   : > { %v6057_v43 = vsel %vm4381_vm3, %v6056_v38, %v6055_v13  ;;  %v6067_v27 = vsel %vm5394_vm9, %v6066_v12, %v5960_v7  ;;  %v6076_v34 = vrot.slane %v5966_v19, 2  ;;  %v6078_v11 = vrot.slane %v5967_v39, 1 }
 0x53b   : > { %v6059_v4 = vsel %vm4383_vm4, %v6058_v0, %v6057_v43  ;;  %v6069_v26 = vsel %vm4379_vm2, %v6068_v41, %v6067_v27  ;;  %v12693_v9 = vrot.slane %v11677_v56, %v10463_v49  ;;  %v12694_v36 = vrot.slane %v11731_v52, %v10463_v49  ;;  %v12703_v27 = vld [vmem:[#allocation66_spill] sm:$0xff] }
 0x53c   : > { %v6061_v42 = vsel %vm4385_vm5, %v6060_v8, %v6059_v4  ;;  %v6071_v29 = vsel %vm4381_vm3, %v6070_v32, %v6069_v26  ;;  %v12695_v45 = vrot.slane %v11586_v47, %v10463_v49  ;;  %v12696_v2 = vrot.slane %v11724_v51, %v10463_v49  ;;  %v12706_v4 = vld [vmem:[#allocation64_spill] sm:$0xff] }
 0x53d   : > { %v6879_v30 = vsel %vm4383_vm4, %v12693_v9, %v11780_v63  ;;  %v6885_v59 = vsel %vm4383_vm4, %v12694_v36, %v11783_v55  ;;  %v6063_v33 = vsel %vm4387_vm6, %v6062_v17, %v6061_v42  ;;  %v6073_v46 = vsel %vm4383_vm4, %v6072_v1, %v6071_v29  ;;  %v12701_v1 = vld [vmem:[#allocation63_spill] sm:$0xff]  ;;  %v12072_v29 = vld [vmem:[%s11508_s27 + $0x90] sm:$0xff] }
 0x53e   : > { %v6880_v21 = vsel %vm4385_vm5, %v12695_v45, %v6879_v30  ;;  %v6886_v63 = vsel %vm4385_vm5, %v12696_v2, %v6885_v59  ;;  %v12697_v55 = vrot.slane %v11694_v60, %v10463_v49  ;;  %v12698_v16 = vrot.slane %v11743_v25, %v10463_v49  ;;  %v6225_v42 = vld [vmem:[%s11508_s27 + $0x80] sm:$0xff] }
 0x53f   : > { %v6065_v28 = vsel %vm4389_vm7, %v6064_v62, %v6063_v33  ;;  %v6075_v44 = vsel %vm4385_vm5, %v6074_v57, %v6073_v46  ;;  %v12699_v15 = vrot.slane %v11688_v35, %v10463_v49  ;;  %v12700_v50 = vrot.slane %v11734_v24, %v10463_v49  ;;  %v6226_v33 = vld [vmem:[%s11508_s27 + $0x88] sm:$0xff]  ;;  %v12081_v46 = vld [vmem:[%s11508_s27 + $0xb0] sm:$0xff] }
 0x540   : > { %v6881_v40 = vsel %vm4387_vm6, %v12697_v55, %v6880_v21  ;;  %v6887_v54 = vsel %vm4387_vm6, %v12698_v16, %v6886_v63  ;;  %v6077_v23 = vsel %vm4387_vm6, %v6076_v34, %v6075_v44  ;;  %v8423_v31 = vrot.slane %v11625_v37, 9  ;;  %v12704_v34 = vld [vmem:[#allocation65_spill] sm:$0xff]  ;;  %v12088_v16 = vld [vmem:[%s11508_s27 + $0x98] sm:$0xff]  ;;  %v12708_v44 = vld [vmem:[#allocation11_spill] sm:$0xff] }
 0x541   : > { %v6882_v20 = vsel %vm4389_vm7, %v12699_v15, %v6881_v40  ;;  %v6888_v7 = vsel %vm4389_vm7, %v12700_v50, %v6887_v54  ;;  %v6079_v14 = vsel %vm4389_vm7, %v6078_v11, %v6077_v23  ;;  %v8424_v19 = vrot.slane %v11677_v56, 9 }
 0x542   : > { %v6923_v3 = vsel %vm4441_vm8, 0.0, %v6882_v20  ;;  %v6924_v22 = vsel %vm4441_vm8, 0.0, %v6888_v7  ;;  %v8425_v39 = vrot.slane %v11586_v47, 9  ;;  %v8426_v18 = vrot.slane %v11694_v60, 9 }
 0x543   : > { %v6083_v53 = vpack.c.b16 %v6079_v14, %v6065_v28  ;;  %v8427_v38 = vrot.slane %v11688_v35, 9  ;;  %v8428_v0 = vrot.slane %v11702_v48, 9  ;;  %v8429_v8 = vrot.slane %v11706_v6, 9 }
 0x544   : > { %v8430_v17 = vrot.slane %v11720_v58, 9  ;;  %v8431_v61 = vrot.slane %v11713_v10, 9  ;;  %v8432_v62 = vrot.slane %v11731_v52, 9  ;;  %v8433_v12 = vrot.slane %v11724_v51, 9 }
 0x545   : > { %9246 = vmatmul.mubr.bf16.gmra.mrb[40].mxu1 %v6083_v53  ;;  %v8434_v41 = vrot.slane %v11743_v25, 9  ;;  %v8435_v13 = vrot.slane %v11734_v24, 9  ;;  %v8436_v32 = vrot.slane %v11753_v5, 9  ;;  %v12702_v57 = vrot.slane %v12701_v1, 9 }
 0x546   : > { %v12705_v11 = vpack.c.b16 %v12703_v27, %v12704_v34  ;;  %v12707_v26 = vrot.slane %v12706_v4, 9  ;;  %v7139_v30 = vadd.f32 %v8423_v31, %v11625_v37  ;;  %v7140_v36 = vadd.f32 %v8424_v19, %v11677_v56  ;;  %v6229_v37 = vld [vmem:[%s11508_s27 + $0xa0] sm:$0xff] }
 0x547   : > { %v7137_v43 = vadd.f32 %v12702_v57, %v12701_v1  ;;  %v7141_v59 = vadd.f32 %v8425_v39, %v11586_v47  ;;  %v7142_v45 = vadd.f32 %v8426_v18, %v11694_v60  ;;  %v7143_v21 = vadd.f32 %v8427_v38, %v11688_v35  ;;  %v6230_v60 = vld [vmem:[%s11508_s27 + $0xa8] sm:$0xff]  ;;  %v12092_v35 = vld [vmem:[%s11508_s27 + $0xb8] sm:$0xff] }
 0x548   : > { %9251 = vmatprep.mubr.msk.bf16.mxu1 %vm7862_vm12, %v12705_v11  ;;  %v7138_v9 = vadd.f32 %v12707_v26, %v12706_v4  ;;  %v7144_v2 = vadd.f32 %v8428_v0, %v11702_v48  ;;  %v7145_v63 = vadd.f32 %v8429_v8, %v11706_v6  ;;  %v7146_v56 = vadd.f32 %v8430_v17, %v11720_v58 }
 0x549   : > { %v7147_v47 = vadd.f32 %v8431_v61, %v11713_v10  ;;  %v7148_v55 = vadd.f32 %v8432_v62, %v11731_v52  ;;  %v7149_v40 = vadd.f32 %v8433_v12, %v11724_v51  ;;  %v7150_v48 = vadd.f32 %v8434_v41, %v11743_v25 }
 0x54a   : > { %v7151_v6 = vadd.f32 %v8435_v13, %v11734_v24  ;;  %v7152_v54 = vadd.f32 %v8436_v32, %v11753_v5  ;;  %v7227_v28 = vcombine.high %v6923_v3, %v6923_v3  ;;  %v7234_v58 = vrot.slane %v6923_v3, %v12708_v44 }
 0x54b   : > { %v7244_v15 = vcombine.high %v6924_v22, %v6924_v22  ;;  %v7251_v10 = vrot.slane %v6924_v22, %v12708_v44  ;;  %v6249_v52 = vadd.f32 %v12072_v29, %v6225_v42  ;;  %v12102_v20 = vadd.f32 %v12088_v16, %v6226_v33 }
 0x54c   : > { %v7241_v51 = vrot.slane %v7227_v28, %v12708_v44  ;;  %v12105_v50 = vadd.f32 %v12081_v46, %v6229_v37  ;;  %v12108_v24 = vadd.f32 %v12092_v35, %v6230_v60  ;;  %v7242_v25 = vcombine.high %v7234_v58, %v7234_v58  ;;  %v9705_v37 = vld [vmem:[%s11508_s27 + $0x70] sm:$0xff] }
 0x54d   : > { %v7258_v5 = vrot.slane %v7244_v15, %v12708_v44  ;;  %v7259_v7 = vcombine.high %v7251_v10, %v7251_v10  ;;  %v7337_v23 = vrot.slane %v7234_v58, 1  ;;  %v7341_v31 = vrot.slane %v7251_v10, 1 }
 0x54e   : > { %v7243_v3 = vcombine.high %v7241_v51, %v7241_v51  ;;  %v7339_v22 = vrot.slane %v7241_v51, 1  ;;  %v7441_v14 = vadd.f32 %v7234_v58, %v7137_v43  ;;  %v7338_v39 = vrot.slane %v7242_v25, 1 }
 0x54f   : > { %v7260_v19 = vcombine.high %v7258_v5, %v7258_v5  ;;  %v7342_v18 = vrot.slane %v7259_v7, 1  ;;  %v7343_v53 = vrot.slane %v7258_v5, 1  ;;  %v7442_v0 = vadd.f32 %v7337_v23, %v7138_v9 }
 0x550   : > { %v7340_v38 = vrot.slane %v7243_v3, 1  ;;  %v7443_v8 = vadd.f32 %v7242_v25, %v7139_v30  ;;  %v7445_v17 = vadd.f32 %v7241_v51, %v7141_v59  ;;  %v7444_v62 = vadd.f32 %v7338_v39, %v7140_v36 }
 0x551   : > { %v7344_v61 = vrot.slane %v7260_v19, 1  ;;  %v7446_v12 = vadd.f32 %v7339_v22, %v7142_v45  ;;  %v7447_v41 = vadd.f32 %v7243_v3, %v7143_v21  ;;  %v7449_v32 = vadd.f32 %v7251_v10, %v7145_v63 }
 0x552   : > { %v7448_v13 = vadd.f32 %v7340_v38, %v7144_v2  ;;  %v7450_v1 = vadd.f32 %v7341_v31, %v7146_v56  ;;  %v7451_v57 = vadd.f32 %v7259_v7, %v7147_v47  ;;  %v7452_v27 = vadd.f32 %v7342_v18, %v7148_v55 }
 0x553   : > { %v7453_v34 = vadd.f32 %v7258_v5, %v7149_v40  ;;  %v7454_v43 = vadd.f32 %v7343_v53, %v7150_v48  ;;  %v7455_v11 = vadd.f32 %v7260_v19, %v7151_v6  ;;  %v7456_v4 = vadd.f32 %v7344_v61, %v7152_v54 }
 0x554   : > { %v7505_v26 = vmul.f32 0.33333334, %v7441_v14  ;;  %v7506_v42 = vmul.f32 0.33333334, %v7442_v0  ;;  %v7507_v33 = vmul.f32 0.33333334, %v7443_v8  ;;  %v12112_v36 = vadd.f32 %v9705_v37, %v6249_v52 }
 0x555   : > { %v7508_v9 = vmul.f32 0.33333334, %v7444_v62  ;;  %v7509_v30 = vmul.f32 0.33333334, %v7445_v17  ;;  %v7510_v59 = vmul.f32 0.33333334, %v7446_v12 }
 0x556   : > { %v7511_v45 = vmul.f32 0.33333334, %v7447_v41  ;;  %v7512_v21 = vmul.f32 0.33333334, %v7448_v13  ;;  %v7513_v2 = vmul.f32 0.33333334, %v7449_v32  ;;  %v7569_v63 = vpack.c.bf16 %v7505_v26, %v7505_v26 }
 0x557   : > { %v7514_v56 = vmul.f32 0.33333334, %v7450_v1  ;;  %v7515_v47 = vmul.f32 0.33333334, %v7451_v57  ;;  %v7516_v55 = vmul.f32 0.33333334, %v7452_v27  ;;  %v7570_v40 = vpack.c.bf16 %v7506_v42, %v7506_v42 }
 0x558   : > { %v7517_v60 = vmul.f32 0.33333334, %v7453_v34  ;;  %v7518_v48 = vmul.f32 0.33333334, %v7454_v43  ;;  %v7519_v6 = vmul.f32 0.33333334, %v7455_v11  ;;  %v7571_v54 = vpack.c.bf16 %v7507_v33, %v7507_v33 }
 0x559   : > { %v7520_v28 = vmul.f32 0.33333334, %v7456_v4  ;;  %v7572_v58 = vpack.c.bf16 %v7508_v9, %v7508_v9  ;;  %v7573_v15 = vpack.c.bf16 %v7509_v30, %v7509_v30  ;;  %v7574_v10 = vpack.c.bf16 %v7510_v59, %v7510_v59 }
 0x55a   : > { %v7575_v51 = vpack.c.bf16 %v7511_v45, %v7511_v45  ;;  %v7576_v25 = vpack.c.bf16 %v7512_v21, %v7512_v21  ;;  %v7577_v52 = vpack.c.bf16 %v7513_v2, %v7513_v2  ;;  %v7578_v5 = vpack.c.bf16 %v7514_v56, %v7514_v56 }
 0x55b   : > { %v7579_v7 = vpack.c.bf16 %v7515_v47, %v7515_v47  ;;  %v7580_v23 = vpack.c.bf16 %v7516_v55, %v7516_v55  ;;  %v7581_v3 = vpack.c.bf16 %v7517_v60, %v7517_v60  ;;  %v7582_v22 = vpack.c.bf16 %v7518_v48, %v7518_v48  ;;  %v9706_v60 = vld [vmem:[%s11508_s27 + $0x78] sm:$0xff] }
 0x55c   : > { %v7583_v31 = vpack.c.bf16 %v7519_v6, %v7519_v6  ;;  %v7584_v14 = vpack.c.bf16 %v7520_v28, %v7520_v28  ;;  %v7698_v19 = vunpack.c.l.b16 %v7569_v63  ;;  %v7699_v39 = vunpack.c.l.b16 %v7570_v40 }
 0x55d   : > { %v7700_v18 = vunpack.c.l.b16 %v7571_v54  ;;  %v7701_v53 = vunpack.c.l.b16 %v7572_v58  ;;  %v7702_v38 = vunpack.c.l.b16 %v7573_v15  ;;  %v7703_v0 = vunpack.c.l.b16 %v7574_v10 }
 0x55e   : > { %v7704_v8 = vunpack.c.l.b16 %v7575_v51  ;;  %v7705_v17 = vunpack.c.l.b16 %v7576_v25  ;;  %v7706_v61 = vunpack.c.l.b16 %v7577_v52  ;;  %v7707_v62 = vunpack.c.l.b16 %v7578_v5 }
 0x55f   : > { %v7708_v12 = vunpack.c.l.b16 %v7579_v7  ;;  %v7709_v41 = vunpack.c.l.b16 %v7580_v23  ;;  %v7710_v13 = vunpack.c.l.b16 %v7581_v3  ;;  %v7711_v32 = vunpack.c.l.b16 %v7582_v22 }
 0x560   : > { %v7712_v1 = vunpack.c.l.b16 %v7583_v31  ;;  %v7713_v57 = vunpack.c.l.b16 %v7584_v14  ;;  %v7774_v27 = vrot.slane %v7699_v39, 7  ;;  %v7776_v34 = vrot.slane %v7700_v18, 6 }
 0x561   : > { %v7778_v43 = vrot.slane %v7701_v53, 5  ;;  %v7780_v11 = vrot.slane %v7702_v38, 4  ;;  %v7782_v4 = vrot.slane %v7703_v0, 3  ;;  %v7784_v26 = vrot.slane %v7704_v8, 2 }
 0x562   : > { %v7775_v42 = vsel %vm5394_vm9, %v7774_v27, %v7698_v19  ;;  %v7786_v33 = vrot.slane %v7705_v17, 1  ;;  %v7788_v9 = vrot.slane %v7707_v62, 7  ;;  %v7790_v30 = vrot.slane %v7708_v12, 6 }
 0x563   : > { %v7777_v59 = vsel %vm4379_vm2, %v7776_v34, %v7775_v42  ;;  %v7792_v37 = vrot.slane %v7709_v41, 5  ;;  %v7794_v45 = vrot.slane %v7710_v13, 4  ;;  %v7796_v21 = vrot.slane %v7711_v32, 3 }
 0x564   : > { %v7779_v2 = vsel %vm4381_vm3, %v7778_v43, %v7777_v59  ;;  %v7789_v63 = vsel %vm5394_vm9, %v7788_v9, %v7706_v61  ;;  %v7798_v56 = vrot.slane %v7712_v1, 2  ;;  %v7800_v47 = vrot.slane %v7713_v57, 1 }
 0x565   : > { %v7781_v55 = vsel %vm4383_vm4, %v7780_v11, %v7779_v2  ;;  %v7791_v40 = vsel %vm4379_vm2, %v7790_v30, %v7789_v63  ;;  %v6266_v48 = vadd.f32 %v9706_v60, %v12102_v20  ;;  %v6267_v6 = vadd.f32 %v12105_v50, %v12072_v29 }
 0x566   : > { %v7783_v54 = vsel %vm4385_vm5, %v7782_v4, %v7781_v55  ;;  %v7793_v28 = vsel %vm4381_vm3, %v7792_v37, %v7791_v40  ;;  %v6268_v58 = vadd.f32 %v12108_v24, %v12088_v16  ;;  %v6281_v15 = vmul.f32 0.33333334, %v12112_v36 }
 0x567   : > { %v7785_v10 = vsel %vm4387_vm6, %v7784_v26, %v7783_v54  ;;  %v7795_v51 = vsel %vm4383_vm4, %v7794_v45, %v7793_v28  ;;  %v6282_v25 = vmul.f32 0.33333334, %v6266_v48  ;;  %v6283_v52 = vmul.f32 0.33333334, %v6267_v6 }
 0x568   : > { %v7787_v20 = vsel %vm4389_vm7, %v7786_v33, %v7785_v10  ;;  %v7797_v5 = vsel %vm4385_vm5, %v7796_v21, %v7795_v51  ;;  %v6284_v29 = vmul.f32 0.33333334, %v6268_v58  ;;  %v6441_v50 = vcombine.high %v6281_v15, %v6281_v15 }
 0x569   : > { %v7799_v7 = vsel %vm4387_vm6, %v7798_v56, %v7797_v5  ;;  %v12135_v23 = vrot.slane %v6281_v15, %v12708_v44  ;;  %v6458_v16 = vcombine.high %v6282_v25, %v6282_v25  ;;  %v12138_v24 = vrot.slane %v6282_v25, %v12708_v44 }
 0x56a   : > { %v7801_v36 = vsel %vm4389_vm7, %v7800_v47, %v7799_v7  ;;  %v12142_v3 = vrot.slane %v6441_v50, %v12708_v44  ;;  %v6475_v22 = vcombine.high %v6283_v52, %v6283_v52  ;;  %v12145_v31 = vrot.slane %v6283_v52, %v12708_v44 }
 0x56b   : > { %v7859_v14 = vpack.c.b16 %v7801_v36, %v7787_v20  ;;  %v6456_v19 = vcombine.high %v12135_v23, %v12135_v23  ;;  %v12150_v39 = vrot.slane %v6458_v16, %v12708_v44  ;;  %v6473_v18 = vcombine.high %v12138_v24, %v12138_v24 }
 0x56c   : > { %v6457_v53 = vcombine.high %v12142_v3, %v12142_v3  ;;  %v12157_v38 = vrot.slane %v6475_v22, %v12708_v44  ;;  %v12161_v0 = vcombine.high %v12145_v31, %v12145_v31  ;;  %v6492_v8 = vcombine.high %v6284_v29, %v6284_v29 }
 0x56d   : > { %9252 = vmatmul.mubr.msk.bf16.vlgmr.msra.gmra.mrb[44].mxu1 %vm7862_vm12, %v7859_v14  ;;  %v6474_v17 = vcombine.high %v12150_v39, %v12150_v39  ;;  %v12167_v61 = vrot.slane %v6284_v29, %v12708_v44  ;;  %v6756_v62 = vrot.slane %v12135_v23, %v10463_v49  ;;  %v6760_v12 = vrot.slane %v6456_v19, %v10463_v49 }
 0x56e   : > { %v6491_v41 = vcombine.high %v12157_v38, %v12157_v38  ;;  %v12175_v13 = vrot.slane %v6492_v8, %v12708_v44  ;;  %v6764_v32 = vrot.slane %v12142_v3, %v10463_v49  ;;  %v6768_v1 = vrot.slane %v6457_v53, %v10463_v49 }
 0x56f   : > { %v6507_v57 = vcombine.high %v12167_v61, %v12167_v61  ;;  %v6772_v27 = vrot.slane %v12138_v24, %v10463_v49  ;;  %v6776_v34 = vrot.slane %v6473_v18, %v10463_v49  ;;  %v6780_v43 = vrot.slane %v12150_v39, %v10463_v49 }
 0x570   : > { %v6508_v11 = vcombine.high %v12175_v13, %v12175_v13  ;;  %v6784_v4 = vrot.slane %v12145_v31, %v10463_v49  ;;  %v6788_v26 = vrot.slane %v12161_v0, %v10463_v49  ;;  %v6792_v42 = vrot.slane %v12157_v38, %v10463_v49 }
 0x571   : > { %v6796_v33 = vrot.slane %v6491_v41, %v10463_v49  ;;  %v6800_v9 = vrot.slane %v12167_v61, %v10463_v49  ;;  %v6804_v30 = vrot.slane %v6507_v57, %v10463_v49  ;;  %v6808_v59 = vrot.slane %v12175_v13, %v10463_v49 }
 0x572   : > { %v6889_v37 = vsel %vm4379_vm2, %v6760_v12, %v6756_v62  ;;  %v6895_v45 = vsel %vm4379_vm2, %v6788_v26, %v6784_v4  ;;  %v8437_v21 = vrot.slane %v12135_v23, 9  ;;  %v8438_v2 = vrot.slane %v6456_v19, 9 }
 0x573   : > { %v6890_v63 = vsel %vm4381_vm3, %v6764_v32, %v6889_v37  ;;  %v6896_v56 = vsel %vm4381_vm3, %v6792_v42, %v6895_v45  ;;  %v8439_v47 = vrot.slane %v12142_v3, 9  ;;  %v8440_v55 = vrot.slane %v6457_v53, 9 }
 0x574   : > { %v6891_v40 = vsel %vm4383_vm4, %v6768_v1, %v6890_v63  ;;  %v6897_v60 = vsel %vm4383_vm4, %v6796_v33, %v6896_v56  ;;  %v8441_v48 = vrot.slane %v12138_v24, 9  ;;  %v8442_v6 = vrot.slane %v6473_v18, 9 }
 0x575   : > { %v6892_v54 = vsel %vm4385_vm5, %v6772_v27, %v6891_v40  ;;  %v6898_v28 = vsel %vm4385_vm5, %v6800_v9, %v6897_v60  ;;  %v8443_v58 = vrot.slane %v12150_v39, 9  ;;  %v8444_v15 = vrot.slane %v6474_v17, 9  ;;  %v6234_v9 = vld [vmem:[%s11508_s27 + $0xc8] sm:$0xff] }
 0x576   : > { %v6893_v10 = vsel %vm4387_vm6, %v6776_v34, %v6892_v54  ;;  %v6899_v51 = vsel %vm4387_vm6, %v6804_v30, %v6898_v28  ;;  %v8445_v25 = vrot.slane %v12145_v31, 9  ;;  %v8446_v52 = vrot.slane %v12161_v0, 9  ;;  %v12233_v30 = vld [vmem:[%s11508_s27 + $0xd0] sm:$0xff] }
 0x577   : > { %v6894_v20 = vsel %vm4389_vm7, %v6780_v43, %v6893_v10  ;;  %v6900_v5 = vsel %vm4389_vm7, %v6808_v59, %v6899_v51  ;;  %v8447_v29 = vrot.slane %v12157_v38, 9  ;;  %v8448_v50 = vrot.slane %v6491_v41, 9  ;;  %v6233_v43 = vld [vmem:[%s11508_s27 + $0xc0] sm:$0xff]  ;;  %v12236_v59 = vld [vmem:[%s11508_s27 + $0xd8] sm:$0xff] }
 0x578   : > { %v6925_v7 = vsel %vm4441_vm8, 0.0, %v6894_v20  ;;  %v6926_v16 = vsel %vm4441_vm8, 0.0, %v6900_v5  ;;  %v8449_v36 = vrot.slane %v12167_v61, 9  ;;  %v8450_v22 = vrot.slane %v6507_v57, 9  ;;  %v6237_v20 = vld [vmem:[%s11508_s27 + $0xe0] sm:$0xff]  ;;  %v6239_v5 = vld [vmem:[%s11508_s27 + $0xf0] sm:$0xff] }
 0x579   : > { %v8451_v14 = vrot.slane %v12175_v13, 9  ;;  %v8452_v8 = vrot.slane %v6508_v11, 9  ;;  %v7153_v62 = vadd.f32 %v8437_v21, %v12135_v23  ;;  %v7154_v12 = vadd.f32 %v8438_v2, %v6456_v19 }
 0x57a   : > { %v7155_v32 = vadd.f32 %v8439_v47, %v12142_v3  ;;  %v7156_v1 = vadd.f32 %v8440_v55, %v6457_v53  ;;  %v7157_v27 = vadd.f32 %v8441_v48, %v12138_v24  ;;  %v7158_v34 = vadd.f32 %v8442_v6, %v6473_v18 }
 0x57b   : > { %v7159_v4 = vadd.f32 %v8443_v58, %v12150_v39  ;;  %v7160_v26 = vadd.f32 %v8444_v15, %v6474_v17  ;;  %v7161_v42 = vadd.f32 %v8445_v25, %v12145_v31  ;;  %v7162_v33 = vadd.f32 %v8446_v52, %v12161_v0 }
 0x57c   : > { %v7163_v23 = vadd.f32 %v8447_v29, %v12157_v38  ;;  %v7164_v3 = vadd.f32 %v8448_v50, %v6491_v41  ;;  %v7165_v19 = vadd.f32 %v8449_v36, %v12167_v61  ;;  %v7166_v24 = vadd.f32 %v8450_v22, %v6507_v57 }
 0x57d   : > { %v7167_v18 = vadd.f32 %v8451_v14, %v12175_v13  ;;  %v7168_v53 = vadd.f32 %v8452_v8, %v6508_v11  ;;  %v7261_v39 = vcombine.high %v6925_v7, %v6925_v7  ;;  %v7268_v17 = vrot.slane %v6925_v7, %v12708_v44 }
 0x57e   : > { %v7278_v31 = vcombine.high %v6926_v16, %v6926_v16  ;;  %v7285_v0 = vrot.slane %v6926_v16, %v12708_v44  ;;  %v12244_v37 = vadd.f32 %v12233_v30, %v6233_v43  ;;  %v12247_v45 = vadd.f32 %v12236_v59, %v6234_v9 }
 0x57f   : > { %v7275_v38 = vrot.slane %v7261_v39, %v12708_v44  ;;  %v7276_v41 = vcombine.high %v7268_v17, %v7268_v17  ;;  %v7345_v61 = vrot.slane %v7268_v17, 1  ;;  %v7457_v57 = vadd.f32 %v7268_v17, %v7153_v62 }
 0x580   : > { %v7292_v13 = vrot.slane %v7278_v31, %v12708_v44  ;;  %v7293_v11 = vcombine.high %v7285_v0, %v7285_v0  ;;  %v7349_v21 = vrot.slane %v7285_v0, 1  ;;  %v7465_v2 = vadd.f32 %v7285_v0, %v7161_v42 }
 0x581   : > { %v7277_v63 = vcombine.high %v7275_v38, %v7275_v38  ;;  %v7346_v56 = vrot.slane %v7276_v41, 1  ;;  %v7347_v47 = vrot.slane %v7275_v38, 1  ;;  %v7458_v55 = vadd.f32 %v7345_v61, %v7154_v12 }
 0x582   : > { %v7294_v40 = vcombine.high %v7292_v13, %v7292_v13  ;;  %v7350_v60 = vrot.slane %v7293_v11, 1  ;;  %v7351_v48 = vrot.slane %v7292_v13, 1  ;;  %v7459_v6 = vadd.f32 %v7276_v41, %v7155_v32 }
 0x583   : > { %v7348_v54 = vrot.slane %v7277_v63, 1  ;;  %v7460_v28 = vadd.f32 %v7346_v56, %v7156_v1  ;;  %v7461_v58 = vadd.f32 %v7275_v38, %v7157_v27  ;;  %v7462_v15 = vadd.f32 %v7347_v47, %v7158_v34 }
 0x584   : > { %v7352_v10 = vrot.slane %v7294_v40, 1  ;;  %v7463_v51 = vadd.f32 %v7277_v63, %v7159_v4  ;;  %v7466_v25 = vadd.f32 %v7349_v21, %v7162_v33  ;;  %v7467_v52 = vadd.f32 %v7293_v11, %v7163_v23 }
 0x585   : > { %v7464_v29 = vadd.f32 %v7348_v54, %v7160_v26  ;;  %v7468_v50 = vadd.f32 %v7350_v60, %v7164_v3  ;;  %v7469_v7 = vadd.f32 %v7292_v13, %v7165_v19  ;;  %v7470_v16 = vadd.f32 %v7351_v48, %v7166_v24 }
 0x586   : > { %v7471_v36 = vadd.f32 %v7294_v40, %v7167_v18  ;;  %v7472_v22 = vadd.f32 %v7352_v10, %v7168_v53  ;;  %v7521_v14 = vmul.f32 0.33333334, %v7457_v57  ;;  %v7522_v8 = vmul.f32 0.33333334, %v7458_v55 }
 0x587   : > { %v7523_v62 = vmul.f32 0.33333334, %v7459_v6  ;;  %v7524_v12 = vmul.f32 0.33333334, %v7460_v28  ;;  %v7525_v32 = vmul.f32 0.33333334, %v7461_v58  ;;  %v12253_v1 = vadd.f32 %v6239_v5, %v6237_v20 }
 0x588   : > { %v7526_v27 = vmul.f32 0.33333334, %v7462_v15  ;;  %v7527_v34 = vmul.f32 0.33333334, %v7463_v51  ;;  %v7528_v43 = vmul.f32 0.33333334, %v7464_v29  ;;  %v7585_v4 = vpack.c.bf16 %v7521_v14, %v7521_v14 }
 0x589   : > { %v7529_v42 = vmul.f32 0.33333334, %v7465_v2  ;;  %v7530_v33 = vmul.f32 0.33333334, %v7466_v25  ;;  %v7531_v9 = vmul.f32 0.33333334, %v7467_v52  ;;  %v7586_v26 = vpack.c.bf16 %v7522_v8, %v7522_v8 }
 0x58a   : > { %v7532_v23 = vmul.f32 0.33333334, %v7468_v50  ;;  %v7533_v3 = vmul.f32 0.33333334, %v7469_v7  ;;  %v7534_v19 = vmul.f32 0.33333334, %v7470_v16  ;;  %v7587_v24 = vpack.c.bf16 %v7523_v62, %v7523_v62 }
 0x58b   : > { %v7535_v18 = vmul.f32 0.33333334, %v7471_v36  ;;  %v7536_v53 = vmul.f32 0.33333334, %v7472_v22  ;;  %v7588_v39 = vpack.c.bf16 %v7524_v12, %v7524_v12  ;;  %v7589_v17 = vpack.c.bf16 %v7525_v32, %v7525_v32  ;;  %v6238_v62 = vld [vmem:[%s11508_s27 + $0xe8] sm:$0xff]  ;;  %v6240_v12 = vld [vmem:[%s11508_s27 + $0xf8] sm:$0xff]  ;;  %s12400_s27 = scalar_lea.vmem %s12437_s12, %s8476_s19 }
 0x58c   : > { %v7590_v31 = vpack.c.bf16 %v7526_v27, %v7526_v27  ;;  %v7591_v0 = vpack.c.bf16 %v7527_v34, %v7527_v34  ;;  %v7592_v38 = vpack.c.bf16 %v7528_v43, %v7528_v43  ;;  %v7593_v41 = vpack.c.bf16 %v7529_v42, %v7529_v42 }
 0x58d   : > { %v7594_v61 = vpack.c.bf16 %v7530_v33, %v7530_v33  ;;  %v7595_v57 = vpack.c.bf16 %v7531_v9, %v7531_v9  ;;  %v7596_v13 = vpack.c.bf16 %v7532_v23, %v7532_v23  ;;  %v7597_v11 = vpack.c.bf16 %v7533_v3, %v7533_v3 }
 0x58e   : > { %v7598_v21 = vpack.c.bf16 %v7534_v19, %v7534_v19  ;;  %v7599_v2 = vpack.c.bf16 %v7535_v18, %v7535_v18  ;;  %v7600_v63 = vpack.c.bf16 %v7536_v53, %v7536_v53  ;;  %v7714_v56 = vunpack.c.l.b16 %v7585_v4 }
 0x58f   : > { %v7715_v47 = vunpack.c.l.b16 %v7586_v26  ;;  %v7716_v55 = vunpack.c.l.b16 %v7587_v24  ;;  %v7717_v40 = vunpack.c.l.b16 %v7588_v39  ;;  %v7718_v60 = vunpack.c.l.b16 %v7589_v17 }
 0x590   : > { %v7719_v48 = vunpack.c.l.b16 %v7590_v31  ;;  %v7720_v6 = vunpack.c.l.b16 %v7591_v0  ;;  %v7721_v54 = vunpack.c.l.b16 %v7592_v38  ;;  %v7722_v28 = vunpack.c.l.b16 %v7593_v41 }
 0x591   : > { %v7723_v58 = vunpack.c.l.b16 %v7594_v61  ;;  %v7724_v15 = vunpack.c.l.b16 %v7595_v57  ;;  %v7725_v10 = vunpack.c.l.b16 %v7596_v13  ;;  %v7726_v51 = vunpack.c.l.b16 %v7597_v11 }
 0x592   : > { %v7727_v25 = vunpack.c.l.b16 %v7598_v21  ;;  %v7728_v52 = vunpack.c.l.b16 %v7599_v2  ;;  %v7729_v20 = vunpack.c.l.b16 %v7600_v63  ;;  %v7802_v5 = vrot.slane %v7715_v47, 7 }
 0x593   : > { %v7804_v29 = vrot.slane %v7716_v55, 6  ;;  %v7806_v50 = vrot.slane %v7717_v40, 5  ;;  %v7808_v7 = vrot.slane %v7718_v60, 4  ;;  %v7810_v16 = vrot.slane %v7719_v48, 3 }
 0x594   : > { %v7803_v36 = vsel %vm5394_vm9, %v7802_v5, %v7714_v56  ;;  %v7812_v22 = vrot.slane %v7720_v6, 2  ;;  %v7814_v14 = vrot.slane %v7721_v54, 1  ;;  %v7816_v8 = vrot.slane %v7723_v58, 7 }
 0x595   : > { %v7805_v32 = vsel %vm4379_vm2, %v7804_v29, %v7803_v36  ;;  %v7818_v27 = vrot.slane %v7724_v15, 6  ;;  %v7820_v34 = vrot.slane %v7725_v10, 5  ;;  %v7822_v43 = vrot.slane %v7726_v51, 4 }
 0x596   : > { %v7807_v4 = vsel %vm4381_vm3, %v7806_v50, %v7805_v32  ;;  %v7817_v42 = vsel %vm5394_vm9, %v7816_v8, %v7722_v28  ;;  %v7824_v33 = vrot.slane %v7727_v25, 3  ;;  %v7826_v9 = vrot.slane %v7728_v52, 2 }
 0x597   : > { %v7809_v26 = vsel %vm4383_vm4, %v7808_v7, %v7807_v4  ;;  %v7819_v23 = vsel %vm4379_vm2, %v7818_v27, %v7817_v42  ;;  %v7828_v3 = vrot.slane %v7729_v20, 1  ;;  %v6256_v19 = vadd.f32 %v6240_v12, %v6238_v62 }
 0x598   : > { %v7811_v24 = vsel %vm4385_vm5, %v7810_v16, %v7809_v26  ;;  %v7821_v18 = vsel %vm4381_vm3, %v7820_v34, %v7819_v23  ;;  %v6269_v53 = vadd.f32 %v12244_v37, %v12081_v46  ;;  %v6270_v39 = vadd.f32 %v12247_v45, %v12092_v35 }
 0x599   : > { %v7813_v17 = vsel %vm4387_vm6, %v7812_v22, %v7811_v24  ;;  %v7823_v31 = vsel %vm4383_vm4, %v7822_v43, %v7821_v18  ;;  %v6271_v0 = vadd.f32 %v12253_v1, %v12233_v30  ;;  %v6272_v38 = vadd.f32 %v6256_v19, %v12236_v59 }
 0x59a   : > { %v7815_v41 = vsel %vm4389_vm7, %v7814_v14, %v7813_v17  ;;  %v7825_v61 = vsel %vm4385_vm5, %v7824_v33, %v7823_v31  ;;  %v6285_v57 = vmul.f32 0.33333334, %v6269_v53  ;;  %v6286_v13 = vmul.f32 0.33333334, %v6270_v39 }
 0x59b   : > { %v7827_v46 = vsel %vm4387_vm6, %v7826_v9, %v7825_v61  ;;  %v6287_v37 = vmul.f32 0.33333334, %v6271_v0  ;;  %v6288_v11 = vmul.f32 0.33333334, %v6272_v38 }
 0x59c   : > { %v7829_v35 = vsel %vm4389_vm7, %v7828_v3, %v7827_v46  ;;  %v6509_v45 = vcombine.high %v6285_v57, %v6285_v57  ;;  %v12279_v21 = vrot.slane %v6285_v57, %v12708_v44  ;;  %v6526_v2 = vcombine.high %v6286_v13, %v6286_v13 }
 0x59d   : > { %v7860_v30 = vpack.c.b16 %v7829_v35, %v7815_v41  ;;  %v12282_v59 = vrot.slane %v6286_v13, %v12708_v44  ;;  %v6543_v1 = vcombine.high %v6287_v37, %v6287_v37  ;;  %v12285_v63 = vrot.slane %v6287_v37, %v12708_v44 }
 0x59e   : > { %v6523_v56 = vrot.slane %v6509_v45, %v12708_v44  ;;  %v6524_v47 = vcombine.high %v12279_v21, %v12279_v21  ;;  %v6560_v55 = vcombine.high %v6288_v11, %v6288_v11  ;;  %v12299_v48 = vrot.slane %v6288_v11, %v12708_v44 }
 0x59f   : > { %9255 = vmatprep.mubr.msk.bf16.mxu1 %vm7862_vm12, %v7860_v30  ;;  %v12292_v40 = vrot.slane %v6543_v1, %v12708_v44  ;;  %v12296_v60 = vcombine.high %v12285_v63, %v12285_v63  ;;  %v6540_v54 = vrot.slane %v6526_v2, %v12708_v44  ;;  %v6541_v28 = vcombine.high %v12282_v59, %v12282_v59 }
 0x5a0   : > { %v6525_v6 = vcombine.high %v6523_v56, %v6523_v56  ;;  %v12305_v58 = vrot.slane %v6560_v55, %v12708_v44  ;;  %v6575_v10 = vcombine.high %v12299_v48, %v12299_v48  ;;  %v6812_v51 = vrot.slane %v12279_v21, %v10463_v49 }
 0x5a1   : > { %v6559_v15 = vcombine.high %v12292_v40, %v12292_v40  ;;  %v6816_v25 = vrot.slane %v6524_v47, %v10463_v49  ;;  %v6542_v52 = vcombine.high %v6540_v54, %v6540_v54  ;;  %v6820_v5 = vrot.slane %v6523_v56, %v10463_v49 }
 0x5a2   : > { %v6576_v20 = vcombine.high %v12305_v58, %v12305_v58  ;;  %v6824_v29 = vrot.slane %v6525_v6, %v10463_v49  ;;  %v6840_v50 = vrot.slane %v12285_v63, %v10463_v49  ;;  %v6844_v7 = vrot.slane %v12296_v60, %v10463_v49 }
 0x5a3   : > { %v6848_v16 = vrot.slane %v12292_v40, %v10463_v49  ;;  %v6828_v36 = vrot.slane %v12282_v59, %v10463_v49  ;;  %v6832_v22 = vrot.slane %v6541_v28, %v10463_v49  ;;  %v6852_v14 = vrot.slane %v6559_v15, %v10463_v49 }
 0x5a4   : > { %v6856_v8 = vrot.slane %v12299_v48, %v10463_v49  ;;  %v6836_v62 = vrot.slane %v6540_v54, %v10463_v49  ;;  %v6860_v12 = vrot.slane %v6575_v10, %v10463_v49  ;;  %v6901_v32 = vsel %vm4379_vm2, %v6816_v25, %v6812_v51 }
 0x5a5   : > { %v6907_v27 = vsel %vm4379_vm2, %v6844_v7, %v6840_v50  ;;  %v6864_v34 = vrot.slane %v12305_v58, %v10463_v49  ;;  %v6902_v43 = vsel %vm4381_vm3, %v6820_v5, %v6901_v32  ;;  %v8453_v42 = vrot.slane %v12279_v21, 9 }
 0x5a6   : > { %v6908_v4 = vsel %vm4381_vm3, %v6848_v16, %v6907_v27  ;;  %v6903_v33 = vsel %vm4383_vm4, %v6824_v29, %v6902_v43  ;;  %v8454_v26 = vrot.slane %v6524_v47, 9  ;;  %v8455_v23 = vrot.slane %v6523_v56, 9 }
 0x5a7   : > { %v6909_v9 = vsel %vm4383_vm4, %v6852_v14, %v6908_v4  ;;  %v6904_v3 = vsel %vm4385_vm5, %v6828_v36, %v6903_v33  ;;  %v8456_v24 = vrot.slane %v6525_v6, 9  ;;  %v8457_v18 = vrot.slane %v12282_v59, 9 }
 0x5a8   : > { %v6910_v19 = vsel %vm4385_vm5, %v6856_v8, %v6909_v9  ;;  %v6905_v49 = vsel %vm4387_vm6, %v6832_v22, %v6904_v3  ;;  %v8458_v39 = vrot.slane %v6541_v28, 9  ;;  %v8459_v17 = vrot.slane %v6540_v54, 9 }
 0x5a9   : > { %v6911_v53 = vsel %vm4387_vm6, %v6860_v12, %v6910_v19  ;;  %v6906_v31 = vsel %vm4389_vm7, %v6836_v62, %v6905_v49  ;;  %v8460_v38 = vrot.slane %v6542_v52, 9  ;;  %v8461_v41 = vrot.slane %v12285_v63, 9 }
 0x5aa   : > { %v6912_v0 = vsel %vm4389_vm7, %v6864_v34, %v6911_v53  ;;  %v6927_v61 = vsel %vm4441_vm8, 0.0, %v6906_v31  ;;  %v8462_v57 = vrot.slane %v12296_v60, 9  ;;  %v8463_v13 = vrot.slane %v12292_v40, 9 }
 0x5ab   : > { %v8464_v46 = vrot.slane %v6559_v15, 9  ;;  %v6928_v37 = vsel %vm4441_vm8, 0.0, %v6912_v0  ;;  %v8465_v11 = vrot.slane %v12299_v48, 9  ;;  %v8466_v35 = vrot.slane %v6575_v10, 9 }
 0x5ac   : > { %v8467_v45 = vrot.slane %v12305_v58, 9  ;;  %v8468_v2 = vrot.slane %v6576_v20, 9  ;;  %v7169_v30 = vadd.f32 %v8453_v42, %v12279_v21  ;;  %v7170_v1 = vadd.f32 %v8454_v26, %v6524_v47 }
 0x5ad   : > { %v7171_v55 = vadd.f32 %v8455_v23, %v6523_v56  ;;  %v7172_v51 = vadd.f32 %v8456_v24, %v6525_v6  ;;  %v7173_v25 = vadd.f32 %v8457_v18, %v12282_v59  ;;  %v7174_v5 = vadd.f32 %v8458_v39, %v6541_v28 }
 0x5ae   : > { %v7175_v29 = vadd.f32 %v8459_v17, %v6540_v54  ;;  %v7176_v50 = vadd.f32 %v8460_v38, %v6542_v52  ;;  %v7177_v7 = vadd.f32 %v8461_v41, %v12285_v63  ;;  %v7178_v16 = vadd.f32 %v8462_v57, %v12296_v60 }
 0x5af   : > { %v7179_v36 = vadd.f32 %v8463_v13, %v12292_v40  ;;  %v7180_v22 = vadd.f32 %v8464_v46, %v6559_v15  ;;  %v7181_v14 = vadd.f32 %v8465_v11, %v12299_v48  ;;  %v7295_v8 = vcombine.high %v6927_v61, %v6927_v61 }
 0x5b0   : > { %v7302_v21 = vrot.slane %v6927_v61, %v12708_v44  ;;  %v7182_v47 = vadd.f32 %v8466_v35, %v6575_v10  ;;  %v7183_v56 = vadd.f32 %v8467_v45, %v12305_v58  ;;  %v7312_v6 = vcombine.high %v6928_v37, %v6928_v37 }
 0x5b1   : > { %v7319_v59 = vrot.slane %v6928_v37, %v12708_v44  ;;  %v7184_v54 = vadd.f32 %v8468_v2, %v6576_v20  ;;  %v7309_v28 = vrot.slane %v7295_v8, %v12708_v44 }
 0x5b2   : > { %v7310_v63 = vcombine.high %v7302_v21, %v7302_v21  ;;  %v7353_v52 = vrot.slane %v7302_v21, 1  ;;  %v7326_v60 = vrot.slane %v7312_v6, %v12708_v44  ;;  %v7473_v62 = vadd.f32 %v7302_v21, %v7169_v30 }
 0x5b3   : > { %v7327_v40 = vcombine.high %v7319_v59, %v7319_v59  ;;  %v7357_v15 = vrot.slane %v7319_v59, 1  ;;  %v7311_v48 = vcombine.high %v7309_v28, %v7309_v28  ;;  %v7355_v32 = vrot.slane %v7309_v28, 1 }
 0x5b4   : > { %v7354_v12 = vrot.slane %v7310_v63, 1  ;;  %v7481_v27 = vadd.f32 %v7319_v59, %v7177_v7  ;;  %v7328_v10 = vcombine.high %v7326_v60, %v7326_v60  ;;  %v7359_v58 = vrot.slane %v7326_v60, 1 }
 0x5b5   : > { %v7358_v34 = vrot.slane %v7327_v40, 1  ;;  %v7474_v43 = vadd.f32 %v7353_v52, %v7170_v1  ;;  %v7356_v4 = vrot.slane %v7311_v48, 1  ;;  %v7475_v42 = vadd.f32 %v7310_v63, %v7171_v55 }
 0x5b6   : > { %v7476_v20 = vadd.f32 %v7354_v12, %v7172_v51  ;;  %v7477_v33 = vadd.f32 %v7309_v28, %v7173_v25  ;;  %v7360_v9 = vrot.slane %v7328_v10, 1  ;;  %v7478_v26 = vadd.f32 %v7355_v32, %v7174_v5 }
 0x5b7   : > { %v7479_v23 = vadd.f32 %v7311_v48, %v7175_v29  ;;  %v7482_v3 = vadd.f32 %v7357_v15, %v7178_v16  ;;  %v7480_v44 = vadd.f32 %v7356_v4, %v7176_v50  ;;  %v7483_v19 = vadd.f32 %v7327_v40, %v7179_v36 }
 0x5b8   : > { %v7484_v24 = vadd.f32 %v7358_v34, %v7180_v22  ;;  %v7485_v18 = vadd.f32 %v7326_v60, %v7181_v14  ;;  %v7486_v49 = vadd.f32 %v7359_v58, %v7182_v47  ;;  %v7487_v53 = vadd.f32 %v7328_v10, %v7183_v56 }
 0x5b9   : > { %v7537_v39 = vmul.f32 0.33333334, %v7473_v62  ;;  %v7538_v17 = vmul.f32 0.33333334, %v7474_v43  ;;  %v7488_v31 = vadd.f32 %v7360_v9, %v7184_v54  ;;  %v7539_v0 = vmul.f32 0.33333334, %v7475_v42 }
 0x5ba   : > { %v7540_v38 = vmul.f32 0.33333334, %v7476_v20  ;;  %v7541_v41 = vmul.f32 0.33333334, %v7477_v33  ;;  %v7542_v61 = vmul.f32 0.33333334, %v7478_v26 }
 0x5bb   : > { %v7543_v57 = vmul.f32 0.33333334, %v7479_v23  ;;  %v7544_v13 = vmul.f32 0.33333334, %v7480_v44  ;;  %v7545_v46 = vmul.f32 0.33333334, %v7481_v27  ;;  %v7602_v35 = vpack.c.bf16 %v7538_v17, %v7538_v17 }
 0x5bc   : > { %v7546_v37 = vmul.f32 0.33333334, %v7482_v3  ;;  %v7547_v11 = vmul.f32 0.33333334, %v7483_v19  ;;  %v7548_v45 = vmul.f32 0.33333334, %v7484_v24  ;;  %v7603_v1 = vpack.c.bf16 %v7539_v0, %v7539_v0 }
 0x5bd   : > { %v7549_v2 = vmul.f32 0.33333334, %v7485_v18  ;;  %v7550_v30 = vmul.f32 0.33333334, %v7486_v49  ;;  %v7551_v55 = vmul.f32 0.33333334, %v7487_v53  ;;  %v7604_v25 = vpack.c.bf16 %v7540_v38, %v7540_v38 }
 0x5be   : > { %v7552_v51 = vmul.f32 0.33333334, %v7488_v31  ;;  %v7605_v5 = vpack.c.bf16 %v7541_v41, %v7541_v41  ;;  %v7601_v29 = vpack.c.bf16 %v7537_v39, %v7537_v39  ;;  %v7606_v50 = vpack.c.bf16 %v7542_v61, %v7542_v61 }
 0x5bf   : > { %v7607_v7 = vpack.c.bf16 %v7543_v57, %v7543_v57  ;;  %v7608_v16 = vpack.c.bf16 %v7544_v13, %v7544_v13  ;;  %v7610_v36 = vpack.c.bf16 %v7546_v37, %v7546_v37  ;;  %v7611_v22 = vpack.c.bf16 %v7547_v11, %v7547_v11 }
 0x5c0   : > { %v7612_v14 = vpack.c.bf16 %v7548_v45, %v7548_v45  ;;  %v7613_v8 = vpack.c.bf16 %v7549_v2, %v7549_v2  ;;  %v7609_v21 = vpack.c.bf16 %v7545_v46, %v7545_v46  ;;  %v7614_v47 = vpack.c.bf16 %v7550_v30, %v7550_v30 }
 0x5c1   : > { %v7615_v56 = vpack.c.bf16 %v7551_v55, %v7551_v55  ;;  %v7616_v6 = vpack.c.bf16 %v7552_v51, %v7552_v51  ;;  %v7731_v59 = vunpack.c.l.b16 %v7602_v35  ;;  %v7732_v54 = vunpack.c.l.b16 %v7603_v1  ;;  %v8396_v51 = vld [vmem:[%s12434_s9] ss:$0 sm:$0xff] }
 0x5c2   : > { %v7733_v28 = vunpack.c.l.b16 %v7604_v25  ;;  %v7734_v63 = vunpack.c.l.b16 %v7605_v5  ;;  %v7730_v52 = vunpack.c.l.b16 %v7601_v29  ;;  %v7735_v60 = vunpack.c.l.b16 %v7606_v50 }
 0x5c3   : > { %v7736_v40 = vunpack.c.l.b16 %v7607_v7  ;;  %v7737_v15 = vunpack.c.l.b16 %v7608_v16  ;;  %v7739_v62 = vunpack.c.l.b16 %v7610_v36  ;;  %v7740_v48 = vunpack.c.l.b16 %v7611_v22 }
 0x5c4   : > { %v7741_v12 = vunpack.c.l.b16 %v7612_v14  ;;  %v7742_v32 = vunpack.c.l.b16 %v7613_v8  ;;  %v7738_v27 = vunpack.c.l.b16 %v7609_v21  ;;  %v7743_v10 = vunpack.c.l.b16 %v7614_v47  ;;  %v7946_v21 = vld [vmem:[%s12436_s11 + $0x10] sm:$0xff] }
 0x5c5   : > { %v7744_v34 = vunpack.c.l.b16 %v7615_v56  ;;  %v7830_v58 = vrot.slane %v7731_v59, 7  ;;  %v7745_v43 = vunpack.c.l.b16 %v7616_v6  ;;  %v7832_v4 = vrot.slane %v7732_v54, 6  ;;  %v7944_v56 = vld [vmem:[%s12436_s11] sm:$0xff]  ;;  %v7947_v54 = vld [vmem:[%s12436_s11 + $0x18] sm:$0xff] }
 0x5c6   : > { %v7834_v42 = vrot.slane %v7733_v28, 5  ;;  %v7836_v20 = vrot.slane %v7734_v63, 4  ;;  %v7838_v9 = vrot.slane %v7735_v60, 3  ;;  %v7840_v26 = vrot.slane %v7736_v40, 2  ;;  %v7945_v60 = vld [vmem:[%s12436_s11 + $0x8] sm:$0xff] }
 0x5c7   : > { %v7831_v33 = vsel %vm5394_vm9, %v7830_v58, %v7730_v52  ;;  %v7844_v23 = vrot.slane %v7739_v62, 7  ;;  %v7846_v44 = vrot.slane %v7740_v48, 6  ;;  %v7848_v19 = vrot.slane %v7741_v12, 5 }
 0x5c8   : > { %v7833_v3 = vsel %vm4379_vm2, %v7832_v4, %v7831_v33  ;;  %v7850_v24 = vrot.slane %v7742_v32, 4  ;;  %v7842_v49 = vrot.slane %v7737_v15, 1  ;;  %v7852_v39 = vrot.slane %v7743_v10, 3 }
 0x5c9   : > { %v7835_v18 = vsel %vm4381_vm3, %v7834_v42, %v7833_v3  ;;  %v7845_v53 = vsel %vm5394_vm9, %v7844_v23, %v7738_v27  ;;  %v7854_v0 = vrot.slane %v7744_v34, 2  ;;  %v7856_v61 = vrot.slane %v7745_v43, 1  ;;  %v7948_v23 = vld [vmem:[%s12436_s11 + $0x20] sm:$0xff] }
 0x5ca   : > { %v7837_v17 = vsel %vm4383_vm4, %v7836_v20, %v7835_v18  ;;  %v7847_v31 = vsel %vm4379_vm2, %v7846_v44, %v7845_v53  ;;  %v7951_v44 = vld [vmem:[%s12436_s11 + $0x38] sm:$0xff] }
 0x5cb   : > { %v7839_v38 = vsel %vm4385_vm5, %v7838_v9, %v7837_v17  ;;  %v7849_v41 = vsel %vm4381_vm3, %v7848_v19, %v7847_v31 }
 0x5cc   : > { %v7841_v57 = vsel %vm4387_vm6, %v7840_v26, %v7839_v38  ;;  %v7851_v13 = vsel %vm4383_vm4, %v7850_v24, %v7849_v41  ;;  %v7950_v26 = vld [vmem:[%s12436_s11 + $0x30] sm:$0xff] }
 0x5cd   : > { %v7843_v46 = vsel %vm4389_vm7, %v7842_v49, %v7841_v57  ;;  %v7853_v37 = vsel %vm4385_vm5, %v7852_v39, %v7851_v13  ;;  %v7949_v49 = vld [vmem:[%s12436_s11 + $0x28] sm:$0xff] }
 0x5ce   : > { %v7855_v11 = vsel %vm4387_vm6, %v7854_v0, %v7853_v37 }
 0x5cf   : > { %v7857_v35 = vsel %vm4389_vm7, %v7856_v61, %v7855_v11 }
 0x5d0   : > { %v7861_v45 = vpack.c.b16 %v7857_v35, %v7843_v46 }
 0x5d2   : > { %9256 = vmatmul.mubr.msk.bf16.gmra.mrb[48].mxu1 %vm7862_vm12, %v7861_v45 }
 0x5f0   : > { %v9243_v2 = vpop.f32.mrb[36].mxu1 }
 0x5f1   : > { %v6170_v30 = vpop.f32.mrb[37].mxu1  ;;  %v6179_v14 = vadd.f32 %v9243_v2, %v8396_v51 }
 0x5f2   : > { %v9244_v1 = vpop.f32.mrb[38].mxu1  ;;  %v6171_v8 = vadd.f32 %v8396_v51, %v6170_v30 }
 0x5f3   : > { %v6173_v55 = vpop.f32.mrb[39].mxu1  ;;  %v6182_v47 = vadd.f32 %v9244_v1, %v8396_v51  ;;  %v6203_v28 = vmax.f32 %v6179_v14, 0.0 }
 0x5f4   : > { %v6174_v6 = vadd.f32 %v8396_v51, %v6173_v55  ;;  %v6201_v40 = vmax.f32 %v6171_v8, 0.0 }
 0x5f5   : > { %v6204_v48 = vmax.f32 %v6182_v47, 0.0 }
 0x5f6   : > { %v6202_v10 = vmax.f32 %v6174_v6, 0.0 }
 0x618   : > { %v9247_v25 = vpop.f32.mrb[40].mxu1 }
 0x619   : > { %v6195_v5 = vadd.f32 %v9247_v25, %v8396_v51  ;;  %v6186_v29 = vpop.f32.mrb[41].mxu1 }
 0x61a   : > { %v6187_v50 = vadd.f32 %v8396_v51, %v6186_v29  ;;  %v9248_v7 = vpop.f32.mrb[42].mxu1 }
 0x61b   : > { %v6198_v16 = vadd.f32 %v9248_v7, %v8396_v51  ;;  %v6189_v36 = vpop.f32.mrb[43].mxu1  ;;  %v6207_v19 = vmax.f32 %v6195_v5, 0.0 }
 0x61c   : > { %v6190_v22 = vadd.f32 %v8396_v51, %v6189_v36  ;;  %v6205_v53 = vmax.f32 %v6187_v50, 0.0 }
 0x61d   : > { %v6208_v31 = vmax.f32 %v6198_v16, 0.0 }
 0x61e   : > { %v6206_v61 = vmax.f32 %v6190_v22, 0.0 }
 0x640   : > { %v9253_v59 = vpop.f32.mrb[44].mxu1 }
 0x641   : > { %v7954_v63 = vadd.f32 %v9253_v59, %v7946_v21  ;;  %v7913_v52 = vpop.f32.mrb[45].mxu1 }
 0x642   : > { %v7952_v15 = vadd.f32 %v7944_v56, %v7913_v52  ;;  %v9254_v62 = vpop.f32.mrb[46].mxu1 }
 0x643   : > { %v7962_v12 = vadd.f32 %v7954_v63, %v6203_v28  ;;  %v7955_v32 = vadd.f32 %v9254_v62, %v7947_v54  ;;  %v7916_v27 = vpop.f32.mrb[47].mxu1 }
 0x644   : > { %v7960_v34 = vadd.f32 %v7952_v15, %v6201_v40  ;;  %v7953_v58 = vadd.f32 %v7945_v60, %v7916_v27 }
 0x645   : > { %v7970_v43 = vmul.f32 0.5, %v7962_v12  ;;  %v7963_v4 = vadd.f32 %v7955_v32, %v6204_v48 }
 0x646   : > { %v7968_v42 = vmul.f32 0.5, %v7960_v34  ;;  %v7961_v20 = vadd.f32 %v7953_v58, %v6202_v10 }
 0x647   : > { %7978 = vst [vmem:[%s12400_s27 + $0x10] sm:$0xff] %v7970_v43  ;;  %v7971_v33 = vmul.f32 0.5, %v7963_v4 }
 0x648   : > { %7976 = vst [vmem:[%s12400_s27] sm:$0xff] %v7968_v42  ;;  %v7969_v9 = vmul.f32 0.5, %v7961_v20 }
 0x649   : > { %7979 = vst [vmem:[%s12400_s27 + $0x18] sm:$0xff] %v7971_v33 }
 0x64a   : > { %7977 = vst [vmem:[%s12400_s27 + $0x8] sm:$0xff] %v7969_v9 }
 0x6a5   : > { %v9257_v3 = vpop.f32.mrb[48].mxu1 }
 0x6a6   : > { %v7958_v24 = vadd.f32 %v9257_v3, %v7950_v26  ;;  %v7929_v18 = vpop.f32.mrb[49].mxu1 }
 0x6a7   : > { %v7956_v39 = vadd.f32 %v7948_v23, %v7929_v18  ;;  %v9258_v17 = vpop.f32.mrb[50].mxu1 }
 0x6a8   : > { %v7966_v0 = vadd.f32 %v7958_v24, %v6207_v19  ;;  %v7959_v38 = vadd.f32 %v9258_v17, %v7951_v44  ;;  %v7932_v41 = vpop.f32.mrb[51].mxu1 }
 0x6a9   : > { %v7964_v57 = vadd.f32 %v7956_v39, %v6205_v53  ;;  %v7957_v13 = vadd.f32 %v7949_v49, %v7932_v41 }
 0x6aa   : > { %v7974_v46 = vmul.f32 0.5, %v7966_v0  ;;  %v7967_v37 = vadd.f32 %v7959_v38, %v6208_v31 }
 0x6ab   : > { %v7972_v11 = vmul.f32 0.5, %v7964_v57  ;;  %v7965_v35 = vadd.f32 %v7957_v13, %v6206_v61 }
 0x6ac   : > { %7982 = vst [vmem:[%s12400_s27 + $0x30] sm:$0xff] %v7974_v46  ;;  %v7975_v45 = vmul.f32 0.5, %v7967_v37 }
 0x6ad   : > { %7980 = vst [vmem:[%s12400_s27 + $0x20] sm:$0xff] %v7972_v11  ;;  %v7973_v2 = vmul.f32 0.5, %v7965_v35 }
 0x6ae   : > { %7983 = vst [vmem:[%s12400_s27 + $0x38] sm:$0xff] %v7975_v45 }
 0x6af   : > { %7981 = vst [vmem:[%s12400_s27 + $0x28] sm:$0xff] %v7973_v2 }
 0x6b0 PF: > { %s22_s21 = sadd.s32 1, %s9713_s21  }
 0x6b1   : > { %p19_p4 = scmp.ge.s32.totalorder %s22_s21, 4  }
 0x6b3   :  { %21 = sbr.rel (!%p19_p4) target bundleno = 1 (0x1), region = 111 }

</bundles_post_ra>
